<compile_context>
chip_gen: v7x
topology: tpu7x:2x2x1
jax: 0.10.0
libtpu: 0.0.40
codegen_flags: <defaults>
</compile_context>

<pallas_src>
import functools

import jax
import jax.numpy as jnp
from jax.experimental import pallas as pl
from jax.experimental.pallas import tpu as pltpu


def resblock_kernel(xpad_ref, w1_ref, b1_ref, w2_ref, b2_ref,
                    out_ref, col_ref, midpad_ref, *, ksize, res_scale):
    """One image per grid step.

    xpad_ref   : (1, H+2p, W+2p, C) zero-padded input (conv1 source + residual)
    w1_ref     : (K*K*C, C)         conv1 im2col weight matrix
    b1_ref     : (1, C)             conv1 bias
    w2_ref     : (K*K*C, C)         conv2 im2col weight matrix
    b2_ref     : (1, C)             conv2 bias
    out_ref    : (1, H, W, C)
    col_ref    : (H*W, K*K*C)       scratch: im2col patch matrix (reused)
    midpad_ref : (H+2p, W+2p, C)    scratch: zero-padded ReLU(conv1) output
    """
    _, H, W, C = out_ref.shape
    K = ksize
    pad = K // 2
    Wp = W + 2 * pad
    f32 = jnp.float32

    # ---- im2col for conv1 directly from the zero-padded input --------------
    for kh in range(K):
        for kw in range(K):
            tap = kh * K + kw
            col_ref[:, tap * C:(tap + 1) * C] = (
                xpad_ref[0, kh:kh + H, kw:kw + W, :].reshape(H * W, C))

    # ---- conv1 as one MXU matmul, then bias + ReLU (f32 accumulate) --------
    h1 = jnp.dot(col_ref[...], w1_ref[...], preferred_element_type=f32)
    h1 = jnp.maximum(h1 + b1_ref[...].astype(f32), 0.0)
    h1_cast = h1.astype(midpad_ref.dtype)

    # ---- padded intermediate: zero only the thin border, write interior ----
    zdt = midpad_ref.dtype
    midpad_ref[0:pad, :, :] = jnp.zeros((pad, Wp, C), zdt)
    midpad_ref[pad + H:, :, :] = jnp.zeros((pad, Wp, C), zdt)
    midpad_ref[pad:pad + H, 0:pad, :] = jnp.zeros((H, pad, C), zdt)
    midpad_ref[pad:pad + H, pad + W:, :] = jnp.zeros((H, pad, C), zdt)
    midpad_ref[pad:pad + H, pad:pad + W, :] = h1_cast.reshape(H, W, C)

    # ---- im2col for conv2 (reuses the same col scratch) --------------------
    for kh in range(K):
        for kw in range(K):
            tap = kh * K + kw
            if kh == pad and kw == pad:
                # Centre tap is exactly ReLU(conv1) -> write from registers,
                # skip one strided VMEM read of the padded intermediate.
                col_ref[:, tap * C:(tap + 1) * C] = h1_cast
            else:
                col_ref[:, tap * C:(tap + 1) * C] = (
                    midpad_ref[kh:kh + H, kw:kw + W, :].reshape(H * W, C))

    # ---- conv2 as one MXU matmul + bias -------------------------------------
    h2 = jnp.dot(col_ref[...], w2_ref[...], preferred_element_type=f32)
    h2 = h2 + b2_ref[...].astype(f32)

    # ---- residual from the interior of the padded input (no extra copy) ----
    x_int = xpad_ref[0, pad:pad + H, pad:pad + W, :].reshape(H * W, C)
    if res_scale != 1.0:                      # static: skip the mul when 1.0
        h2 = h2 * f32(res_scale)
    res = h2 + x_int.astype(f32)

    out_ref[...] = res.reshape(out_ref.shape).astype(out_ref.dtype)


def resblock_forward(x_nchw, w1_oihw, b1, w2_oihw, b2, *, res_scale=1.0):
    """x_nchw: (N, C, H, W); w*_oihw: (Cout, Cin, K, K); b*: (C,)."""
    N, C, H, W = x_nchw.shape
    K = w1_oihw.shape[-1]
    pad = K // 2
    Hp, Wp = H + 2 * pad, W + 2 * pad

    # NCHW -> NHWC (channels-last is the TPU-friendly layout), pad once.
    x = jnp.transpose(x_nchw, (0, 2, 3, 1))
    xpad = jnp.pad(x, ((0, 0), (pad, pad), (pad, pad), (0, 0)))

    # OIHW -> HWIO -> (K*K*Cin, Cout) im2col weight matrices (host side).
    w1m = jnp.transpose(w1_oihw, (2, 3, 1, 0)).reshape(K * K * C, C)
    w2m = jnp.transpose(w2_oihw, (2, 3, 1, 0)).reshape(K * K * C, C)
    b1_2d = b1.reshape(1, C)
    b2_2d = b2.reshape(1, C)

    kernel = functools.partial(resblock_kernel, ksize=K, res_scale=res_scale)

    itemsize = x.dtype.itemsize
    flops = N * 2 * (2 * H * W * C * C * K * K)      # two convs, MAC = 2 flops
    bytes_accessed = (xpad.size * itemsize            # padded input read
                      + N * H * W * C * itemsize      # output write
                      + 2 * (K * K * C * C + C) * itemsize)  # weights + biases

    out_nhwc = pl.pallas_call(
        kernel,
        out_shape=jax.ShapeDtypeStruct((N, H, W, C), x.dtype),
        grid_spec=pltpu.PrefetchScalarGridSpec(
            num_scalar_prefetch=0,
            grid=(N,),
            in_specs=[
                pl.BlockSpec((1, Hp, Wp, C), lambda n: (n, 0, 0, 0)),
                pl.BlockSpec((K * K * C, C), lambda n: (0, 0)),
                pl.BlockSpec((1, C), lambda n: (0, 0)),
                pl.BlockSpec((K * K * C, C), lambda n: (0, 0)),
                pl.BlockSpec((1, C), lambda n: (0, 0)),
            ],
            out_specs=pl.BlockSpec((1, H, W, C), lambda n: (n, 0, 0, 0)),
            scratch_shapes=[
                pltpu.VMEM((H * W, K * K * C), x.dtype),   # im2col patches
                pltpu.VMEM((Hp, Wp, C), x.dtype),          # padded ReLU(conv1)
            ],
        ),
        compiler_params=pltpu.CompilerParams(
            dimension_semantics=("parallel",),
            vmem_limit_bytes=32 * 1024 * 1024),
        cost_estimate=pl.CostEstimate(flops=flops, transcendentals=0,
                                      bytes_accessed=bytes_accessed),
    )(xpad, w1m, b1_2d, w2m, b2_2d)

    # NHWC -> NCHW to match the PyTorch module's interface.
    return jnp.transpose(out_nhwc, (0, 3, 1, 2))


# ----------------------------- reference ------------------------------------
def _conv_same_nchw_ref(x, w, b):
    y = jax.lax.conv_general_dilated(
        x, w, window_strides=(1, 1), padding="SAME",
        dimension_numbers=("NCHW", "OIHW", "NCHW"))
    return y + b.reshape(1, -1, 1, 1)


def _resblock_ref(x, w1, b1, w2, b2, res_scale):
    h = jax.nn.relu(_conv_same_nchw_ref(x, w1, b1))
    return _conv_same_nchw_ref(h, w2, b2) * res_scale + x


if __name__ == "__main__":
    # Small shapes consistent with the module: n_feats=4, kernel_size=3.
    N, C, H, W, K = 2, 4, 16, 16, 3
    res_scale = 1.0

    key = jax.random.PRNGKey(0)
    kx, kw1, kb1, kw2, kb2 = jax.random.split(key, 5)

    x = jax.random.normal(kx, (N, C, H, W), dtype=jnp.float32)
    w1 = 0.1 * jax.random.normal(kw1, (C, C, K, K), dtype=jnp.float32)
    b1 = 0.1 * jax.random.normal(kb1, (C,), dtype=jnp.float32)
    w2 = 0.1 * jax.random.normal(kw2, (C, C, K, K), dtype=jnp.float32)
    b2 = 0.1 * jax.random.normal(kb2, (C,), dtype=jnp.float32)

    out = resblock_forward(x, w1, b1, w2, b2, res_scale=res_scale)
    out = jax.block_until_ready(out)

    ref = _resblock_ref(x, w1, b1, w2, b2, res_scale)
    max_err = float(jnp.max(jnp.abs(out - ref)))
    assert max_err < 1e-4, f"mismatch vs reference: {max_err}"

    print("KERNEL_OK")
</pallas_src>

<mosaic_0001>
module attributes {stable_mosaic.version = 11 : i64} {
  func.func @resblock_kernel(%arg0: i32, %arg1: memref<1x18x18x4xf32, #tpu.memory_space<vmem>>, %arg2: memref<36x4xf32, #tpu.memory_space<vmem>>, %arg3: memref<1x4xf32, #tpu.memory_space<vmem>>, %arg4: memref<36x4xf32, #tpu.memory_space<vmem>>, %arg5: memref<1x4xf32, #tpu.memory_space<vmem>>, %arg6: memref<1x16x16x4xf32, #tpu.memory_space<vmem>>, %arg7: memref<256x36xf32, #tpu.memory_space<vmem>>, %arg8: memref<18x18x4xf32, #tpu.memory_space<vmem>>) attributes {dimension_semantics = [#tpu.dimension_semantics<parallel>], iteration_bounds = array<i64: 2>, scalar_prefetch = 0 : i64, scratch_operands = 2 : i64, tpu.core_type = #tpu.core_type<tc>, window_params = [{transform_indices = @transform_0, window_bounds = array<i64: 1, 18, 18, 4>}, {pipeline_mode = #tpu.pipeline_mode<synchronous>, transform_indices = @transform_1, window_bounds = array<i64: 36, 4>}, {pipeline_mode = #tpu.pipeline_mode<synchronous>, transform_indices = @transform_2, window_bounds = array<i64: 1, 4>}, {pipeline_mode = #tpu.pipeline_mode<synchronous>, transform_indices = @transform_3, window_bounds = array<i64: 36, 4>}, {pipeline_mode = #tpu.pipeline_mode<synchronous>, transform_indices = @transform_4, window_bounds = array<i64: 1, 4>}, {transform_indices = @transform_5, window_bounds = array<i64: 1, 16, 16, 4>}]} {
    %c0 = arith.constant 0 : index
    %c0_0 = arith.constant 0 : index
    %c0_1 = arith.constant 0 : index
    %c0_2 = arith.constant 0 : index
    %0 = vector.load %arg1[%c0, %c0_0, %c0_1, %c0_2] : memref<1x18x18x4xf32, #tpu.memory_space<vmem>>, vector<1x16x16x4xf32>
    %1 = vector.shape_cast %0 : vector<1x16x16x4xf32> to vector<16x16x4xf32>
    %2 = vector.shape_cast %1 : vector<16x16x4xf32> to vector<256x4xf32>
    %c0_3 = arith.constant 0 : index
    %c0_4 = arith.constant 0 : index
    %3 = vector.load %arg7[%c0_3, %c0_4] : memref<256x36xf32, #tpu.memory_space<vmem>>, vector<256x4xf32>
    tpu.vector_store %arg7[%c0_3, %c0_4], %2 {strides = array<i32>} : memref<256x36xf32, #tpu.memory_space<vmem>>, vector<256x4xf32>,
    %c0_5 = arith.constant 0 : index
    %c0_6 = arith.constant 0 : index
    %c1 = arith.constant 1 : index
    %c0_7 = arith.constant 0 : index
    %4 = vector.load %arg1[%c0_5, %c0_6, %c1, %c0_7] : memref<1x18x18x4xf32, #tpu.memory_space<vmem>>, vector<1x16x16x4xf32>
    %5 = vector.shape_cast %4 : vector<1x16x16x4xf32> to vector<16x16x4xf32>
    %6 = vector.shape_cast %5 : vector<16x16x4xf32> to vector<256x4xf32>
    %c0_8 = arith.constant 0 : index
    %c4 = arith.constant 4 : index
    %7 = vector.load %arg7[%c0_8, %c4] : memref<256x36xf32, #tpu.memory_space<vmem>>, vector<256x4xf32>
    tpu.vector_store %arg7[%c0_8, %c4], %6 {strides = array<i32>} : memref<256x36xf32, #tpu.memory_space<vmem>>, vector<256x4xf32>,
    %c0_9 = arith.constant 0 : index
    %c0_10 = arith.constant 0 : index
    %c2 = arith.constant 2 : index
    %c0_11 = arith.constant 0 : index
    %8 = vector.load %arg1[%c0_9, %c0_10, %c2, %c0_11] : memref<1x18x18x4xf32, #tpu.memory_space<vmem>>, vector<1x16x16x4xf32>
    %9 = vector.shape_cast %8 : vector<1x16x16x4xf32> to vector<16x16x4xf32>
    %10 = vector.shape_cast %9 : vector<16x16x4xf32> to vector<256x4xf32>
    %c0_12 = arith.constant 0 : index
    %c8 = arith.constant 8 : index
    %11 = vector.load %arg7[%c0_12, %c8] : memref<256x36xf32, #tpu.memory_space<vmem>>, vector<256x4xf32>
    tpu.vector_store %arg7[%c0_12, %c8], %10 {strides = array<i32>} : memref<256x36xf32, #tpu.memory_space<vmem>>, vector<256x4xf32>,
    %c0_13 = arith.constant 0 : index
    %c1_14 = arith.constant 1 : index
    %c0_15 = arith.constant 0 : index
    %c0_16 = arith.constant 0 : index
    %12 = vector.load %arg1[%c0_13, %c1_14, %c0_15, %c0_16] : memref<1x18x18x4xf32, #tpu.memory_space<vmem>>, vector<1x16x16x4xf32>
    %13 = vector.shape_cast %12 : vector<1x16x16x4xf32> to vector<16x16x4xf32>
    %14 = vector.shape_cast %13 : vector<16x16x4xf32> to vector<256x4xf32>
    %c0_17 = arith.constant 0 : index
    %c12 = arith.constant 12 : index
    %15 = vector.load %arg7[%c0_17, %c12] : memref<256x36xf32, #tpu.memory_space<vmem>>, vector<256x4xf32>
    tpu.vector_store %arg7[%c0_17, %c12], %14 {strides = array<i32>} : memref<256x36xf32, #tpu.memory_space<vmem>>, vector<256x4xf32>,
    %c0_18 = arith.constant 0 : index
    %c1_19 = arith.constant 1 : index
    %c1_20 = arith.constant 1 : index
    %c0_21 = arith.constant 0 : index
    %16 = vector.load %arg1[%c0_18, %c1_19, %c1_20, %c0_21] : memref<1x18x18x4xf32, #tpu.memory_space<vmem>>, vector<1x16x16x4xf32>
    %17 = vector.shape_cast %16 : vector<1x16x16x4xf32> to vector<16x16x4xf32>
    %18 = vector.shape_cast %17 : vector<16x16x4xf32> to vector<256x4xf32>
    %c0_22 = arith.constant 0 : index
    %c16 = arith.constant 16 : index
    %19 = vector.load %arg7[%c0_22, %c16] : memref<256x36xf32, #tpu.memory_space<vmem>>, vector<256x4xf32>
    tpu.vector_store %arg7[%c0_22, %c16], %18 {strides = array<i32>} : memref<256x36xf32, #tpu.memory_space<vmem>>, vector<256x4xf32>,
    %c0_23 = arith.constant 0 : index
    %c1_24 = arith.constant 1 : index
    %c2_25 = arith.constant 2 : index
    %c0_26 = arith.constant 0 : index
    %20 = vector.load %arg1[%c0_23, %c1_24, %c2_25, %c0_26] : memref<1x18x18x4xf32, #tpu.memory_space<vmem>>, vector<1x16x16x4xf32>
    %21 = vector.shape_cast %20 : vector<1x16x16x4xf32> to vector<16x16x4xf32>
    %22 = vector.shape_cast %21 : vector<16x16x4xf32> to vector<256x4xf32>
    %c0_27 = arith.constant 0 : index
    %c20 = arith.constant 20 : index
    %23 = vector.load %arg7[%c0_27, %c20] : memref<256x36xf32, #tpu.memory_space<vmem>>, vector<256x4xf32>
    tpu.vector_store %arg7[%c0_27, %c20], %22 {strides = array<i32>} : memref<256x36xf32, #tpu.memory_space<vmem>>, vector<256x4xf32>,
    %c0_28 = arith.constant 0 : index
    %c2_29 = arith.constant 2 : index
    %c0_30 = arith.constant 0 : index
    %c0_31 = arith.constant 0 : index
    %24 = vector.load %arg1[%c0_28, %c2_29, %c0_30, %c0_31] : memref<1x18x18x4xf32, #tpu.memory_space<vmem>>, vector<1x16x16x4xf32>
    %25 = vector.shape_cast %24 : vector<1x16x16x4xf32> to vector<16x16x4xf32>
    %26 = vector.shape_cast %25 : vector<16x16x4xf32> to vector<256x4xf32>
    %c0_32 = arith.constant 0 : index
    %c24 = arith.constant 24 : index
    %27 = vector.load %arg7[%c0_32, %c24] : memref<256x36xf32, #tpu.memory_space<vmem>>, vector<256x4xf32>
    tpu.vector_store %arg7[%c0_32, %c24], %26 {strides = array<i32>} : memref<256x36xf32, #tpu.memory_space<vmem>>, vector<256x4xf32>,
    %c0_33 = arith.constant 0 : index
    %c2_34 = arith.constant 2 : index
    %c1_35 = arith.constant 1 : index
    %c0_36 = arith.constant 0 : index
    %28 = vector.load %arg1[%c0_33, %c2_34, %c1_35, %c0_36] : memref<1x18x18x4xf32, #tpu.memory_space<vmem>>, vector<1x16x16x4xf32>
    %29 = vector.shape_cast %28 : vector<1x16x16x4xf32> to vector<16x16x4xf32>
    %30 = vector.shape_cast %29 : vector<16x16x4xf32> to vector<256x4xf32>
    %c0_37 = arith.constant 0 : index
    %c28 = arith.constant 28 : index
    %31 = vector.load %arg7[%c0_37, %c28] : memref<256x36xf32, #tpu.memory_space<vmem>>, vector<256x4xf32>
    tpu.vector_store %arg7[%c0_37, %c28], %30 {strides = array<i32>} : memref<256x36xf32, #tpu.memory_space<vmem>>, vector<256x4xf32>,
    %c0_38 = arith.constant 0 : index
    %c2_39 = arith.constant 2 : index
    %c2_40 = arith.constant 2 : index
    %c0_41 = arith.constant 0 : index
    %32 = vector.load %arg1[%c0_38, %c2_39, %c2_40, %c0_41] : memref<1x18x18x4xf32, #tpu.memory_space<vmem>>, vector<1x16x16x4xf32>
    %33 = vector.shape_cast %32 : vector<1x16x16x4xf32> to vector<16x16x4xf32>
    %34 = vector.shape_cast %33 : vector<16x16x4xf32> to vector<256x4xf32>
    %c0_42 = arith.constant 0 : index
    %c32 = arith.constant 32 : index
    %35 = vector.load %arg7[%c0_42, %c32] : memref<256x36xf32, #tpu.memory_space<vmem>>, vector<256x4xf32>
    tpu.vector_store %arg7[%c0_42, %c32], %34 {strides = array<i32>} : memref<256x36xf32, #tpu.memory_space<vmem>>, vector<256x4xf32>,
    %c0_43 = arith.constant 0 : index
    %c0_44 = arith.constant 0 : index
    %36 = vector.load %arg7[%c0_43, %c0_44] : memref<256x36xf32, #tpu.memory_space<vmem>>, vector<256x36xf32>
    %c0_45 = arith.constant 0 : index
    %c0_46 = arith.constant 0 : index
    %37 = vector.load %arg2[%c0_45, %c0_46] : memref<36x4xf32, #tpu.memory_space<vmem>>, vector<36x4xf32>
    %cst = arith.constant dense<0.000000e+00> : vector<256x4xf32>
    %38 = tpu.matmul %36, %37, %cst {dimension_numbers = #tpu.dot_dimension_numbers<[1], [0], [0], [1], [0, 0, 1, 1], [], []>} : vector<256x36xf32>, vector<36x4xf32>, vector<256x4xf32> -> vector<256x4xf32>
    %c0_47 = arith.constant 0 : index
    %c0_48 = arith.constant 0 : index
    %39 = vector.load %arg3[%c0_47, %c0_48] : memref<1x4xf32, #tpu.memory_space<vmem>>, vector<1x4xf32>
    %40 = vector.broadcast %39 : vector<1x4xf32> to vector<256x4xf32>
    %41 = arith.addf %38, %40 : vector<256x4xf32>
    %cst_49 = arith.constant 0.000000e+00 : f32
    %42 = vector.broadcast %cst_49 : f32 to vector<256x4xf32>
    %43 = arith.maximumf %41, %42 : vector<256x4xf32>
    %cst_50 = arith.constant 0.000000e+00 : f32
    %44 = vector.broadcast %cst_50 : f32 to vector<1x18x4xf32>
    %c0_51 = arith.constant 0 : index
    %c0_52 = arith.constant 0 : index
    %c0_53 = arith.constant 0 : index
    %45 = vector.load %arg8[%c0_51, %c0_52, %c0_53] : memref<18x18x4xf32, #tpu.memory_space<vmem>>, vector<1x18x4xf32>
    tpu.vector_store %arg8[%c0_51, %c0_52, %c0_53], %44 {strides = array<i32>} : memref<18x18x4xf32, #tpu.memory_space<vmem>>, vector<1x18x4xf32>,
    %cst_54 = arith.constant 0.000000e+00 : f32
    %46 = vector.broadcast %cst_54 : f32 to vector<1x18x4xf32>
    %c17 = arith.constant 17 : index
    %c0_55 = arith.constant 0 : index
    %c0_56 = arith.constant 0 : index
    %47 = vector.load %arg8[%c17, %c0_55, %c0_56] : memref<18x18x4xf32, #tpu.memory_space<vmem>>, vector<1x18x4xf32>
    tpu.vector_store %arg8[%c17, %c0_55, %c0_56], %46 {strides = array<i32>} : memref<18x18x4xf32, #tpu.memory_space<vmem>>, vector<1x18x4xf32>,
    %cst_57 = arith.constant 0.000000e+00 : f32
    %48 = vector.broadcast %cst_57 : f32 to vector<16x1x4xf32>
    %c1_58 = arith.constant 1 : index
    %c0_59 = arith.constant 0 : index
    %c0_60 = arith.constant 0 : index
    %49 = vector.load %arg8[%c1_58, %c0_59, %c0_60] : memref<18x18x4xf32, #tpu.memory_space<vmem>>, vector<16x1x4xf32>
    tpu.vector_store %arg8[%c1_58, %c0_59, %c0_60], %48 {strides = array<i32>} : memref<18x18x4xf32, #tpu.memory_space<vmem>>, vector<16x1x4xf32>,
    %cst_61 = arith.constant 0.000000e+00 : f32
    %50 = vector.broadcast %cst_61 : f32 to vector<16x1x4xf32>
    %c1_62 = arith.constant 1 : index
    %c17_63 = arith.constant 17 : index
    %c0_64 = arith.constant 0 : index
    %51 = vector.load %arg8[%c1_62, %c17_63, %c0_64] : memref<18x18x4xf32, #tpu.memory_space<vmem>>, vector<16x1x4xf32>
    tpu.vector_store %arg8[%c1_62, %c17_63, %c0_64], %50 {strides = array<i32>} : memref<18x18x4xf32, #tpu.memory_space<vmem>>, vector<16x1x4xf32>,
    %52 = vector.shape_cast %43 : vector<256x4xf32> to vector<16x16x4xf32>
    %c1_65 = arith.constant 1 : index
    %c1_66 = arith.constant 1 : index
    %c0_67 = arith.constant 0 : index
    %53 = vector.load %arg8[%c1_65, %c1_66, %c0_67] : memref<18x18x4xf32, #tpu.memory_space<vmem>>, vector<16x16x4xf32>
    tpu.vector_store %arg8[%c1_65, %c1_66, %c0_67], %52 {strides = array<i32>} : memref<18x18x4xf32, #tpu.memory_space<vmem>>, vector<16x16x4xf32>,
    %c0_68 = arith.constant 0 : index
    %c0_69 = arith.constant 0 : index
    %c0_70 = arith.constant 0 : index
    %54 = vector.load %arg8[%c0_68, %c0_69, %c0_70] : memref<18x18x4xf32, #tpu.memory_space<vmem>>, vector<16x16x4xf32>
    %55 = vector.shape_cast %54 : vector<16x16x4xf32> to vector<256x4xf32>
    %c0_71 = arith.constant 0 : index
    %c0_72 = arith.constant 0 : index
    %56 = vector.load %arg7[%c0_71, %c0_72] : memref<256x36xf32, #tpu.memory_space<vmem>>, vector<256x4xf32>
    tpu.vector_store %arg7[%c0_71, %c0_72], %55 {strides = array<i32>} : memref<256x36xf32, #tpu.memory_space<vmem>>, vector<256x4xf32>,
    %c0_73 = arith.constant 0 : index
    %c1_74 = arith.constant 1 : index
    %c0_75 = arith.constant 0 : index
    %57 = vector.load %arg8[%c0_73, %c1_74, %c0_75] : memref<18x18x4xf32, #tpu.memory_space<vmem>>, vector<16x16x4xf32>
    %58 = vector.shape_cast %57 : vector<16x16x4xf32> to vector<256x4xf32>
    %c0_76 = arith.constant 0 : index
    %c4_77 = arith.constant 4 : index
    %59 = vector.load %arg7[%c0_76, %c4_77] : memref<256x36xf32, #tpu.memory_space<vmem>>, vector<256x4xf32>
    tpu.vector_store %arg7[%c0_76, %c4_77], %58 {strides = array<i32>} : memref<256x36xf32, #tpu.memory_space<vmem>>, vector<256x4xf32>,
    %c0_78 = arith.constant 0 : index
    %c2_79 = arith.constant 2 : index
    %c0_80 = arith.constant 0 : index
    %60 = vector.load %arg8[%c0_78, %c2_79, %c0_80] : memref<18x18x4xf32, #tpu.memory_space<vmem>>, vector<16x16x4xf32>
    %61 = vector.shape_cast %60 : vector<16x16x4xf32> to vector<256x4xf32>
    %c0_81 = arith.constant 0 : index
    %c8_82 = arith.constant 8 : index
    %62 = vector.load %arg7[%c0_81, %c8_82] : memref<256x36xf32, #tpu.memory_space<vmem>>, vector<256x4xf32>
    tpu.vector_store %arg7[%c0_81, %c8_82], %61 {strides = array<i32>} : memref<256x36xf32, #tpu.memory_space<vmem>>, vector<256x4xf32>,
    %c1_83 = arith.constant 1 : index
    %c0_84 = arith.constant 0 : index
    %c0_85 = arith.constant 0 : index
    %63 = vector.load %arg8[%c1_83, %c0_84, %c0_85] : memref<18x18x4xf32, #tpu.memory_space<vmem>>, vector<16x16x4xf32>
    %64 = vector.shape_cast %63 : vector<16x16x4xf32> to vector<256x4xf32>
    %c0_86 = arith.constant 0 : index
    %c12_87 = arith.constant 12 : index
    %65 = vector.load %arg7[%c0_86, %c12_87] : memref<256x36xf32, #tpu.memory_space<vmem>>, vector<256x4xf32>
    tpu.vector_store %arg7[%c0_86, %c12_87], %64 {strides = array<i32>} : memref<256x36xf32, #tpu.memory_space<vmem>>, vector<256x4xf32>,
    %c0_88 = arith.constant 0 : index
    %c16_89 = arith.constant 16 : index
    %66 = vector.load %arg7[%c0_88, %c16_89] : memref<256x36xf32, #tpu.memory_space<vmem>>, vector<256x4xf32>
    tpu.vector_store %arg7[%c0_88, %c16_89], %43 {strides = array<i32>} : memref<256x36xf32, #tpu.memory_space<vmem>>, vector<256x4xf32>,
    %c1_90 = arith.constant 1 : index
    %c2_91 = arith.constant 2 : index
    %c0_92 = arith.constant 0 : index
    %67 = vector.load %arg8[%c1_90, %c2_91, %c0_92] : memref<18x18x4xf32, #tpu.memory_space<vmem>>, vector<16x16x4xf32>
    %68 = vector.shape_cast %67 : vector<16x16x4xf32> to vector<256x4xf32>
    %c0_93 = arith.constant 0 : index
    %c20_94 = arith.constant 20 : index
    %69 = vector.load %arg7[%c0_93, %c20_94] : memref<256x36xf32, #tpu.memory_space<vmem>>, vector<256x4xf32>
    tpu.vector_store %arg7[%c0_93, %c20_94], %68 {strides = array<i32>} : memref<256x36xf32, #tpu.memory_space<vmem>>, vector<256x4xf32>,
    %c2_95 = arith.constant 2 : index
    %c0_96 = arith.constant 0 : index
    %c0_97 = arith.constant 0 : index
    %70 = vector.load %arg8[%c2_95, %c0_96, %c0_97] : memref<18x18x4xf32, #tpu.memory_space<vmem>>, vector<16x16x4xf32>
    %71 = vector.shape_cast %70 : vector<16x16x4xf32> to vector<256x4xf32>
    %c0_98 = arith.constant 0 : index
    %c24_99 = arith.constant 24 : index
    %72 = vector.load %arg7[%c0_98, %c24_99] : memref<256x36xf32, #tpu.memory_space<vmem>>, vector<256x4xf32>
    tpu.vector_store %arg7[%c0_98, %c24_99], %71 {strides = array<i32>} : memref<256x36xf32, #tpu.memory_space<vmem>>, vector<256x4xf32>,
    %c2_100 = arith.constant 2 : index
    %c1_101 = arith.constant 1 : index
    %c0_102 = arith.constant 0 : index
    %73 = vector.load %arg8[%c2_100, %c1_101, %c0_102] : memref<18x18x4xf32, #tpu.memory_space<vmem>>, vector<16x16x4xf32>
    %74 = vector.shape_cast %73 : vector<16x16x4xf32> to vector<256x4xf32>
    %c0_103 = arith.constant 0 : index
    %c28_104 = arith.constant 28 : index
    %75 = vector.load %arg7[%c0_103, %c28_104] : memref<256x36xf32, #tpu.memory_space<vmem>>, vector<256x4xf32>
    tpu.vector_store %arg7[%c0_103, %c28_104], %74 {strides = array<i32>} : memref<256x36xf32, #tpu.memory_space<vmem>>, vector<256x4xf32>,
    %c2_105 = arith.constant 2 : index
    %c2_106 = arith.constant 2 : index
    %c0_107 = arith.constant 0 : index
    %76 = vector.load %arg8[%c2_105, %c2_106, %c0_107] : memref<18x18x4xf32, #tpu.memory_space<vmem>>, vector<16x16x4xf32>
    %77 = vector.shape_cast %76 : vector<16x16x4xf32> to vector<256x4xf32>
    %c0_108 = arith.constant 0 : index
    %c32_109 = arith.constant 32 : index
    %78 = vector.load %arg7[%c0_108, %c32_109] : memref<256x36xf32, #tpu.memory_space<vmem>>, vector<256x4xf32>
    tpu.vector_store %arg7[%c0_108, %c32_109], %77 {strides = array<i32>} : memref<256x36xf32, #tpu.memory_space<vmem>>, vector<256x4xf32>,
    %c0_110 = arith.constant 0 : index
    %c0_111 = arith.constant 0 : index
    %79 = vector.load %arg7[%c0_110, %c0_111] : memref<256x36xf32, #tpu.memory_space<vmem>>, vector<256x36xf32>
    %c0_112 = arith.constant 0 : index
    %c0_113 = arith.constant 0 : index
    %80 = vector.load %arg4[%c0_112, %c0_113] : memref<36x4xf32, #tpu.memory_space<vmem>>, vector<36x4xf32>
    %cst_114 = arith.constant dense<0.000000e+00> : vector<256x4xf32>
    %81 = tpu.matmul %79, %80, %cst_114 {dimension_numbers = #tpu.dot_dimension_numbers<[1], [0], [0], [1], [0, 0, 1, 1], [], []>} : vector<256x36xf32>, vector<36x4xf32>, vector<256x4xf32> -> vector<256x4xf32>
    %c0_115 = arith.constant 0 : index
    %c0_116 = arith.constant 0 : index
    %82 = vector.load %arg5[%c0_115, %c0_116] : memref<1x4xf32, #tpu.memory_space<vmem>>, vector<1x4xf32>
    %83 = vector.broadcast %82 : vector<1x4xf32> to vector<256x4xf32>
    %84 = arith.addf %81, %83 : vector<256x4xf32>
    %c0_117 = arith.constant 0 : index
    %c1_118 = arith.constant 1 : index
    %c1_119 = arith.constant 1 : index
    %c0_120 = arith.constant 0 : index
    %85 = vector.load %arg1[%c0_117, %c1_118, %c1_119, %c0_120] : memref<1x18x18x4xf32, #tpu.memory_space<vmem>>, vector<1x16x16x4xf32>
    %86 = vector.shape_cast %85 : vector<1x16x16x4xf32> to vector<16x16x4xf32>
    %87 = vector.shape_cast %86 : vector<16x16x4xf32> to vector<256x4xf32>
    %88 = arith.addf %84, %87 : vector<256x4xf32>
    %89 = vector.shape_cast %88 : vector<256x4xf32> to vector<1x16x16x4xf32>
    %c0_121 = arith.constant 0 : index
    %c0_122 = arith.constant 0 : index
    %c0_123 = arith.constant 0 : index
    %c0_124 = arith.constant 0 : index
    %90 = vector.load %arg6[%c0_121, %c0_122, %c0_123, %c0_124] : memref<1x16x16x4xf32, #tpu.memory_space<vmem>>, vector<1x16x16x4xf32>
    tpu.vector_store %arg6[%c0_121, %c0_122, %c0_123, %c0_124], %89 {strides = array<i32>} : memref<1x16x16x4xf32, #tpu.memory_space<vmem>>, vector<1x16x16x4xf32>,
    return
  }
  func.func @transform_0(%arg0: i32) -> (i32, i32, i32, i32) {
    %c0_i32 = arith.constant 0 : i32
    %c0_i32_0 = arith.constant 0 : i32
    %c0_i32_1 = arith.constant 0 : i32
    %c0_i32_2 = arith.constant 0 : i32
    return %arg0, %c0_i32, %c0_i32_0, %c0_i32_1 : i32, i32, i32, i32
  }
  func.func @transform_1(%arg0: i32) -> (i32, i32) {
    %c0_i32 = arith.constant 0 : i32
    %c0_i32_0 = arith.constant 0 : i32
    %c0_i32_1 = arith.constant 0 : i32
    return %c0_i32, %c0_i32_0 : i32, i32
  }
  func.func @transform_2(%arg0: i32) -> (i32, i32) {
    %c0_i32 = arith.constant 0 : i32
    %c0_i32_0 = arith.constant 0 : i32
    %c0_i32_1 = arith.constant 0 : i32
    return %c0_i32, %c0_i32_0 : i32, i32
  }
  func.func @transform_3(%arg0: i32) -> (i32, i32) {
    %c0_i32 = arith.constant 0 : i32
    %c0_i32_0 = arith.constant 0 : i32
    %c0_i32_1 = arith.constant 0 : i32
    return %c0_i32, %c0_i32_0 : i32, i32
  }
  func.func @transform_4(%arg0: i32) -> (i32, i32) {
    %c0_i32 = arith.constant 0 : i32
    %c0_i32_0 = arith.constant 0 : i32
    %c0_i32_1 = arith.constant 0 : i32
    return %c0_i32, %c0_i32_0 : i32, i32
  }
  func.func @transform_5(%arg0: i32) -> (i32, i32, i32, i32) {
    %c0_i32 = arith.constant 0 : i32
    %c0_i32_0 = arith.constant 0 : i32
    %c0_i32_1 = arith.constant 0 : i32
    %c0_i32_2 = arith.constant 0 : i32
    return %arg0, %c0_i32, %c0_i32_0, %c0_i32_1 : i32, i32, i32, i32
  }
}

</mosaic_0001>

<bundles_post_ra>
// kernel: tpu_custom_call.1
= control target key start
LH: loop header
LB: loop body
LE: loop exit
PB: predicated region body
PF: predicated region fallthrough
CT: control target
= control target key end

     0   :  { %s4974_s18 = smov 0   ;;  %s7466_s0 = inlined_call_operand.vmem [shape: f32[2,18,18,4], index: 0, kind: input, shape index: {}]   ;;  %s7467_s1 = inlined_call_operand.vmem [shape: f32[36,4], index: 1, kind: input, shape index: {}]   ;;  %s7468_s2 = inlined_call_operand.vmem [shape: f32[1,4], index: 2, kind: input, shape index: {}]   ;;  %s7469_s3 = inlined_call_operand.vmem [shape: f32[36,4], index: 3, kind: input, shape index: {}]   ;;  %s7470_s4 = inlined_call_operand.vmem [shape: f32[1,4], index: 4, kind: input, shape index: {}]   ;;  %s7471_s5 = inlined_call_operand.vmem [shape: f32[2,16,16,4], index: 5, kind: output, shape index: {}]  }
   0x1 LB: > { %s4400_s19 = sadd.s32 4294967295, %s4933_s18   ;;  %p4404_p0 = scmp.ge.s32.totalorder %s4933_s18, 1  ;;  %s4933_s18 = sphi %s4974_s18, %s15_s18  }
   0x2   : > { %p187_p1 = scmp.lt.s32.totalorder %s4933_s18, 3 }
   0x4   : > { %p188_p2 = pnand %p4404_p0, %p187_p1 }
   0x6   : > { %191 = sbr.rel (%p188_p2) target bundleno = 1658 (0x67a), region = 40 }
   0xd   : > { %p215_p3 = scmp.lt.s32.totalorder %s4400_s19, 1  ;;  %s4935_s24 = smov 4   ;;  %vm257_vm0 = vcmask 31744   ;;  %vm450_vm1 = vcmask 64544   ;;  %vm643_vm2 = vcmask 97344   ;;  %vm837_vm3 = vcmask 130144  }
   0xe   : > { %s4936_s25 = smov 8   ;;  %s4937_s26 = smov 12   ;;  %vm1030_vm4 = vcmask 162944   ;;  %vm1223_vm5 = vcmask 195744   ;;  %vm1977_vm6 = vcmask 1043456   ;;  %vm1417_vm7 = vcmask 228544  }
   0xf   : > { %s7711_s19 = smov (!%p215_p3, %s4400_s19), 1  ;;  %s4938_s27 = smov 16   ;;  %vm1610_vm8 = vcmask 261344   ;;  %vm1803_vm9 = vcmask 294144   ;;  %vm1880_vm10 = vcmask 293888   ;;  %vm2240_vm11 = vcmask 25600  }
  0x10   : > { %s4909_s20 = smul.u32 432, %s7711_s19  ;;  %s4939_s28 = smov 20   ;;  %vm2247_vm12 = vcmask 24576  }
  0x11   : > { %s4940_s29 = smov 24   ;;  %s4941_s15 = smov 28  }
  0x12   : > { %s4988_s23 = scalar_lea.vmem %s7466_s0, %s4909_s20  ;;  %s4942_s16 = smov 32  }
  0x13   : > { %v290_v0 = vld [vmem:[%s4988_s23 + $0x1] sm:$0xff]  ;;  %v4992_v1 = vld [vmem:[%s4988_s23 + $0x19] sm:$0xff]  ;;  %v291_v2 = vld [vmem:[%s4988_s23 + $0x9] sm:$0xff] }
  0x14   : > { %354 = vrot.lane.b32.xlu0 %v290_v0, %s4935_s24  ;;  %358 = vrot.lane.b32.xlu1 %v4992_v1, %s4935_s24  ;;  %v4999_v3 = vld [vmem:[%s4988_s23 + $0x21] sm:$0xff]  ;;  %v5005_v4 = vld [vmem:[%s4988_s23 + $0x31] sm:$0xff] }
  0x15   : > { %v5008_v5 = vld [vmem:[%s4988_s23 + $0x39] sm:$0xff]  ;;  %v5015_v6 = vld [vmem:[%s4988_s23 + $0x49] sm:$0xff]  ;;  %v5018_v7 = vld [vmem:[%s4988_s23 + $0x51] sm:$0xff] }
  0x16   : > { %v5025_v8 = vld [vmem:[%s4988_s23 + $0x61] sm:$0xff]  ;;  %v5028_v9 = vld [vmem:[%s4988_s23 + $0x69] sm:$0xff]  ;;  %v5035_v10 = vld [vmem:[%s4988_s23 + $0x79] sm:$0xff] }
  0x17   : > { %v5038_v11 = vld [vmem:[%s4988_s23 + $0x81] sm:$0xff]  ;;  %v5046_v13 = vld [vmem:[%s4988_s23 + $0x91] sm:$0xff]  ;;  %v5050_v14 = vld [vmem:[%s4988_s23 + $0x99] sm:$0xff] }
  0x18   : > { %356 = vrot.lane.b32.xlu0 %v291_v2, %s4935_s24  ;;  %360 = vrot.lane.b32.xlu1 %v4999_v3, %s4935_s24  ;;  %v225_v12 = vld [vmem:[%s4988_s23] sm:$0xff]  ;;  %v5053_v15 = vld [vmem:[%s4988_s23 + $0x18] sm:$0xff] }
  0x19   : > { %258 = vst.msk [vmem:[#allocation2] sm:$0xff] %vm257_vm0, %v225_v12  ;;  %v226_v16 = vld [vmem:[%s4988_s23 + $0x8] sm:$0xff]  ;;  %260 = vst.msk [vmem:[#allocation2 + $0x10] sm:$0xff] %vm257_vm0, %v5053_v15  ;;  %v5060_v17 = vld [vmem:[%s4988_s23 + $0x20] sm:$0xff] }
  0x1a   : > { %259 = vst.msk [vmem:[#allocation2 + $0x8] sm:$0xff] %vm257_vm0, %v226_v16  ;;  %v5063_v18 = vld [vmem:[%s4988_s23 + $0x30] sm:$0xff]  ;;  %261 = vst.msk [vmem:[#allocation2 + $0x18] sm:$0xff] %vm257_vm0, %v5060_v17  ;;  %v5073_v20 = vld [vmem:[%s4988_s23 + $0x38] sm:$0xff] }
  0x1b   : > { %v5066_v19 = vld [vmem:[%s4988_s23 + $0xa9] sm:$0xff]  ;;  %262 = vst.msk [vmem:[#allocation2 + $0x20] sm:$0xff] %vm257_vm0, %v5063_v18  ;;  %v5080_v21 = vld [vmem:[%s4988_s23 + $0xb1] sm:$0xff]  ;;  %263 = vst.msk [vmem:[#allocation2 + $0x28] sm:$0xff] %vm257_vm0, %v5073_v20 }
  0x1c   : > { %362 = vrot.lane.b32.xlu0 %v5005_v4, %s4935_s24  ;;  %364 = vrot.lane.b32.xlu1 %v5008_v5, %s4935_s24  ;;  %v5085_v22 = vld [vmem:[%s4988_s23 + $0x48] sm:$0xff]  ;;  %v5090_v23 = vld [vmem:[%s4988_s23 + $0x50] sm:$0xff] }
  0x1d   : > { %264 = vst.msk [vmem:[#allocation2 + $0x30] sm:$0xff] %vm257_vm0, %v5085_v22  ;;  %v5093_v24 = vld [vmem:[%s4988_s23 + $0x60] sm:$0xff]  ;;  %v5096_v25 = vld [vmem:[%s4988_s23 + $0x68] sm:$0xff]  ;;  %265 = vst.msk [vmem:[#allocation2 + $0x38] sm:$0xff] %vm257_vm0, %v5090_v23 }
  0x1e   : > { %266 = vst.msk [vmem:[#allocation2 + $0x40] sm:$0xff] %vm257_vm0, %v5093_v24  ;;  %267 = vst.msk [vmem:[#allocation2 + $0x48] sm:$0xff] %vm257_vm0, %v5096_v25  ;;  %v5105_v26 = vld [vmem:[%s4988_s23 + $0x78] sm:$0xff]  ;;  %v5108_v27 = vld [vmem:[%s4988_s23 + $0x80] sm:$0xff] }
  0x1f   : > { %v5111_v28 = vld [vmem:[%s4988_s23 + $0x90] sm:$0xff]  ;;  %v5114_v29 = vld [vmem:[%s4988_s23 + $0xc1] sm:$0xff]  ;;  %268 = vst.msk [vmem:[#allocation2 + $0x50] sm:$0xff] %vm257_vm0, %v5105_v26  ;;  %269 = vst.msk [vmem:[#allocation2 + $0x58] sm:$0xff] %vm257_vm0, %v5108_v27 }
  0x20   : > { %366 = vrot.lane.b32.xlu0 %v5015_v6, %s4935_s24  ;;  %368 = vrot.lane.b32.xlu1 %v5018_v7, %s4935_s24  ;;  %v5117_v30 = vld [vmem:[%s4988_s23 + $0xc9] sm:$0xff]  ;;  %270 = vst.msk [vmem:[#allocation2 + $0x60] sm:$0xff] %vm257_vm0, %v5111_v28  ;;  %v5126_v31 = vld [vmem:[%s4988_s23 + $0x98] sm:$0xff] }
  0x21   : > { %v5129_v32 = vld [vmem:[%s4988_s23 + $0xa8] sm:$0xff]  ;;  %v5132_v33 = vld [vmem:[%s4988_s23 + $0xb0] sm:$0xff]  ;;  %271 = vst.msk [vmem:[#allocation2 + $0x68] sm:$0xff] %vm257_vm0, %v5126_v31  ;;  %v5145_v34 = vld [vmem:[%s4988_s23 + $0xc0] sm:$0xff] }
  0x22   : > { %272 = vst.msk [vmem:[#allocation2 + $0x70] sm:$0xff] %vm257_vm0, %v5129_v32  ;;  %273 = vst.msk [vmem:[#allocation2 + $0x78] sm:$0xff] %vm257_vm0, %v5132_v33  ;;  %v5148_v35 = vld [vmem:[%s4988_s23 + $0xc8] sm:$0xff]  ;;  %v5155_v36 = vld [vmem:[%s4988_s23 + $0xd8] sm:$0xff] }
  0x23   : > { %274 = vst.msk [vmem:[#allocation2 + $0x80] sm:$0xff] %vm257_vm0, %v5145_v34  ;;  %275 = vst.msk [vmem:[#allocation2 + $0x88] sm:$0xff] %vm257_vm0, %v5148_v35  ;;  %v5158_v37 = vld [vmem:[%s4988_s23 + $0xe0] sm:$0xff]  ;;  %v5161_v38 = vld [vmem:[%s4988_s23 + $0xf0] sm:$0xff] }
  0x24   : > { %370 = vrot.lane.b32.xlu0 %v5025_v8, %s4935_s24  ;;  %372 = vrot.lane.b32.xlu1 %v5028_v9, %s4935_s24  ;;  %276 = vst.msk [vmem:[#allocation2 + $0x90] sm:$0xff] %vm257_vm0, %v5155_v36  ;;  %277 = vst.msk [vmem:[#allocation2 + $0x98] sm:$0xff] %vm257_vm0, %v5158_v37  ;;  %v5170_v39 = vld [vmem:[%s4988_s23 + $0xf8] sm:$0xff]  ;;  %v5173_v40 = vld [vmem:[%s4988_s23 + $0x108] sm:$0xff] }
  0x25   : > { %278 = vst.msk [vmem:[#allocation2 + $0xa0] sm:$0xff] %vm257_vm0, %v5161_v38  ;;  %279 = vst.msk [vmem:[#allocation2 + $0xa8] sm:$0xff] %vm257_vm0, %v5170_v39  ;;  %v5184_v41 = vld [vmem:[%s4988_s23 + $0x110] sm:$0xff]  ;;  %v5187_v42 = vld [vmem:[%s4988_s23 + $0xd9] sm:$0xff] }
  0x26   : > { %280 = vst.msk [vmem:[#allocation2 + $0xb0] sm:$0xff] %vm257_vm0, %v5173_v40  ;;  %v5190_v43 = vld [vmem:[%s4988_s23 + $0xe1] sm:$0xff]  ;;  %281 = vst.msk [vmem:[#allocation2 + $0xb8] sm:$0xff] %vm257_vm0, %v5184_v41  ;;  %v5207_v46 = vld [vmem:[%s4988_s23 + $0xf1] sm:$0xff] }
  0x27   : > { %v5195_v44 = vld [vmem:[%s4988_s23 + $0x120] sm:$0xff]  ;;  %v5204_v45 = vld [vmem:[%s4988_s23 + $0x128] sm:$0xff]  ;;  %v5215_v48 = vld [vmem:[%s4988_s23 + $0x138] sm:$0xff] }
  0x28   : > { %374 = vrot.lane.b32.xlu0 %v5035_v10, %s4935_s24  ;;  %376 = vrot.lane.b32.xlu1 %v5038_v11, %s4935_s24  ;;  %282 = vst.msk [vmem:[#allocation2 + $0xc0] sm:$0xff] %vm257_vm0, %v5195_v44  ;;  %v5210_v47 = vld [vmem:[%s4988_s23 + $0xf9] sm:$0xff]  ;;  %283 = vst.msk [vmem:[#allocation2 + $0xc8] sm:$0xff] %vm257_vm0, %v5204_v45  ;;  %v5227_v50 = vld [vmem:[%s4988_s23 + $0x109] sm:$0xff] }
  0x29   : > { %284 = vst.msk [vmem:[#allocation2 + $0xd0] sm:$0xff] %vm257_vm0, %v5215_v48  ;;  %v5224_v49 = vld [vmem:[%s4988_s23 + $0x140] sm:$0xff]  ;;  %v5230_v51 = vld [vmem:[%s4988_s23 + $0x111] sm:$0xff]  ;;  %v5250_v55 = vld [vmem:[%s4988_s23 + $0x129] sm:$0xff] }
  0x2a   : > { %285 = vst.msk [vmem:[#allocation2 + $0xd8] sm:$0xff] %vm257_vm0, %v5224_v49  ;;  %v5235_v52 = vld [vmem:[%s4988_s23 + $0x150] sm:$0xff]  ;;  %v5244_v53 = vld [vmem:[%s4988_s23 + $0x158] sm:$0xff]  ;;  %v5247_v54 = vld [vmem:[%s4988_s23 + $0x121] sm:$0xff] }
  0x2b   : > { %286 = vst.msk [vmem:[#allocation2 + $0xe0] sm:$0xff] %vm257_vm0, %v5235_v52  ;;  %287 = vst.msk [vmem:[#allocation2 + $0xe8] sm:$0xff] %vm257_vm0, %v5244_v53  ;;  %v5255_v56 = vld [vmem:[%s4988_s23 + $0x168] sm:$0xff]  ;;  %v5264_v57 = vld [vmem:[%s4988_s23 + $0x170] sm:$0xff] }
  0x2c   : > { %378 = vrot.lane.b32.xlu0 %v5046_v13, %s4935_s24  ;;  %380 = vrot.lane.b32.xlu1 %v5050_v14, %s4935_s24  ;;  %288 = vst.msk [vmem:[#allocation2 + $0xf0] sm:$0xff] %vm257_vm0, %v5255_v56  ;;  %v5267_v58 = vld [vmem:[%s4988_s23 + $0x139] sm:$0xff]  ;;  %v5270_v59 = vld [vmem:[%s4988_s23 + $0x141] sm:$0xff]  ;;  %289 = vst.msk [vmem:[#allocation2 + $0xf8] sm:$0xff] %vm257_vm0, %v5264_v57 }
  0x2d   : > { %v5279_v60 = vld [vmem:[%s4988_s23 + $0x151] sm:$0xff]  ;;  %v5282_v61 = vld [vmem:[%s4988_s23 + $0x159] sm:$0xff]  ;;  %v5289_v62 = vld [vmem:[%s4988_s23 + $0x169] sm:$0xff] }
  0x2e   : > { %7568 = vst [vmem:[#allocation4_spill] sm:$0xff] %v5279_v60  ;;  %7569 = vst [vmem:[#allocation5_spill] sm:$0xff] %v5282_v61  ;;  %v5292_v63 = vld [vmem:[%s4988_s23 + $0x171] sm:$0xff]  ;;  %v483_v0 = vld [vmem:[%s4988_s23 + $0x2] sm:$0xff] }
  0x2f   : > { %7570 = vst [vmem:[#allocation6_spill] sm:$0xff] %v5289_v62  ;;  %7571 = vst [vmem:[#allocation7_spill] sm:$0xff] %v5292_v63  ;;  %v484_v2 = vld [vmem:[%s4988_s23 + $0xa] sm:$0xff]  ;;  %v5303_v12 = vld [vmem:[%s4988_s23 + $0x1a] sm:$0xff] }
  0x30   : > { %382 = vrot.lane.b32.xlu0 %v5066_v19, %s4935_s24  ;;  %384 = vrot.lane.b32.xlu1 %v5080_v21, %s4935_s24  ;;  %7572 = vst [vmem:[#allocation8_spill] sm:$0xff] %v5303_v12  ;;  %v5306_v16 = vld [vmem:[%s4988_s23 + $0x22] sm:$0xff] }
  0x31   : > { %7573 = vst [vmem:[#allocation9_spill] sm:$0xff] %v5306_v16 }
  0x34   : > { %386 = vrot.lane.b32.xlu0 %v5114_v29, %s4935_s24  ;;  %388 = vrot.lane.b32.xlu1 %v5117_v30, %s4935_s24 }
  0x38   : > { %390 = vrot.lane.b32.xlu0 %v5187_v42, %s4935_s24  ;;  %392 = vrot.lane.b32.xlu1 %v5190_v43, %s4935_s24 }
  0x3c   : > { %394 = vrot.lane.b32.xlu0 %v5207_v46, %s4935_s24  ;;  %396 = vrot.lane.b32.xlu1 %v5210_v47, %s4935_s24 }
  0x40   : > { %398 = vrot.lane.b32.xlu0 %v5227_v50, %s4935_s24  ;;  %400 = vrot.lane.b32.xlu1 %v5230_v51, %s4935_s24 }
  0x44   : > { %402 = vrot.lane.b32.xlu0 %v5247_v54, %s4935_s24  ;;  %404 = vrot.lane.b32.xlu1 %v5250_v55, %s4935_s24 }
  0x48   : > { %406 = vrot.lane.b32.xlu0 %v5267_v58, %s4935_s24  ;;  %408 = vrot.lane.b32.xlu1 %v5270_v59, %s4935_s24 }
  0x4c   : > { %410 = vrot.lane.b32.xlu0 %v5279_v60, %s4935_s24  ;;  %412 = vrot.lane.b32.xlu1 %v5282_v61, %s4935_s24 }
  0x50   : > { %414 = vrot.lane.b32.xlu0 %v5289_v62, %s4935_s24  ;;  %416 = vrot.lane.b32.xlu1 %v5292_v63, %s4935_s24  ;;  %v5313_v63 = vld [vmem:[%s4988_s23 + $0x32] sm:$0xff]  ;;  %v5316_v62 = vld [vmem:[%s4988_s23 + $0x3a] sm:$0xff] }
  0x51   : > { %7574 = vst [vmem:[#allocation10_spill] sm:$0xff] %v5313_v63  ;;  %7575 = vst [vmem:[#allocation11_spill] sm:$0xff] %v5316_v62 }
  0x54   : > { %547 = vrot.lane.b32.xlu0 %v483_v0, %s4936_s25  ;;  %549 = vrot.lane.b32.xlu1 %v484_v2, %s4936_s25  ;;  %v5323_v0 = vld [vmem:[%s4988_s23 + $0x4a] sm:$0xff]  ;;  %v5326_v2 = vld [vmem:[%s4988_s23 + $0x52] sm:$0xff] }
  0x55   : > { %7576 = vst [vmem:[#allocation12_spill] sm:$0xff] %v5323_v0  ;;  %7577 = vst [vmem:[#allocation13_spill] sm:$0xff] %v5326_v2 }
  0x58   : > { %551 = vrot.lane.b32.xlu0 %v5303_v12, %s4936_s25  ;;  %553 = vrot.lane.b32.xlu1 %v5306_v16, %s4936_s25  ;;  %v5333_v16 = vld [vmem:[%s4988_s23 + $0x62] sm:$0xff]  ;;  %v5336_v12 = vld [vmem:[%s4988_s23 + $0x6a] sm:$0xff] }
  0x59   : > { %7578 = vst [vmem:[#allocation14_spill] sm:$0xff] %v5333_v16  ;;  %7579 = vst [vmem:[#allocation15_spill] sm:$0xff] %v5336_v12 }
  0x5c   : > { %555 = vrot.lane.b32.xlu0 %v5313_v63, %s4936_s25  ;;  %557 = vrot.lane.b32.xlu1 %v5316_v62, %s4936_s25  ;;  %v5343_v62 = vld [vmem:[%s4988_s23 + $0x7a] sm:$0xff]  ;;  %v5346_v63 = vld [vmem:[%s4988_s23 + $0x82] sm:$0xff] }
  0x5d   : > { %7580 = vst [vmem:[#allocation16_spill] sm:$0xff] %v5343_v62  ;;  %7581 = vst [vmem:[#allocation17_spill] sm:$0xff] %v5346_v63 }
  0x60   : > { %559 = vrot.lane.b32.xlu0 %v5323_v0, %s4936_s25  ;;  %561 = vrot.lane.b32.xlu1 %v5326_v2, %s4936_s25  ;;  %v5353_v2 = vld [vmem:[%s4988_s23 + $0x92] sm:$0xff]  ;;  %v5356_v0 = vld [vmem:[%s4988_s23 + $0x9a] sm:$0xff] }
  0x61   : > { %7582 = vst [vmem:[#allocation18_spill] sm:$0xff] %v5353_v2  ;;  %7583 = vst [vmem:[#allocation19_spill] sm:$0xff] %v5356_v0 }
  0x64   : > { %563 = vrot.lane.b32.xlu0 %v5333_v16, %s4936_s25  ;;  %565 = vrot.lane.b32.xlu1 %v5336_v12, %s4936_s25  ;;  %v5363_v12 = vld [vmem:[%s4988_s23 + $0xaa] sm:$0xff]  ;;  %v5366_v16 = vld [vmem:[%s4988_s23 + $0xb2] sm:$0xff] }
  0x65   : > { %7584 = vst [vmem:[#allocation20_spill] sm:$0xff] %v5363_v12  ;;  %7585 = vst [vmem:[#allocation21_spill] sm:$0xff] %v5366_v16 }
  0x68   : > { %567 = vrot.lane.b32.xlu0 %v5343_v62, %s4936_s25  ;;  %569 = vrot.lane.b32.xlu1 %v5346_v63, %s4936_s25  ;;  %v5373_v63 = vld [vmem:[%s4988_s23 + $0xc2] sm:$0xff]  ;;  %v5376_v62 = vld [vmem:[%s4988_s23 + $0xca] sm:$0xff] }
  0x69   : > { %7586 = vst [vmem:[#allocation22_spill] sm:$0xff] %v5373_v63  ;;  %7587 = vst [vmem:[#allocation23_spill] sm:$0xff] %v5376_v62 }
  0x6c   : > { %571 = vrot.lane.b32.xlu0 %v5353_v2, %s4936_s25  ;;  %573 = vrot.lane.b32.xlu1 %v5356_v0, %s4936_s25  ;;  %v5383_v0 = vld [vmem:[%s4988_s23 + $0xda] sm:$0xff]  ;;  %v5386_v2 = vld [vmem:[%s4988_s23 + $0xe2] sm:$0xff] }
  0x6d   : > { %7588 = vst [vmem:[#allocation24_spill] sm:$0xff] %v5383_v0  ;;  %7589 = vst [vmem:[#allocation25_spill] sm:$0xff] %v5386_v2 }
  0x70   : > { %575 = vrot.lane.b32.xlu0 %v5363_v12, %s4936_s25  ;;  %577 = vrot.lane.b32.xlu1 %v5366_v16, %s4936_s25  ;;  %v5393_v16 = vld [vmem:[%s4988_s23 + $0xf2] sm:$0xff]  ;;  %v5396_v12 = vld [vmem:[%s4988_s23 + $0xfa] sm:$0xff] }
  0x71   : > { %7590 = vst [vmem:[#allocation26_spill] sm:$0xff] %v5393_v16  ;;  %7591 = vst [vmem:[#allocation27_spill] sm:$0xff] %v5396_v12 }
  0x74   : > { %579 = vrot.lane.b32.xlu0 %v5373_v63, %s4936_s25  ;;  %581 = vrot.lane.b32.xlu1 %v5376_v62, %s4936_s25  ;;  %v5403_v62 = vld [vmem:[%s4988_s23 + $0x10a] sm:$0xff]  ;;  %v5406_v63 = vld [vmem:[%s4988_s23 + $0x112] sm:$0xff] }
  0x75   : > { %7592 = vst [vmem:[#allocation28_spill] sm:$0xff] %v5403_v62  ;;  %7593 = vst [vmem:[#allocation29_spill] sm:$0xff] %v5406_v63 }
  0x78   : > { %583 = vrot.lane.b32.xlu0 %v5383_v0, %s4936_s25  ;;  %585 = vrot.lane.b32.xlu1 %v5386_v2, %s4936_s25  ;;  %v5413_v2 = vld [vmem:[%s4988_s23 + $0x122] sm:$0xff]  ;;  %v5416_v0 = vld [vmem:[%s4988_s23 + $0x12a] sm:$0xff] }
  0x79   : > { %7594 = vst [vmem:[#allocation30_spill] sm:$0xff] %v5413_v2  ;;  %7595 = vst [vmem:[#allocation31_spill] sm:$0xff] %v5416_v0 }
  0x7c   : > { %587 = vrot.lane.b32.xlu0 %v5393_v16, %s4936_s25  ;;  %589 = vrot.lane.b32.xlu1 %v5396_v12, %s4936_s25  ;;  %v5423_v12 = vld [vmem:[%s4988_s23 + $0x13a] sm:$0xff]  ;;  %v5426_v16 = vld [vmem:[%s4988_s23 + $0x142] sm:$0xff] }
  0x7d   : > { %7596 = vst [vmem:[#allocation32_spill] sm:$0xff] %v5423_v12  ;;  %7597 = vst [vmem:[#allocation33_spill] sm:$0xff] %v5426_v16 }
  0x80   : > { %591 = vrot.lane.b32.xlu0 %v5403_v62, %s4936_s25  ;;  %593 = vrot.lane.b32.xlu1 %v5406_v63, %s4936_s25 }
  0x84   : > { %595 = vrot.lane.b32.xlu0 %v5413_v2, %s4936_s25  ;;  %597 = vrot.lane.b32.xlu1 %v5416_v0, %s4936_s25  ;;  %v5435_v2 = vld [vmem:[%s4988_s23 + $0x152] sm:$0xff]  ;;  %v5438_v0 = vld [vmem:[%s4988_s23 + $0x15a] sm:$0xff] }
  0x86   : > { %v355_v62 = vpop.permute.xlu0 %354  ;;  %v359_v61 = vpop.permute.xlu1 %358 }
  0x87   : > { %451 = vst.msk [vmem:[#allocation2] sm:$0xff] %vm450_vm1, %v355_v62  ;;  %453 = vst.msk [vmem:[#allocation2 + $0x10] sm:$0xff] %vm450_vm1, %v359_v61  ;;  %v5447_v61 = vld [vmem:[%s4988_s23 + $0x16a] sm:$0xff]  ;;  %v5450_v62 = vld [vmem:[%s4988_s23 + $0x172] sm:$0xff] }
  0x88   : > { %599 = vrot.lane.b32.xlu0 %v5423_v12, %s4936_s25  ;;  %601 = vrot.lane.b32.xlu1 %v5426_v16, %s4936_s25 }
  0x8a   : > { %v357_v63 = vpop.permute.xlu0 %356  ;;  %v361_v60 = vpop.permute.xlu1 %360 }
  0x8b   : > { %452 = vst.msk [vmem:[#allocation2 + $0x8] sm:$0xff] %vm450_vm1, %v357_v63  ;;  %454 = vst.msk [vmem:[#allocation2 + $0x18] sm:$0xff] %vm450_vm1, %v361_v60 }
  0x8c   : > { %603 = vrot.lane.b32.xlu0 %v5435_v2, %s4936_s25  ;;  %605 = vrot.lane.b32.xlu1 %v5438_v0, %s4936_s25 }
  0x8e   : > { %v363_v16 = vpop.permute.xlu0 %362  ;;  %v365_v12 = vpop.permute.xlu1 %364 }
  0x8f   : > { %455 = vst.msk [vmem:[#allocation2 + $0x20] sm:$0xff] %vm450_vm1, %v363_v16  ;;  %456 = vst.msk [vmem:[#allocation2 + $0x28] sm:$0xff] %vm450_vm1, %v365_v12 }
  0x90   : > { %607 = vrot.lane.b32.xlu0 %v5447_v61, %s4936_s25  ;;  %609 = vrot.lane.b32.xlu1 %v5450_v62, %s4936_s25 }
  0x92   : > { %v367_v60 = vpop.permute.xlu0 %366  ;;  %v369_v63 = vpop.permute.xlu1 %368 }
  0x93   : > { %457 = vst.msk [vmem:[#allocation2 + $0x30] sm:$0xff] %vm450_vm1, %v367_v60  ;;  %458 = vst.msk [vmem:[#allocation2 + $0x38] sm:$0xff] %vm450_vm1, %v369_v63 }
  0x94   : > { %741 = vrot.lane.b32.xlu0 %v5053_v15, %s4937_s26  ;;  %743 = vrot.lane.b32.xlu1 %v5060_v17, %s4937_s26 }
  0x96   : > { %v371_v12 = vpop.permute.xlu0 %370  ;;  %v373_v16 = vpop.permute.xlu1 %372 }
  0x97   : > { %459 = vst.msk [vmem:[#allocation2 + $0x40] sm:$0xff] %vm450_vm1, %v371_v12  ;;  %460 = vst.msk [vmem:[#allocation2 + $0x48] sm:$0xff] %vm450_vm1, %v373_v16 }
  0x98   : > { %745 = vrot.lane.b32.xlu0 %v5063_v18, %s4937_s26  ;;  %747 = vrot.lane.b32.xlu1 %v5073_v20, %s4937_s26 }
  0x9a   : > { %v375_v60 = vpop.permute.xlu0 %374  ;;  %v377_v63 = vpop.permute.xlu1 %376 }
  0x9b   : > { %461 = vst.msk [vmem:[#allocation2 + $0x50] sm:$0xff] %vm450_vm1, %v375_v60  ;;  %462 = vst.msk [vmem:[#allocation2 + $0x58] sm:$0xff] %vm450_vm1, %v377_v63 }
  0x9c   : > { %749 = vrot.lane.b32.xlu0 %v5085_v22, %s4937_s26  ;;  %751 = vrot.lane.b32.xlu1 %v5090_v23, %s4937_s26 }
  0x9e   : > { %v379_v15 = vpop.permute.xlu0 %378  ;;  %v381_v17 = vpop.permute.xlu1 %380 }
  0x9f   : > { %463 = vst.msk [vmem:[#allocation2 + $0x60] sm:$0xff] %vm450_vm1, %v379_v15  ;;  %464 = vst.msk [vmem:[#allocation2 + $0x68] sm:$0xff] %vm450_vm1, %v381_v17 }
  0xa0   : > { %753 = vrot.lane.b32.xlu0 %v5093_v24, %s4937_s26  ;;  %755 = vrot.lane.b32.xlu1 %v5096_v25, %s4937_s26 }
  0xa2   : > { %v383_v12 = vpop.permute.xlu0 %382  ;;  %v385_v16 = vpop.permute.xlu1 %384 }
  0xa3   : > { %465 = vst.msk [vmem:[#allocation2 + $0x70] sm:$0xff] %vm450_vm1, %v383_v12  ;;  %466 = vst.msk [vmem:[#allocation2 + $0x78] sm:$0xff] %vm450_vm1, %v385_v16 }
  0xa4   : > { %757 = vrot.lane.b32.xlu0 %v5105_v26, %s4937_s26  ;;  %759 = vrot.lane.b32.xlu1 %v5108_v27, %s4937_s26 }
  0xa6   : > { %v387_v60 = vpop.permute.xlu0 %386  ;;  %v389_v63 = vpop.permute.xlu1 %388 }
  0xa7   : > { %467 = vst.msk [vmem:[#allocation2 + $0x80] sm:$0xff] %vm450_vm1, %v387_v60  ;;  %468 = vst.msk [vmem:[#allocation2 + $0x88] sm:$0xff] %vm450_vm1, %v389_v63 }
  0xa8   : > { %761 = vrot.lane.b32.xlu0 %v5111_v28, %s4937_s26  ;;  %763 = vrot.lane.b32.xlu1 %v5126_v31, %s4937_s26 }
  0xaa   : > { %v391_v15 = vpop.permute.xlu0 %390  ;;  %v393_v17 = vpop.permute.xlu1 %392 }
  0xab   : > { %469 = vst.msk [vmem:[#allocation2 + $0x90] sm:$0xff] %vm450_vm1, %v391_v15  ;;  %470 = vst.msk [vmem:[#allocation2 + $0x98] sm:$0xff] %vm450_vm1, %v393_v17 }
  0xac   : > { %765 = vrot.lane.b32.xlu0 %v5129_v32, %s4937_s26  ;;  %767 = vrot.lane.b32.xlu1 %v5132_v33, %s4937_s26 }
  0xae   : > { %v395_v12 = vpop.permute.xlu0 %394  ;;  %v397_v16 = vpop.permute.xlu1 %396 }
  0xaf   : > { %471 = vst.msk [vmem:[#allocation2 + $0xa0] sm:$0xff] %vm450_vm1, %v395_v12  ;;  %472 = vst.msk [vmem:[#allocation2 + $0xa8] sm:$0xff] %vm450_vm1, %v397_v16 }
  0xb0   : > { %769 = vrot.lane.b32.xlu0 %v5145_v34, %s4937_s26  ;;  %771 = vrot.lane.b32.xlu1 %v5148_v35, %s4937_s26 }
  0xb2   : > { %v399_v60 = vpop.permute.xlu0 %398  ;;  %v401_v63 = vpop.permute.xlu1 %400 }
  0xb3   : > { %473 = vst.msk [vmem:[#allocation2 + $0xb0] sm:$0xff] %vm450_vm1, %v399_v60  ;;  %474 = vst.msk [vmem:[#allocation2 + $0xb8] sm:$0xff] %vm450_vm1, %v401_v63 }
  0xb4   : > { %773 = vrot.lane.b32.xlu0 %v5155_v36, %s4937_s26  ;;  %775 = vrot.lane.b32.xlu1 %v5158_v37, %s4937_s26 }
  0xb6   : > { %v403_v15 = vpop.permute.xlu0 %402  ;;  %v405_v17 = vpop.permute.xlu1 %404 }
  0xb7   : > { %475 = vst.msk [vmem:[#allocation2 + $0xc0] sm:$0xff] %vm450_vm1, %v403_v15  ;;  %476 = vst.msk [vmem:[#allocation2 + $0xc8] sm:$0xff] %vm450_vm1, %v405_v17 }
  0xb8   : > { %777 = vrot.lane.b32.xlu0 %v5161_v38, %s4937_s26  ;;  %779 = vrot.lane.b32.xlu1 %v5170_v39, %s4937_s26 }
  0xba   : > { %v407_v12 = vpop.permute.xlu0 %406  ;;  %v409_v16 = vpop.permute.xlu1 %408 }
  0xbb   : > { %477 = vst.msk [vmem:[#allocation2 + $0xd0] sm:$0xff] %vm450_vm1, %v407_v12  ;;  %478 = vst.msk [vmem:[#allocation2 + $0xd8] sm:$0xff] %vm450_vm1, %v409_v16 }
  0xbc   : > { %781 = vrot.lane.b32.xlu0 %v5173_v40, %s4937_s26  ;;  %783 = vrot.lane.b32.xlu1 %v5184_v41, %s4937_s26 }
  0xbe   : > { %v411_v60 = vpop.permute.xlu0 %410  ;;  %v413_v63 = vpop.permute.xlu1 %412 }
  0xbf   : > { %479 = vst.msk [vmem:[#allocation2 + $0xe0] sm:$0xff] %vm450_vm1, %v411_v60  ;;  %480 = vst.msk [vmem:[#allocation2 + $0xe8] sm:$0xff] %vm450_vm1, %v413_v63 }
  0xc0   : > { %785 = vrot.lane.b32.xlu0 %v5195_v44, %s4937_s26  ;;  %787 = vrot.lane.b32.xlu1 %v5204_v45, %s4937_s26 }
  0xc2   : > { %v415_v15 = vpop.permute.xlu0 %414  ;;  %v417_v17 = vpop.permute.xlu1 %416 }
  0xc3   : > { %481 = vst.msk [vmem:[#allocation2 + $0xf0] sm:$0xff] %vm450_vm1, %v415_v15  ;;  %482 = vst.msk [vmem:[#allocation2 + $0xf8] sm:$0xff] %vm450_vm1, %v417_v17  ;;  %v5549_v15 = vld [vmem:[%s4988_s23 + $0x180] sm:$0xff]  ;;  %v5552_v17 = vld [vmem:[%s4988_s23 + $0x188] sm:$0xff] }
  0xc4   : > { %789 = vrot.lane.b32.xlu0 %v5215_v48, %s4937_s26  ;;  %791 = vrot.lane.b32.xlu1 %v5224_v49, %s4937_s26 }
  0xc6   : > { %v548_v12 = vpop.permute.xlu0 %547  ;;  %v550_v16 = vpop.permute.xlu1 %549 }
  0xc7   : > { %644 = vst.msk [vmem:[#allocation2] sm:$0xff] %vm643_vm2, %v548_v12  ;;  %645 = vst.msk [vmem:[#allocation2 + $0x8] sm:$0xff] %vm643_vm2, %v550_v16 }
  0xc8   : > { %793 = vrot.lane.b32.xlu0 %v5235_v52, %s4937_s26  ;;  %795 = vrot.lane.b32.xlu1 %v5244_v53, %s4937_s26 }
  0xca   : > { %v552_v60 = vpop.permute.xlu0 %551  ;;  %v554_v63 = vpop.permute.xlu1 %553 }
  0xcb   : > { %646 = vst.msk [vmem:[#allocation2 + $0x10] sm:$0xff] %vm643_vm2, %v552_v60  ;;  %647 = vst.msk [vmem:[#allocation2 + $0x18] sm:$0xff] %vm643_vm2, %v554_v63 }
  0xcc   : > { %797 = vrot.lane.b32.xlu0 %v5255_v56, %s4937_s26  ;;  %799 = vrot.lane.b32.xlu1 %v5264_v57, %s4937_s26 }
  0xce   : > { %v556_v12 = vpop.permute.xlu0 %555  ;;  %v558_v16 = vpop.permute.xlu1 %557 }
  0xcf   : > { %648 = vst.msk [vmem:[#allocation2 + $0x20] sm:$0xff] %vm643_vm2, %v556_v12  ;;  %649 = vst.msk [vmem:[#allocation2 + $0x28] sm:$0xff] %vm643_vm2, %v558_v16 }
  0xd0   : > { %801 = vrot.lane.b32.xlu0 %v5549_v15, %s4937_s26  ;;  %803 = vrot.lane.b32.xlu1 %v5552_v17, %s4937_s26 }
  0xd2   : > { %v560_v60 = vpop.permute.xlu0 %559  ;;  %v562_v63 = vpop.permute.xlu1 %561 }
  0xd3   : > { %650 = vst.msk [vmem:[#allocation2 + $0x30] sm:$0xff] %vm643_vm2, %v560_v60  ;;  %651 = vst.msk [vmem:[#allocation2 + $0x38] sm:$0xff] %vm643_vm2, %v562_v63 }
  0xd4   : > { %934 = vrot.lane.b32.xlu0 %v4992_v1, %s4938_s27  ;;  %936 = vrot.lane.b32.xlu1 %v4999_v3, %s4938_s27 }
  0xd6   : > { %v564_v12 = vpop.permute.xlu0 %563  ;;  %v566_v16 = vpop.permute.xlu1 %565 }
  0xd7   : > { %652 = vst.msk [vmem:[#allocation2 + $0x40] sm:$0xff] %vm643_vm2, %v564_v12  ;;  %653 = vst.msk [vmem:[#allocation2 + $0x48] sm:$0xff] %vm643_vm2, %v566_v16 }
  0xd8   : > { %938 = vrot.lane.b32.xlu0 %v5005_v4, %s4938_s27  ;;  %940 = vrot.lane.b32.xlu1 %v5008_v5, %s4938_s27 }
  0xda   : > { %v568_v60 = vpop.permute.xlu0 %567  ;;  %v570_v63 = vpop.permute.xlu1 %569 }
  0xdb   : > { %654 = vst.msk [vmem:[#allocation2 + $0x50] sm:$0xff] %vm643_vm2, %v568_v60  ;;  %655 = vst.msk [vmem:[#allocation2 + $0x58] sm:$0xff] %vm643_vm2, %v570_v63  ;;  %v5651_v60 = vld [vmem:[%s4988_s23 + $0x181] sm:$0xff]  ;;  %v5654_v63 = vld [vmem:[%s4988_s23 + $0x189] sm:$0xff] }
  0xdc   : > { %942 = vrot.lane.b32.xlu0 %v5015_v6, %s4938_s27  ;;  %944 = vrot.lane.b32.xlu1 %v5018_v7, %s4938_s27 }
  0xde   : > { %v572_v1 = vpop.permute.xlu0 %571  ;;  %v574_v3 = vpop.permute.xlu1 %573 }
  0xdf   : > { %656 = vst.msk [vmem:[#allocation2 + $0x60] sm:$0xff] %vm643_vm2, %v572_v1  ;;  %657 = vst.msk [vmem:[#allocation2 + $0x68] sm:$0xff] %vm643_vm2, %v574_v3 }
  0xe0   : > { %946 = vrot.lane.b32.xlu0 %v5025_v8, %s4938_s27  ;;  %948 = vrot.lane.b32.xlu1 %v5028_v9, %s4938_s27 }
  0xe2   : > { %v576_v4 = vpop.permute.xlu0 %575  ;;  %v578_v5 = vpop.permute.xlu1 %577 }
  0xe3   : > { %658 = vst.msk [vmem:[#allocation2 + $0x70] sm:$0xff] %vm643_vm2, %v576_v4  ;;  %659 = vst.msk [vmem:[#allocation2 + $0x78] sm:$0xff] %vm643_vm2, %v578_v5 }
  0xe4   : > { %950 = vrot.lane.b32.xlu0 %v5035_v10, %s4938_s27  ;;  %952 = vrot.lane.b32.xlu1 %v5038_v11, %s4938_s27 }
  0xe6   : > { %v580_v6 = vpop.permute.xlu0 %579  ;;  %v582_v7 = vpop.permute.xlu1 %581 }
  0xe7   : > { %660 = vst.msk [vmem:[#allocation2 + $0x80] sm:$0xff] %vm643_vm2, %v580_v6  ;;  %661 = vst.msk [vmem:[#allocation2 + $0x88] sm:$0xff] %vm643_vm2, %v582_v7  ;;  %v7602_v6 = vld [vmem:[#allocation8_spill] sm:$0xff]  ;;  %v7603_v7 = vld [vmem:[#allocation9_spill] sm:$0xff] }
  0xe8   : > { %954 = vrot.lane.b32.xlu0 %v5046_v13, %s4938_s27  ;;  %956 = vrot.lane.b32.xlu1 %v5050_v14, %s4938_s27 }
  0xea   : > { %v584_v8 = vpop.permute.xlu0 %583  ;;  %v586_v9 = vpop.permute.xlu1 %585 }
  0xeb   : > { %662 = vst.msk [vmem:[#allocation2 + $0x90] sm:$0xff] %vm643_vm2, %v584_v8  ;;  %663 = vst.msk [vmem:[#allocation2 + $0x98] sm:$0xff] %vm643_vm2, %v586_v9 }
  0xec   : > { %958 = vrot.lane.b32.xlu0 %v5066_v19, %s4938_s27  ;;  %960 = vrot.lane.b32.xlu1 %v5080_v21, %s4938_s27 }
  0xee   : > { %v588_v10 = vpop.permute.xlu0 %587  ;;  %v590_v11 = vpop.permute.xlu1 %589 }
  0xef   : > { %664 = vst.msk [vmem:[#allocation2 + $0xa0] sm:$0xff] %vm643_vm2, %v588_v10  ;;  %665 = vst.msk [vmem:[#allocation2 + $0xa8] sm:$0xff] %vm643_vm2, %v590_v11  ;;  %v7604_v10 = vld [vmem:[#allocation10_spill] sm:$0xff]  ;;  %v7605_v11 = vld [vmem:[#allocation11_spill] sm:$0xff] }
  0xf0   : > { %962 = vrot.lane.b32.xlu0 %v5114_v29, %s4938_s27  ;;  %964 = vrot.lane.b32.xlu1 %v5117_v30, %s4938_s27 }
  0xf2   : > { %v592_v13 = vpop.permute.xlu0 %591  ;;  %v594_v14 = vpop.permute.xlu1 %593 }
  0xf3   : > { %666 = vst.msk [vmem:[#allocation2 + $0xb0] sm:$0xff] %vm643_vm2, %v592_v13  ;;  %667 = vst.msk [vmem:[#allocation2 + $0xb8] sm:$0xff] %vm643_vm2, %v594_v14 }
  0xf4   : > { %966 = vrot.lane.b32.xlu0 %v5187_v42, %s4938_s27  ;;  %968 = vrot.lane.b32.xlu1 %v5190_v43, %s4938_s27 }
  0xf6   : > { %v596_v19 = vpop.permute.xlu0 %595  ;;  %v598_v21 = vpop.permute.xlu1 %597 }
  0xf7   : > { %668 = vst.msk [vmem:[#allocation2 + $0xc0] sm:$0xff] %vm643_vm2, %v596_v19  ;;  %669 = vst.msk [vmem:[#allocation2 + $0xc8] sm:$0xff] %vm643_vm2, %v598_v21  ;;  %v7606_v19 = vld [vmem:[#allocation12_spill] sm:$0xff]  ;;  %v7607_v21 = vld [vmem:[#allocation13_spill] sm:$0xff] }
  0xf8   : > { %970 = vrot.lane.b32.xlu0 %v5207_v46, %s4938_s27  ;;  %972 = vrot.lane.b32.xlu1 %v5210_v47, %s4938_s27 }
  0xfa   : > { %v600_v29 = vpop.permute.xlu0 %599  ;;  %v602_v30 = vpop.permute.xlu1 %601 }
  0xfb   : > { %670 = vst.msk [vmem:[#allocation2 + $0xd0] sm:$0xff] %vm643_vm2, %v600_v29  ;;  %671 = vst.msk [vmem:[#allocation2 + $0xd8] sm:$0xff] %vm643_vm2, %v602_v30 }
  0xfc   : > { %974 = vrot.lane.b32.xlu0 %v5227_v50, %s4938_s27  ;;  %976 = vrot.lane.b32.xlu1 %v5230_v51, %s4938_s27 }
  0xfe   : > { %v604_v42 = vpop.permute.xlu0 %603  ;;  %v606_v43 = vpop.permute.xlu1 %605 }
  0xff   : > { %672 = vst.msk [vmem:[#allocation2 + $0xe0] sm:$0xff] %vm643_vm2, %v604_v42  ;;  %673 = vst.msk [vmem:[#allocation2 + $0xe8] sm:$0xff] %vm643_vm2, %v606_v43  ;;  %v7608_v42 = vld [vmem:[#allocation14_spill] sm:$0xff]  ;;  %v7609_v43 = vld [vmem:[#allocation15_spill] sm:$0xff] }
 0x100   : > { %978 = vrot.lane.b32.xlu0 %v5247_v54, %s4938_s27  ;;  %980 = vrot.lane.b32.xlu1 %v5250_v55, %s4938_s27  ;;  %v7598_v54 = vld [vmem:[#allocation4_spill] sm:$0xff]  ;;  %v7599_v55 = vld [vmem:[#allocation5_spill] sm:$0xff] }
 0x102   : > { %v608_v46 = vpop.permute.xlu0 %607  ;;  %v610_v47 = vpop.permute.xlu1 %609 }
 0x103   : > { %674 = vst.msk [vmem:[#allocation2 + $0xf0] sm:$0xff] %vm643_vm2, %v608_v46  ;;  %675 = vst.msk [vmem:[#allocation2 + $0xf8] sm:$0xff] %vm643_vm2, %v610_v47 }
 0x104   : > { %982 = vrot.lane.b32.xlu0 %v5267_v58, %s4938_s27  ;;  %984 = vrot.lane.b32.xlu1 %v5270_v59, %s4938_s27  ;;  %v7600_v58 = vld [vmem:[#allocation6_spill] sm:$0xff]  ;;  %v7601_v59 = vld [vmem:[#allocation7_spill] sm:$0xff] }
 0x106   : > { %v742_v50 = vpop.permute.xlu0 %741  ;;  %v744_v51 = vpop.permute.xlu1 %743 }
 0x107   : > { %838 = vst.msk [vmem:[#allocation2] sm:$0xff] %vm837_vm3, %v742_v50  ;;  %839 = vst.msk [vmem:[#allocation2 + $0x8] sm:$0xff] %vm837_vm3, %v744_v51  ;;  %v7610_v50 = vld [vmem:[#allocation16_spill] sm:$0xff]  ;;  %v7611_v51 = vld [vmem:[#allocation17_spill] sm:$0xff] }
 0x108   : > { %986 = vrot.lane.b32.xlu0 %v7598_v54, %s4938_s27  ;;  %988 = vrot.lane.b32.xlu1 %v7599_v55, %s4938_s27 }
 0x10a   : > { %v746_v12 = vpop.permute.xlu0 %745  ;;  %v748_v16 = vpop.permute.xlu1 %747 }
 0x10b   : > { %840 = vst.msk [vmem:[#allocation2 + $0x10] sm:$0xff] %vm837_vm3, %v746_v12  ;;  %841 = vst.msk [vmem:[#allocation2 + $0x18] sm:$0xff] %vm837_vm3, %v748_v16  ;;  %v7612_v12 = vld [vmem:[#allocation18_spill] sm:$0xff]  ;;  %v7613_v16 = vld [vmem:[#allocation19_spill] sm:$0xff] }
 0x10c   : > { %990 = vrot.lane.b32.xlu0 %v7600_v58, %s4938_s27  ;;  %992 = vrot.lane.b32.xlu1 %v7601_v59, %s4938_s27 }
 0x10e   : > { %v750_v1 = vpop.permute.xlu0 %749  ;;  %v752_v3 = vpop.permute.xlu1 %751 }
 0x10f   : > { %842 = vst.msk [vmem:[#allocation2 + $0x20] sm:$0xff] %vm837_vm3, %v750_v1  ;;  %843 = vst.msk [vmem:[#allocation2 + $0x28] sm:$0xff] %vm837_vm3, %v752_v3  ;;  %v7614_v1 = vld [vmem:[#allocation20_spill] sm:$0xff]  ;;  %v7615_v3 = vld [vmem:[#allocation21_spill] sm:$0xff] }
 0x110   : > { %994 = vrot.lane.b32.xlu0 %v5651_v60, %s4938_s27  ;;  %996 = vrot.lane.b32.xlu1 %v5654_v63, %s4938_s27 }
 0x112   : > { %v754_v4 = vpop.permute.xlu0 %753  ;;  %v756_v5 = vpop.permute.xlu1 %755 }
 0x113   : > { %844 = vst.msk [vmem:[#allocation2 + $0x30] sm:$0xff] %vm837_vm3, %v754_v4  ;;  %845 = vst.msk [vmem:[#allocation2 + $0x38] sm:$0xff] %vm837_vm3, %v756_v5 }
 0x114   : > { %1127 = vrot.lane.b32.xlu0 %v7602_v6, %s4939_s28  ;;  %1129 = vrot.lane.b32.xlu1 %v7603_v7, %s4939_s28  ;;  %v7616_v6 = vld [vmem:[#allocation22_spill] sm:$0xff]  ;;  %v7617_v7 = vld [vmem:[#allocation23_spill] sm:$0xff] }
 0x116   : > { %v758_v8 = vpop.permute.xlu0 %757  ;;  %v760_v9 = vpop.permute.xlu1 %759 }
 0x117   : > { %846 = vst.msk [vmem:[#allocation2 + $0x40] sm:$0xff] %vm837_vm3, %v758_v8  ;;  %847 = vst.msk [vmem:[#allocation2 + $0x48] sm:$0xff] %vm837_vm3, %v760_v9 }
 0x118   : > { %1131 = vrot.lane.b32.xlu0 %v7604_v10, %s4939_s28  ;;  %1133 = vrot.lane.b32.xlu1 %v7605_v11, %s4939_s28  ;;  %v7618_v10 = vld [vmem:[#allocation24_spill] sm:$0xff]  ;;  %v7619_v11 = vld [vmem:[#allocation25_spill] sm:$0xff] }
 0x11a   : > { %v762_v13 = vpop.permute.xlu0 %761  ;;  %v764_v14 = vpop.permute.xlu1 %763 }
 0x11b   : > { %848 = vst.msk [vmem:[#allocation2 + $0x50] sm:$0xff] %vm837_vm3, %v762_v13  ;;  %849 = vst.msk [vmem:[#allocation2 + $0x58] sm:$0xff] %vm837_vm3, %v764_v14 }
 0x11c   : > { %1135 = vrot.lane.b32.xlu0 %v7606_v19, %s4939_s28  ;;  %1137 = vrot.lane.b32.xlu1 %v7607_v21, %s4939_s28  ;;  %v7620_v19 = vld [vmem:[#allocation26_spill] sm:$0xff]  ;;  %v7621_v21 = vld [vmem:[#allocation27_spill] sm:$0xff] }
 0x11e   : > { %v766_v29 = vpop.permute.xlu0 %765  ;;  %v768_v30 = vpop.permute.xlu1 %767 }
 0x11f   : > { %850 = vst.msk [vmem:[#allocation2 + $0x60] sm:$0xff] %vm837_vm3, %v766_v29  ;;  %851 = vst.msk [vmem:[#allocation2 + $0x68] sm:$0xff] %vm837_vm3, %v768_v30 }
 0x120   : > { %1139 = vrot.lane.b32.xlu0 %v7608_v42, %s4939_s28  ;;  %1141 = vrot.lane.b32.xlu1 %v7609_v43, %s4939_s28  ;;  %v7622_v42 = vld [vmem:[#allocation28_spill] sm:$0xff]  ;;  %v7623_v43 = vld [vmem:[#allocation29_spill] sm:$0xff] }
 0x122   : > { %v770_v46 = vpop.permute.xlu0 %769  ;;  %v772_v47 = vpop.permute.xlu1 %771 }
 0x123   : > { %852 = vst.msk [vmem:[#allocation2 + $0x70] sm:$0xff] %vm837_vm3, %v770_v46  ;;  %853 = vst.msk [vmem:[#allocation2 + $0x78] sm:$0xff] %vm837_vm3, %v772_v47 }
 0x124   : > { %1143 = vrot.lane.b32.xlu0 %v7610_v50, %s4939_s28  ;;  %1145 = vrot.lane.b32.xlu1 %v7611_v51, %s4939_s28  ;;  %v7624_v50 = vld [vmem:[#allocation30_spill] sm:$0xff]  ;;  %v7625_v51 = vld [vmem:[#allocation31_spill] sm:$0xff] }
 0x126   : > { %v774_v54 = vpop.permute.xlu0 %773  ;;  %v776_v55 = vpop.permute.xlu1 %775 }
 0x127   : > { %854 = vst.msk [vmem:[#allocation2 + $0x80] sm:$0xff] %vm837_vm3, %v774_v54  ;;  %855 = vst.msk [vmem:[#allocation2 + $0x88] sm:$0xff] %vm837_vm3, %v776_v55 }
 0x128   : > { %1147 = vrot.lane.b32.xlu0 %v7612_v12, %s4939_s28  ;;  %1149 = vrot.lane.b32.xlu1 %v7613_v16, %s4939_s28  ;;  %v7626_v12 = vld [vmem:[#allocation32_spill] sm:$0xff]  ;;  %v7627_v16 = vld [vmem:[#allocation33_spill] sm:$0xff] }
 0x12a   : > { %v778_v58 = vpop.permute.xlu0 %777  ;;  %v780_v59 = vpop.permute.xlu1 %779 }
 0x12b   : > { %856 = vst.msk [vmem:[#allocation2 + $0x90] sm:$0xff] %vm837_vm3, %v778_v58  ;;  %857 = vst.msk [vmem:[#allocation2 + $0x98] sm:$0xff] %vm837_vm3, %v780_v59 }
 0x12c   : > { %1151 = vrot.lane.b32.xlu0 %v7614_v1, %s4939_s28  ;;  %1153 = vrot.lane.b32.xlu1 %v7615_v3, %s4939_s28 }
 0x12e   : > { %v782_v4 = vpop.permute.xlu0 %781  ;;  %v784_v5 = vpop.permute.xlu1 %783 }
 0x12f   : > { %858 = vst.msk [vmem:[#allocation2 + $0xa0] sm:$0xff] %vm837_vm3, %v782_v4  ;;  %859 = vst.msk [vmem:[#allocation2 + $0xa8] sm:$0xff] %vm837_vm3, %v784_v5  ;;  %v5753_v4 = vld [vmem:[%s4988_s23 + $0x182] sm:$0xff]  ;;  %v5756_v5 = vld [vmem:[%s4988_s23 + $0x18a] sm:$0xff] }
 0x130   : > { %1155 = vrot.lane.b32.xlu0 %v7616_v6, %s4939_s28  ;;  %1157 = vrot.lane.b32.xlu1 %v7617_v7, %s4939_s28 }
 0x132   : > { %v786_v8 = vpop.permute.xlu0 %785  ;;  %v788_v9 = vpop.permute.xlu1 %787 }
 0x133   : > { %860 = vst.msk [vmem:[#allocation2 + $0xb0] sm:$0xff] %vm837_vm3, %v786_v8  ;;  %861 = vst.msk [vmem:[#allocation2 + $0xb8] sm:$0xff] %vm837_vm3, %v788_v9 }
 0x134   : > { %1159 = vrot.lane.b32.xlu0 %v7618_v10, %s4939_s28  ;;  %1161 = vrot.lane.b32.xlu1 %v7619_v11, %s4939_s28  ;;  %v1870_v11 = vld [vmem:[%s7467_s1 + $0x10] sm:$0xff] }
 0x136   : > { %v790_v13 = vpop.permute.xlu0 %789  ;;  %v792_v14 = vpop.permute.xlu1 %791 }
 0x137   : > { %862 = vst.msk [vmem:[#allocation2 + $0xc0] sm:$0xff] %vm837_vm3, %v790_v13  ;;  %863 = vst.msk [vmem:[#allocation2 + $0xc8] sm:$0xff] %vm837_vm3, %v792_v14  ;;  %v1871_v13 = vld [vmem:[%s7467_s1 + $0x18] sm:$0xff] }
 0x138   : > { %1163 = vrot.lane.b32.xlu0 %v7620_v19, %s4939_s28  ;;  %1165 = vrot.lane.b32.xlu1 %v7621_v21, %s4939_s28  ;;  %v4536_v14 = vld [vmem:[%s4988_s23 + $0x31] sm:$0xff] }
 0x13a   : > { %v794_v29 = vpop.permute.xlu0 %793  ;;  %v796_v30 = vpop.permute.xlu1 %795 }
 0x13b   : > { %864 = vst.msk [vmem:[#allocation2 + $0xd0] sm:$0xff] %vm837_vm3, %v794_v29  ;;  %865 = vst.msk [vmem:[#allocation2 + $0xd8] sm:$0xff] %vm837_vm3, %v796_v30  ;;  %v1872_v29 = vld [vmem:[%s7467_s1 + $0x20] sm:$0xf] }
 0x13c   : > { %1167 = vrot.lane.b32.xlu0 %v7622_v42, %s4939_s28  ;;  %1169 = vrot.lane.b32.xlu1 %v7623_v43, %s4939_s28  ;;  %v4569_v43 = vld [vmem:[%s4988_s23 + $0x3a] sm:$0xff] }
 0x13e   : > { %v798_v46 = vpop.permute.xlu0 %797  ;;  %v800_v47 = vpop.permute.xlu1 %799 }
 0x13f   : > { %866 = vst.msk [vmem:[#allocation2 + $0xe0] sm:$0xff] %vm837_vm3, %v798_v46  ;;  %867 = vst.msk [vmem:[#allocation2 + $0xe8] sm:$0xff] %vm837_vm3, %v800_v47  ;;  %v4538_v46 = vld [vmem:[%s4988_s23 + $0x49] sm:$0xff] }
 0x140   : > { %1171 = vrot.lane.b32.xlu0 %v7624_v50, %s4939_s28  ;;  %1173 = vrot.lane.b32.xlu1 %v7625_v51, %s4939_s28  ;;  %v4539_v51 = vld [vmem:[%s4988_s23 + $0x51] sm:$0xff] }
 0x142   : > { %v802_v54 = vpop.permute.xlu0 %801  ;;  %v804_v55 = vpop.permute.xlu1 %803 }
 0x143   : > { %868 = vst.msk [vmem:[#allocation2 + $0xf0] sm:$0xff] %vm837_vm3, %v802_v54  ;;  %869 = vst.msk [vmem:[#allocation2 + $0xf8] sm:$0xff] %vm837_vm3, %v804_v55  ;;  %v4570_v54 = vld [vmem:[%s4988_s23 + $0x4a] sm:$0xff] }
 0x144   : > { %1175 = vrot.lane.b32.xlu0 %v7626_v12, %s4939_s28  ;;  %1177 = vrot.lane.b32.xlu1 %v7627_v16, %s4939_s28  ;;  %v4571_v16 = vld [vmem:[%s4988_s23 + $0x52] sm:$0xff] }
 0x146   : > { %v935_v58 = vpop.permute.xlu0 %934  ;;  %v937_v59 = vpop.permute.xlu1 %936 }
 0x147   : > { %1031 = vst.msk [vmem:[#allocation2] sm:$0xff] %vm1030_vm4, %v935_v58  ;;  %1032 = vst.msk [vmem:[#allocation2 + $0x8] sm:$0xff] %vm1030_vm4, %v937_v59  ;;  %v4540_v58 = vld [vmem:[%s4988_s23 + $0x61] sm:$0xff] }
 0x148   : > { %1179 = vrot.lane.b32.xlu0 %v5435_v2, %s4939_s28  ;;  %1181 = vrot.lane.b32.xlu1 %v5438_v0, %s4939_s28 }
 0x14a   : > { %v939_v1 = vpop.permute.xlu0 %938  ;;  %v941_v3 = vpop.permute.xlu1 %940 }
 0x14b   : > { %1033 = vst.msk [vmem:[#allocation2 + $0x10] sm:$0xff] %vm1030_vm4, %v939_v1  ;;  %1034 = vst.msk [vmem:[#allocation2 + $0x18] sm:$0xff] %vm1030_vm4, %v941_v3  ;;  %v4541_v3 = vld [vmem:[%s4988_s23 + $0x69] sm:$0xff] }
 0x14c   : > { %1183 = vrot.lane.b32.xlu0 %v5447_v61, %s4939_s28  ;;  %1185 = vrot.lane.b32.xlu1 %v5450_v62, %s4939_s28 }
 0x14e   : > { %v943_v2 = vpop.permute.xlu0 %942  ;;  %v945_v6 = vpop.permute.xlu1 %944 }
 0x14f   : > { %1035 = vst.msk [vmem:[#allocation2 + $0x20] sm:$0xff] %vm1030_vm4, %v943_v2  ;;  %1036 = vst.msk [vmem:[#allocation2 + $0x28] sm:$0xff] %vm1030_vm4, %v945_v6  ;;  %v4572_v2 = vld [vmem:[%s4988_s23 + $0x62] sm:$0xff] }
 0x150   : > { %1187 = vrot.lane.b32.xlu0 %v5753_v4, %s4939_s28  ;;  %1189 = vrot.lane.b32.xlu1 %v5756_v5, %s4939_s28 }
 0x152   : > { %v947_v0 = vpop.permute.xlu0 %946  ;;  %v949_v61 = vpop.permute.xlu1 %948 }
 0x153   : > { %1037 = vst.msk [vmem:[#allocation2 + $0x30] sm:$0xff] %vm1030_vm4, %v947_v0  ;;  %1038 = vst.msk [vmem:[#allocation2 + $0x38] sm:$0xff] %vm1030_vm4, %v949_v61  ;;  %v4573_v61 = vld [vmem:[%s4988_s23 + $0x6a] sm:$0xff] }
 0x154   : > { %1321 = vrot.lane.b32.xlu0 %v5063_v18, %s4940_s29  ;;  %1323 = vrot.lane.b32.xlu1 %v5073_v20, %s4940_s29 }
 0x156   : > { %v951_v62 = vpop.permute.xlu0 %950  ;;  %v953_v7 = vpop.permute.xlu1 %952 }
 0x157   : > { %1039 = vst.msk [vmem:[#allocation2 + $0x40] sm:$0xff] %vm1030_vm4, %v951_v62  ;;  %1040 = vst.msk [vmem:[#allocation2 + $0x48] sm:$0xff] %vm1030_vm4, %v953_v7  ;;  %v4542_v62 = vld [vmem:[%s4988_s23 + $0x79] sm:$0xff] }
 0x158   : > { %1325 = vrot.lane.b32.xlu0 %v5085_v22, %s4940_s29  ;;  %1327 = vrot.lane.b32.xlu1 %v5090_v23, %s4940_s29 }
 0x15a   : > { %v955_v8 = vpop.permute.xlu0 %954  ;;  %v957_v9 = vpop.permute.xlu1 %956 }
 0x15b   : > { %1041 = vst.msk [vmem:[#allocation2 + $0x50] sm:$0xff] %vm1030_vm4, %v955_v8  ;;  %1042 = vst.msk [vmem:[#allocation2 + $0x58] sm:$0xff] %vm1030_vm4, %v957_v9  ;;  %v4543_v9 = vld [vmem:[%s4988_s23 + $0x81] sm:$0xff] }
 0x15c   : > { %1329 = vrot.lane.b32.xlu0 %v5093_v24, %s4940_s29  ;;  %1331 = vrot.lane.b32.xlu1 %v5096_v25, %s4940_s29 }
 0x15e   : > { %v959_v18 = vpop.permute.xlu0 %958  ;;  %v961_v20 = vpop.permute.xlu1 %960 }
 0x15f   : > { %1043 = vst.msk [vmem:[#allocation2 + $0x60] sm:$0xff] %vm1030_vm4, %v959_v18  ;;  %1044 = vst.msk [vmem:[#allocation2 + $0x68] sm:$0xff] %vm1030_vm4, %v961_v20  ;;  %v4574_v18 = vld [vmem:[%s4988_s23 + $0x7a] sm:$0xff] }
 0x160   : > { %1333 = vrot.lane.b32.xlu0 %v5105_v26, %s4940_s29  ;;  %1335 = vrot.lane.b32.xlu1 %v5108_v27, %s4940_s29 }
 0x162   : > { %v963_v22 = vpop.permute.xlu0 %962  ;;  %v965_v23 = vpop.permute.xlu1 %964 }
 0x163   : > { %1045 = vst.msk [vmem:[#allocation2 + $0x70] sm:$0xff] %vm1030_vm4, %v963_v22  ;;  %1046 = vst.msk [vmem:[#allocation2 + $0x78] sm:$0xff] %vm1030_vm4, %v965_v23  ;;  %v4575_v23 = vld [vmem:[%s4988_s23 + $0x82] sm:$0xff] }
 0x164   : > { %1337 = vrot.lane.b32.xlu0 %v5111_v28, %s4940_s29  ;;  %1339 = vrot.lane.b32.xlu1 %v5126_v31, %s4940_s29 }
 0x166   : > { %v967_v24 = vpop.permute.xlu0 %966  ;;  %v969_v25 = vpop.permute.xlu1 %968 }
 0x167   : > { %1047 = vst.msk [vmem:[#allocation2 + $0x80] sm:$0xff] %vm1030_vm4, %v967_v24  ;;  %1048 = vst.msk [vmem:[#allocation2 + $0x88] sm:$0xff] %vm1030_vm4, %v969_v25  ;;  %v4544_v24 = vld [vmem:[%s4988_s23 + $0x91] sm:$0xff] }
 0x168   : > { %1341 = vrot.lane.b32.xlu0 %v5129_v32, %s4940_s29  ;;  %1343 = vrot.lane.b32.xlu1 %v5132_v33, %s4940_s29 }
 0x16a   : > { %v971_v26 = vpop.permute.xlu0 %970  ;;  %v973_v27 = vpop.permute.xlu1 %972 }
 0x16b   : > { %1049 = vst.msk [vmem:[#allocation2 + $0x90] sm:$0xff] %vm1030_vm4, %v971_v26  ;;  %1050 = vst.msk [vmem:[#allocation2 + $0x98] sm:$0xff] %vm1030_vm4, %v973_v27  ;;  %v4545_v27 = vld [vmem:[%s4988_s23 + $0x99] sm:$0xff] }
 0x16c   : > { %1345 = vrot.lane.b32.xlu0 %v5145_v34, %s4940_s29  ;;  %1347 = vrot.lane.b32.xlu1 %v5148_v35, %s4940_s29 }
 0x16e   : > { %v975_v28 = vpop.permute.xlu0 %974  ;;  %v977_v31 = vpop.permute.xlu1 %976 }
 0x16f   : > { %1051 = vst.msk [vmem:[#allocation2 + $0xa0] sm:$0xff] %vm1030_vm4, %v975_v28  ;;  %1052 = vst.msk [vmem:[#allocation2 + $0xa8] sm:$0xff] %vm1030_vm4, %v977_v31  ;;  %v4576_v28 = vld [vmem:[%s4988_s23 + $0x92] sm:$0xff] }
 0x170   : > { %1349 = vrot.lane.b32.xlu0 %v5155_v36, %s4940_s29  ;;  %1351 = vrot.lane.b32.xlu1 %v5158_v37, %s4940_s29 }
 0x172   : > { %v979_v32 = vpop.permute.xlu0 %978  ;;  %v981_v33 = vpop.permute.xlu1 %980 }
 0x173   : > { %1053 = vst.msk [vmem:[#allocation2 + $0xb0] sm:$0xff] %vm1030_vm4, %v979_v32  ;;  %1054 = vst.msk [vmem:[#allocation2 + $0xb8] sm:$0xff] %vm1030_vm4, %v981_v33  ;;  %v4577_v33 = vld [vmem:[%s4988_s23 + $0x9a] sm:$0xff] }
 0x174   : > { %1353 = vrot.lane.b32.xlu0 %v5161_v38, %s4940_s29  ;;  %1355 = vrot.lane.b32.xlu1 %v5170_v39, %s4940_s29 }
 0x176   : > { %v983_v34 = vpop.permute.xlu0 %982  ;;  %v985_v35 = vpop.permute.xlu1 %984 }
 0x177   : > { %1055 = vst.msk [vmem:[#allocation2 + $0xc0] sm:$0xff] %vm1030_vm4, %v983_v34  ;;  %1056 = vst.msk [vmem:[#allocation2 + $0xc8] sm:$0xff] %vm1030_vm4, %v985_v35  ;;  %v4546_v34 = vld [vmem:[%s4988_s23 + $0xa9] sm:$0xff] }
 0x178   : > { %1357 = vrot.lane.b32.xlu0 %v5173_v40, %s4940_s29  ;;  %1359 = vrot.lane.b32.xlu1 %v5184_v41, %s4940_s29 }
 0x17a   : > { %v987_v36 = vpop.permute.xlu0 %986  ;;  %v989_v37 = vpop.permute.xlu1 %988 }
 0x17b   : > { %1057 = vst.msk [vmem:[#allocation2 + $0xd0] sm:$0xff] %vm1030_vm4, %v987_v36  ;;  %1058 = vst.msk [vmem:[#allocation2 + $0xd8] sm:$0xff] %vm1030_vm4, %v989_v37  ;;  %v4547_v37 = vld [vmem:[%s4988_s23 + $0xb1] sm:$0xff] }
 0x17c   : > { %1361 = vrot.lane.b32.xlu0 %v5195_v44, %s4940_s29  ;;  %1363 = vrot.lane.b32.xlu1 %v5204_v45, %s4940_s29 }
 0x17e   : > { %v991_v38 = vpop.permute.xlu0 %990  ;;  %v993_v39 = vpop.permute.xlu1 %992 }
 0x17f   : > { %1059 = vst.msk [vmem:[#allocation2 + $0xe0] sm:$0xff] %vm1030_vm4, %v991_v38  ;;  %1060 = vst.msk [vmem:[#allocation2 + $0xe8] sm:$0xff] %vm1030_vm4, %v993_v39  ;;  %v4578_v38 = vld [vmem:[%s4988_s23 + $0xaa] sm:$0xff] }
 0x180   : > { %1365 = vrot.lane.b32.xlu0 %v5215_v48, %s4940_s29  ;;  %1367 = vrot.lane.b32.xlu1 %v5224_v49, %s4940_s29  ;;  %v1868_v48 = vld [vmem:[%s7467_s1] sm:$0xff]  ;;  %v1869_v49 = vld [vmem:[%s7467_s1 + $0x8] sm:$0xff] }
 0x182   : > { %v995_v40 = vpop.permute.xlu0 %994  ;;  %v997_v41 = vpop.permute.xlu1 %996 }
 0x183   : > { %1061 = vst.msk [vmem:[#allocation2 + $0xf0] sm:$0xff] %vm1030_vm4, %v995_v40  ;;  %1062 = vst.msk [vmem:[#allocation2 + $0xf8] sm:$0xff] %vm1030_vm4, %v997_v41  ;;  %v4579_v41 = vld [vmem:[%s4988_s23 + $0xb2] sm:$0xff] }
 0x184   : > { %1369 = vrot.lane.b32.xlu0 %v5235_v52, %s4940_s29  ;;  %1371 = vrot.lane.b32.xlu1 %v5244_v53, %s4940_s29  ;;  %v4893_v52 = vpack.c.bf16 %v1869_v49, %v1868_v48  ;;  %v4549_v49 = vld [vmem:[%s4988_s23 + $0xc9] sm:$0xff] }
 0x186   : > { %v1128_v44 = vpop.permute.xlu0 %1127  ;;  %v1130_v45 = vpop.permute.xlu1 %1129  ;;  %4894 = vmatprep.subr.bf16.mxu0 %v4893_v52 }
 0x187   : > { %1224 = vst.msk [vmem:[#allocation2] sm:$0xff] %vm1223_vm5, %v1128_v44  ;;  %1225 = vst.msk [vmem:[#allocation2 + $0x8] sm:$0xff] %vm1223_vm5, %v1130_v45  ;;  %4896 = vmatpush3.bf16.msra.mxu0 %v4893_v52  ;;  %v4548_v44 = vld [vmem:[%s4988_s23 + $0xc1] sm:$0xff] }
 0x188   : > { %1373 = vrot.lane.b32.xlu0 %v5255_v56, %s4940_s29  ;;  %1375 = vrot.lane.b32.xlu1 %v5264_v57, %s4940_s29  ;;  %v4897_v56 = vpack.c.bf16 %v1871_v13, %v1870_v11  ;;  %v4534_v57 = vld [vmem:[%s4988_s23 + $0x198] sm:$0xff]  ;;  %v4580_v52 = vld [vmem:[%s4988_s23 + $0xc2] sm:$0xff] }
 0x189   : > { %v4581_v11 = vld [vmem:[%s4988_s23 + $0xca] sm:$0xff]  ;;  %v4550_v13 = vld [vmem:[%s4988_s23 + $0xd9] sm:$0xff] }
 0x18a   : > { %v1132_v53 = vpop.permute.xlu0 %1131  ;;  %v1134_v10 = vpop.permute.xlu1 %1133  ;;  %4898 = vmatprep.subr.bf16.mxu0 %v4897_v56 }
 0x18b   : > { %1226 = vst.msk [vmem:[#allocation2 + $0x10] sm:$0xff] %vm1223_vm5, %v1132_v53  ;;  %1227 = vst.msk [vmem:[#allocation2 + $0x18] sm:$0xff] %vm1223_vm5, %v1134_v10  ;;  %4900 = vmatpush3.bf16.msra.mxu0 %v4897_v56 }
 0x18c   : > { %1377 = vrot.lane.b32.xlu0 %v5549_v15, %s4940_s29  ;;  %1379 = vrot.lane.b32.xlu1 %v5552_v17, %s4940_s29  ;;  %v4537_v15 = vld [vmem:[%s4988_s23 + $0x39] sm:$0xff] }
 0x18d   : > { %v4568_v17 = vld [vmem:[%s4988_s23 + $0x32] sm:$0xff]  ;;  %4785 = vmatprep.subr.msk.mxu0 %vm1977_vm6, %v1872_v29 }
 0x18e   : > { %v1136_v19 = vpop.permute.xlu0 %1135  ;;  %v1138_v21 = vpop.permute.xlu1 %1137 }
 0x18f   : > { %1228 = vst.msk [vmem:[#allocation2 + $0x20] sm:$0xff] %vm1223_vm5, %v1136_v19  ;;  %1229 = vst.msk [vmem:[#allocation2 + $0x28] sm:$0xff] %vm1223_vm5, %v1138_v21  ;;  %4786 = vmatpush3.msk.msra.mxu0 %vm1977_vm6, %v1872_v29  ;;  %v4582_v19 = vld [vmem:[%s4988_s23 + $0xda] sm:$0xff] }
 0x190   : > { %1381 = vrot.lane.b32.xlu0 %v4534_v57, %s4940_s29  ;;  %1514 = vrot.lane.b32.xlu1 %v4536_v14, %s4941_s15  ;;  %v4551_v14 = vld [vmem:[%s4988_s23 + $0xe1] sm:$0xff] }
 0x192   : > { %v1140_v30 = vpop.permute.xlu0 %1139  ;;  %v1142_v42 = vpop.permute.xlu1 %1141 }
 0x193   : > { %1230 = vst.msk [vmem:[#allocation2 + $0x30] sm:$0xff] %vm1223_vm5, %v1140_v30  ;;  %1231 = vst.msk [vmem:[#allocation2 + $0x38] sm:$0xff] %vm1223_vm5, %v1142_v42 }
 0x194   : > { %1516 = vrot.lane.b32.xlu0 %v4537_v15, %s4941_s15  ;;  %1707 = vrot.lane.b32.xlu1 %v4568_v17, %s4942_s16  ;;  %v4583_v15 = vld [vmem:[%s4988_s23 + $0xe2] sm:$0xff]  ;;  %v4552_v17 = vld [vmem:[%s4988_s23 + $0xf1] sm:$0xff] }
 0x196   : > { %v1144_v47 = vpop.permute.xlu0 %1143  ;;  %v1146_v50 = vpop.permute.xlu1 %1145 }
 0x197   : > { %1232 = vst.msk [vmem:[#allocation2 + $0x40] sm:$0xff] %vm1223_vm5, %v1144_v47  ;;  %1233 = vst.msk [vmem:[#allocation2 + $0x48] sm:$0xff] %vm1223_vm5, %v1146_v50 }
 0x198   : > { %1709 = vrot.lane.b32.xlu0 %v4569_v43, %s4942_s16  ;;  %1518 = vrot.lane.b32.xlu1 %v4538_v46, %s4941_s15  ;;  %v4553_v43 = vld [vmem:[%s4988_s23 + $0xf9] sm:$0xff] }
 0x199   : > { %v4584_v46 = vld [vmem:[%s4988_s23 + $0xf2] sm:$0xff] }
 0x19a   : > { %v1148_v55 = vpop.permute.xlu0 %1147  ;;  %v1150_v12 = vpop.permute.xlu1 %1149 }
 0x19b   : > { %1234 = vst.msk [vmem:[#allocation2 + $0x50] sm:$0xff] %vm1223_vm5, %v1148_v55  ;;  %1235 = vst.msk [vmem:[#allocation2 + $0x58] sm:$0xff] %vm1223_vm5, %v1150_v12 }
 0x19c   : > { %1520 = vrot.lane.b32.xlu0 %v4539_v51, %s4941_s15  ;;  %1711 = vrot.lane.b32.xlu1 %v4570_v54, %s4942_s16  ;;  %v4585_v51 = vld [vmem:[%s4988_s23 + $0xfa] sm:$0xff]  ;;  %v4554_v54 = vld [vmem:[%s4988_s23 + $0x109] sm:$0xff] }
 0x19e   : > { %v1152_v59 = vpop.permute.xlu0 %1151  ;;  %v1154_v1 = vpop.permute.xlu1 %1153 }
 0x19f   : > { %1236 = vst.msk [vmem:[#allocation2 + $0x60] sm:$0xff] %vm1223_vm5, %v1152_v59  ;;  %1237 = vst.msk [vmem:[#allocation2 + $0x68] sm:$0xff] %vm1223_vm5, %v1154_v1 }
 0x1a0   : > { %1713 = vrot.lane.b32.xlu0 %v4571_v16, %s4942_s16  ;;  %1522 = vrot.lane.b32.xlu1 %v4540_v58, %s4941_s15  ;;  %v4555_v16 = vld [vmem:[%s4988_s23 + $0x111] sm:$0xff] }
 0x1a1   : > { %v4586_v58 = vld [vmem:[%s4988_s23 + $0x10a] sm:$0xff] }
 0x1a2   : > { %v1156_v6 = vpop.permute.xlu0 %1155  ;;  %v1158_v0 = vpop.permute.xlu1 %1157 }
 0x1a3   : > { %1238 = vst.msk [vmem:[#allocation2 + $0x70] sm:$0xff] %vm1223_vm5, %v1156_v6  ;;  %1239 = vst.msk [vmem:[#allocation2 + $0x78] sm:$0xff] %vm1223_vm5, %v1158_v0 }
 0x1a4   : > { %1524 = vrot.lane.b32.xlu0 %v4541_v3, %s4941_s15  ;;  %1715 = vrot.lane.b32.xlu1 %v4572_v2, %s4942_s16  ;;  %v4587_v3 = vld [vmem:[%s4988_s23 + $0x112] sm:$0xff]  ;;  %v4556_v2 = vld [vmem:[%s4988_s23 + $0x121] sm:$0xff] }
 0x1a6   : > { %v1160_v7 = vpop.permute.xlu0 %1159  ;;  %v1162_v8 = vpop.permute.xlu1 %1161 }
 0x1a7   : > { %1240 = vst.msk [vmem:[#allocation2 + $0x80] sm:$0xff] %vm1223_vm5, %v1160_v7  ;;  %1241 = vst.msk [vmem:[#allocation2 + $0x88] sm:$0xff] %vm1223_vm5, %v1162_v8 }
 0x1a8   : > { %1717 = vrot.lane.b32.xlu0 %v4573_v61, %s4942_s16  ;;  %1526 = vrot.lane.b32.xlu1 %v4542_v62, %s4941_s15  ;;  %v4557_v61 = vld [vmem:[%s4988_s23 + $0x129] sm:$0xff] }
 0x1a9   : > { %v4588_v62 = vld [vmem:[%s4988_s23 + $0x122] sm:$0xff] }
 0x1aa   : > { %v1164_v20 = vpop.permute.xlu0 %1163  ;;  %v1166_v22 = vpop.permute.xlu1 %1165 }
 0x1ab   : > { %1242 = vst.msk [vmem:[#allocation2 + $0x90] sm:$0xff] %vm1223_vm5, %v1164_v20  ;;  %1243 = vst.msk [vmem:[#allocation2 + $0x98] sm:$0xff] %vm1223_vm5, %v1166_v22 }
 0x1ac   : > { %1528 = vrot.lane.b32.xlu0 %v4543_v9, %s4941_s15  ;;  %1719 = vrot.lane.b32.xlu1 %v4574_v18, %s4942_s16  ;;  %v4589_v9 = vld [vmem:[%s4988_s23 + $0x12a] sm:$0xff]  ;;  %v4558_v18 = vld [vmem:[%s4988_s23 + $0x139] sm:$0xff] }
 0x1ae   : > { %v1168_v25 = vpop.permute.xlu0 %1167  ;;  %v1170_v26 = vpop.permute.xlu1 %1169 }
 0x1af   : > { %1244 = vst.msk [vmem:[#allocation2 + $0xa0] sm:$0xff] %vm1223_vm5, %v1168_v25  ;;  %1245 = vst.msk [vmem:[#allocation2 + $0xa8] sm:$0xff] %vm1223_vm5, %v1170_v26 }
 0x1b0   : > { %1721 = vrot.lane.b32.xlu0 %v4575_v23, %s4942_s16  ;;  %1530 = vrot.lane.b32.xlu1 %v4544_v24, %s4941_s15  ;;  %v4559_v23 = vld [vmem:[%s4988_s23 + $0x141] sm:$0xff] }
 0x1b1   : > { %v4590_v24 = vld [vmem:[%s4988_s23 + $0x13a] sm:$0xff] }
 0x1b2   : > { %v1172_v31 = vpop.permute.xlu0 %1171  ;;  %v1174_v32 = vpop.permute.xlu1 %1173 }
 0x1b3   : > { %1246 = vst.msk [vmem:[#allocation2 + $0xb0] sm:$0xff] %vm1223_vm5, %v1172_v31  ;;  %1247 = vst.msk [vmem:[#allocation2 + $0xb8] sm:$0xff] %vm1223_vm5, %v1174_v32 }
 0x1b4   : > { %1532 = vrot.lane.b32.xlu0 %v4545_v27, %s4941_s15  ;;  %1723 = vrot.lane.b32.xlu1 %v4576_v28, %s4942_s16  ;;  %v4591_v27 = vld [vmem:[%s4988_s23 + $0x142] sm:$0xff]  ;;  %v4560_v28 = vld [vmem:[%s4988_s23 + $0x151] sm:$0xff] }
 0x1b6   : > { %v1176_v35 = vpop.permute.xlu0 %1175  ;;  %v1178_v36 = vpop.permute.xlu1 %1177 }
 0x1b7   : > { %1248 = vst.msk [vmem:[#allocation2 + $0xc0] sm:$0xff] %vm1223_vm5, %v1176_v35  ;;  %1249 = vst.msk [vmem:[#allocation2 + $0xc8] sm:$0xff] %vm1223_vm5, %v1178_v36 }
 0x1b8   : > { %1725 = vrot.lane.b32.xlu0 %v4577_v33, %s4942_s16  ;;  %1534 = vrot.lane.b32.xlu1 %v4546_v34, %s4941_s15  ;;  %v4561_v33 = vld [vmem:[%s4988_s23 + $0x159] sm:$0xff] }
 0x1b9   : > { %v4592_v34 = vld [vmem:[%s4988_s23 + $0x152] sm:$0xff] }
 0x1ba   : > { %v1180_v39 = vpop.permute.xlu0 %1179  ;;  %v1182_v40 = vpop.permute.xlu1 %1181 }
 0x1bb   : > { %1250 = vst.msk [vmem:[#allocation2 + $0xd0] sm:$0xff] %vm1223_vm5, %v1180_v39  ;;  %1251 = vst.msk [vmem:[#allocation2 + $0xd8] sm:$0xff] %vm1223_vm5, %v1182_v40 }
 0x1bc   : > { %1536 = vrot.lane.b32.xlu0 %v4547_v37, %s4941_s15  ;;  %1727 = vrot.lane.b32.xlu1 %v4578_v38, %s4942_s16  ;;  %v4593_v37 = vld [vmem:[%s4988_s23 + $0x15a] sm:$0xff]  ;;  %v4562_v38 = vld [vmem:[%s4988_s23 + $0x169] sm:$0xff] }
 0x1be   : > { %v1184_v45 = vpop.permute.xlu0 %1183  ;;  %v1186_v48 = vpop.permute.xlu1 %1185 }
 0x1bf   : > { %1252 = vst.msk [vmem:[#allocation2 + $0xe0] sm:$0xff] %vm1223_vm5, %v1184_v45  ;;  %1253 = vst.msk [vmem:[#allocation2 + $0xe8] sm:$0xff] %vm1223_vm5, %v1186_v48 }
 0x1c0   : > { %1729 = vrot.lane.b32.xlu0 %v4579_v41, %s4942_s16  ;;  %1538 = vrot.lane.b32.xlu1 %v4548_v44, %s4941_s15  ;;  %v4563_v41 = vld [vmem:[%s4988_s23 + $0x171] sm:$0xff] }
 0x1c1   : > { %v4594_v44 = vld [vmem:[%s4988_s23 + $0x16a] sm:$0xff] }
 0x1c2   : > { %v1188_v53 = vpop.permute.xlu0 %1187  ;;  %v1190_v10 = vpop.permute.xlu1 %1189 }
 0x1c3   : > { %1254 = vst.msk [vmem:[#allocation2 + $0xf0] sm:$0xff] %vm1223_vm5, %v1188_v53  ;;  %1255 = vst.msk [vmem:[#allocation2 + $0xf8] sm:$0xff] %vm1223_vm5, %v1190_v10 }
 0x1c4   : > { %1540 = vrot.lane.b32.xlu0 %v4549_v49, %s4941_s15  ;;  %1731 = vrot.lane.b32.xlu1 %v4580_v52, %s4942_s16  ;;  %v4595_v49 = vld [vmem:[%s4988_s23 + $0x172] sm:$0xff] }
 0x1c6   : > { %v1322_v56 = vpop.permute.xlu0 %1321  ;;  %v1324_v57 = vpop.permute.xlu1 %1323 }
 0x1c7   : > { %1418 = vst.msk [vmem:[#allocation2] sm:$0xff] %vm1417_vm7, %v1322_v56  ;;  %1419 = vst.msk [vmem:[#allocation2 + $0x8] sm:$0xff] %vm1417_vm7, %v1324_v57 }
 0x1c8   : > { %1733 = vrot.lane.b32.xlu0 %v4581_v11, %s4942_s16  ;;  %1542 = vrot.lane.b32.xlu1 %v4550_v13, %s4941_s15  ;;  %v4535_v13 = vld [vmem:[%s4988_s23 + $0x1a0] sm:$0xff] }
 0x1ca   : > { %v1326_v21 = vpop.permute.xlu0 %1325  ;;  %v1328_v29 = vpop.permute.xlu1 %1327 }
 0x1cb   : > { %1420 = vst.msk [vmem:[#allocation2 + $0x10] sm:$0xff] %vm1417_vm7, %v1326_v21  ;;  %1421 = vst.msk [vmem:[#allocation2 + $0x18] sm:$0xff] %vm1417_vm7, %v1328_v29 }
 0x1cc   : > { %1544 = vrot.lane.b32.xlu0 %v4551_v14, %s4941_s15  ;;  %1735 = vrot.lane.b32.xlu1 %v4582_v19, %s4942_s16  ;;  %v4566_v14 = vld [vmem:[%s4988_s23 + $0x199] sm:$0xff] }
 0x1ce   : > { %v1330_v30 = vpop.permute.xlu0 %1329  ;;  %v1332_v42 = vpop.permute.xlu1 %1331 }
 0x1cf   : > { %1422 = vst.msk [vmem:[#allocation2 + $0x20] sm:$0xff] %vm1417_vm7, %v1330_v30  ;;  %1423 = vst.msk [vmem:[#allocation2 + $0x28] sm:$0xff] %vm1417_vm7, %v1332_v42 }
 0x1d0   : > { %1737 = vrot.lane.b32.xlu0 %v4583_v15, %s4942_s16  ;;  %1546 = vrot.lane.b32.xlu1 %v4552_v17, %s4941_s15 }
 0x1d2   : > { %v1334_v47 = vpop.permute.xlu0 %1333  ;;  %v1336_v50 = vpop.permute.xlu1 %1335 }
 0x1d3   : > { %1424 = vst.msk [vmem:[#allocation2 + $0x30] sm:$0xff] %vm1417_vm7, %v1334_v47  ;;  %1425 = vst.msk [vmem:[#allocation2 + $0x38] sm:$0xff] %vm1417_vm7, %v1336_v50 }
 0x1d4   : > { %1548 = vrot.lane.b32.xlu0 %v4553_v43, %s4941_s15  ;;  %1739 = vrot.lane.b32.xlu1 %v4584_v46, %s4942_s16 }
 0x1d6   : > { %v1338_v55 = vpop.permute.xlu0 %1337  ;;  %v1340_v12 = vpop.permute.xlu1 %1339 }
 0x1d7   : > { %1426 = vst.msk [vmem:[#allocation2 + $0x40] sm:$0xff] %vm1417_vm7, %v1338_v55  ;;  %1427 = vst.msk [vmem:[#allocation2 + $0x48] sm:$0xff] %vm1417_vm7, %v1340_v12 }
 0x1d8   : > { %1741 = vrot.lane.b32.xlu0 %v4585_v51, %s4942_s16  ;;  %1550 = vrot.lane.b32.xlu1 %v4554_v54, %s4941_s15 }
 0x1da   : > { %v1342_v59 = vpop.permute.xlu0 %1341  ;;  %v1344_v1 = vpop.permute.xlu1 %1343 }
 0x1db   : > { %1428 = vst.msk [vmem:[#allocation2 + $0x50] sm:$0xff] %vm1417_vm7, %v1342_v59  ;;  %1429 = vst.msk [vmem:[#allocation2 + $0x58] sm:$0xff] %vm1417_vm7, %v1344_v1 }
 0x1dc   : > { %1552 = vrot.lane.b32.xlu0 %v4555_v16, %s4941_s15  ;;  %1743 = vrot.lane.b32.xlu1 %v4586_v58, %s4942_s16 }
 0x1de   : > { %v1346_v6 = vpop.permute.xlu0 %1345  ;;  %v1348_v0 = vpop.permute.xlu1 %1347 }
 0x1df   : > { %1430 = vst.msk [vmem:[#allocation2 + $0x60] sm:$0xff] %vm1417_vm7, %v1346_v6  ;;  %1431 = vst.msk [vmem:[#allocation2 + $0x68] sm:$0xff] %vm1417_vm7, %v1348_v0 }
 0x1e0   : > { %1745 = vrot.lane.b32.xlu0 %v4587_v3, %s4942_s16  ;;  %1554 = vrot.lane.b32.xlu1 %v4556_v2, %s4941_s15 }
 0x1e2   : > { %v1350_v7 = vpop.permute.xlu0 %1349  ;;  %v1352_v8 = vpop.permute.xlu1 %1351 }
 0x1e3   : > { %1432 = vst.msk [vmem:[#allocation2 + $0x70] sm:$0xff] %vm1417_vm7, %v1350_v7  ;;  %1433 = vst.msk [vmem:[#allocation2 + $0x78] sm:$0xff] %vm1417_vm7, %v1352_v8 }
 0x1e4   : > { %1556 = vrot.lane.b32.xlu0 %v4557_v61, %s4941_s15  ;;  %1747 = vrot.lane.b32.xlu1 %v4588_v62, %s4942_s16 }
 0x1e6   : > { %v1354_v20 = vpop.permute.xlu0 %1353  ;;  %v1356_v22 = vpop.permute.xlu1 %1355 }
 0x1e7   : > { %1434 = vst.msk [vmem:[#allocation2 + $0x80] sm:$0xff] %vm1417_vm7, %v1354_v20  ;;  %1435 = vst.msk [vmem:[#allocation2 + $0x88] sm:$0xff] %vm1417_vm7, %v1356_v22 }
 0x1e8   : > { %1749 = vrot.lane.b32.xlu0 %v4589_v9, %s4942_s16  ;;  %1558 = vrot.lane.b32.xlu1 %v4558_v18, %s4941_s15 }
 0x1ea   : > { %v1358_v25 = vpop.permute.xlu0 %1357  ;;  %v1360_v26 = vpop.permute.xlu1 %1359 }
 0x1eb   : > { %1436 = vst.msk [vmem:[#allocation2 + $0x90] sm:$0xff] %vm1417_vm7, %v1358_v25  ;;  %1437 = vst.msk [vmem:[#allocation2 + $0x98] sm:$0xff] %vm1417_vm7, %v1360_v26 }
 0x1ec   : > { %1560 = vrot.lane.b32.xlu0 %v4559_v23, %s4941_s15  ;;  %1751 = vrot.lane.b32.xlu1 %v4590_v24, %s4942_s16 }
 0x1ee   : > { %v1362_v31 = vpop.permute.xlu0 %1361  ;;  %v1364_v32 = vpop.permute.xlu1 %1363 }
 0x1ef   : > { %1438 = vst.msk [vmem:[#allocation2 + $0xa0] sm:$0xff] %vm1417_vm7, %v1362_v31  ;;  %1439 = vst.msk [vmem:[#allocation2 + $0xa8] sm:$0xff] %vm1417_vm7, %v1364_v32 }
 0x1f0   : > { %1753 = vrot.lane.b32.xlu0 %v4591_v27, %s4942_s16  ;;  %1562 = vrot.lane.b32.xlu1 %v4560_v28, %s4941_s15 }
 0x1f2   : > { %v1366_v35 = vpop.permute.xlu0 %1365  ;;  %v1368_v36 = vpop.permute.xlu1 %1367 }
 0x1f3   : > { %1440 = vst.msk [vmem:[#allocation2 + $0xb0] sm:$0xff] %vm1417_vm7, %v1366_v35  ;;  %1441 = vst.msk [vmem:[#allocation2 + $0xb8] sm:$0xff] %vm1417_vm7, %v1368_v36 }
 0x1f4   : > { %1564 = vrot.lane.b32.xlu0 %v4561_v33, %s4941_s15  ;;  %1755 = vrot.lane.b32.xlu1 %v4592_v34, %s4942_s16 }
 0x1f6   : > { %v1370_v39 = vpop.permute.xlu0 %1369  ;;  %v1372_v40 = vpop.permute.xlu1 %1371 }
 0x1f7   : > { %1442 = vst.msk [vmem:[#allocation2 + $0xc0] sm:$0xff] %vm1417_vm7, %v1370_v39  ;;  %1443 = vst.msk [vmem:[#allocation2 + $0xc8] sm:$0xff] %vm1417_vm7, %v1372_v40 }
 0x1f8   : > { %1757 = vrot.lane.b32.xlu0 %v4593_v37, %s4942_s16  ;;  %1566 = vrot.lane.b32.xlu1 %v4562_v38, %s4941_s15 }
 0x1fa   : > { %v1374_v45 = vpop.permute.xlu0 %1373  ;;  %v1376_v48 = vpop.permute.xlu1 %1375 }
 0x1fb   : > { %1444 = vst.msk [vmem:[#allocation2 + $0xd0] sm:$0xff] %vm1417_vm7, %v1374_v45  ;;  %1445 = vst.msk [vmem:[#allocation2 + $0xd8] sm:$0xff] %vm1417_vm7, %v1376_v48 }
 0x1fc   : > { %1568 = vrot.lane.b32.xlu0 %v4563_v41, %s4941_s15  ;;  %1759 = vrot.lane.b32.xlu1 %v4594_v44, %s4942_s16 }
 0x1fe   : > { %v1378_v52 = vpop.permute.xlu0 %1377  ;;  %v1380_v53 = vpop.permute.xlu1 %1379 }
 0x1ff   : > { %1446 = vst.msk [vmem:[#allocation2 + $0xe0] sm:$0xff] %vm1417_vm7, %v1378_v52  ;;  %1447 = vst.msk [vmem:[#allocation2 + $0xe8] sm:$0xff] %vm1417_vm7, %v1380_v53 }
 0x200   : > { %1761 = vrot.lane.b32.xlu0 %v4595_v49, %s4942_s16  ;;  %1570 = vrot.lane.b32.xlu1 %v5651_v60, %s4941_s15  ;;  %v4567_v60 = vld [vmem:[%s4988_s23 + $0x1a1] sm:$0xff] }
 0x202   : > { %v1382_v10 = vpop.permute.xlu0 %1381  ;;  %v1515_v11 = vpop.permute.xlu1 %1514 }
 0x203   : > { %1448 = vst.msk [vmem:[#allocation2 + $0xf0] sm:$0xff] %vm1417_vm7, %v1382_v10 }
 0x204   : > { %1611 = vst.msk [vmem:[#allocation2] sm:$0xff] %vm1610_vm8, %v1515_v11  ;;  %1572 = vrot.lane.b32.xlu0 %v5654_v63, %s4941_s15  ;;  %1763 = vrot.lane.b32.xlu1 %v5753_v4, %s4942_s16 }
 0x206   : > { %v1517_v56 = vpop.permute.xlu0 %1516  ;;  %v1708_v57 = vpop.permute.xlu1 %1707 }
 0x207   : > { %1612 = vst.msk [vmem:[#allocation2 + $0x8] sm:$0xff] %vm1610_vm8, %v1517_v56 }
 0x208   : > { %1804 = vst.msk [vmem:[#allocation2] sm:$0xff] %vm1803_vm9, %v1708_v57  ;;  %1765 = vrot.lane.b32.xlu0 %v5756_v5, %s4942_s16  ;;  %1383 = vrot.lane.b32.xlu1 %v4535_v13, %s4940_s29 }
 0x20a   : > { %v1710_v19 = vpop.permute.xlu0 %1709  ;;  %v1519_v63 = vpop.permute.xlu1 %1518 }
 0x20b   : > { %1805 = vst.msk [vmem:[#allocation2 + $0x8] sm:$0xff] %vm1803_vm9, %v1710_v19 }
 0x20c   : > { %1613 = vst.msk [vmem:[#allocation2 + $0x10] sm:$0xff] %vm1610_vm8, %v1519_v63  ;;  %1576 = vrot.lane.b32.xlu1 %v4567_v60, %s4941_s15  ;;  %1574 = vrot.lane.b32.xlu0 %v4566_v14, %s4941_s15 }
 0x20e   : > { %v1521_v4 = vpop.permute.xlu0 %1520  ;;  %v1712_v21 = vpop.permute.xlu1 %1711 }
 0x20f   : > { %v1836_v29 = vld [vmem:[#allocation2] sm:$0xff]  ;;  %1614 = vst.msk [vmem:[#allocation2 + $0x18] sm:$0xff] %vm1610_vm8, %v1521_v4 }
 0x210   : > { %1806 = vst.msk [vmem:[#allocation2 + $0x10] sm:$0xff] %vm1803_vm9, %v1712_v21  ;;  %4787 = vmatprep.mubr.msk.f32.mxu0 %vm1880_vm10, %v1836_v29 }
 0x212   : > { %v1714_v5 = vpop.permute.xlu0 %1713  ;;  %v1837_v15 = vld [vmem:[#allocation2 + $0x8] sm:$0xff]  ;;  %v1523_v17 = vpop.permute.xlu1 %1522 }
 0x213   : > { %1807 = vst.msk [vmem:[#allocation2 + $0x18] sm:$0xff] %vm1803_vm9, %v1714_v5  ;;  %4788 = vmatmul.mubr.msk.f32.vlgmr.msra.gmra.mrb[0].mxu0 %vm1880_vm10, %v1837_v15 }
 0x214   : > { %1615 = vst.msk [vmem:[#allocation2 + $0x20] sm:$0xff] %vm1610_vm8, %v1523_v17  ;;  %v4943_v17 = vmov 0.0  }
 0x215   : > { %2239 = vst.msk [vmem:[#allocation3 + $0x8] sm:$0xff] %vm257_vm0, %v4943_v17  ;;  %2238 = vst.msk [vmem:[#allocation3] sm:$0xff] %vm257_vm0, %v4943_v17 }
 0x216   : > { %v1525_v30 = vpop.permute.xlu0 %1524  ;;  %v1716_v42 = vpop.permute.xlu1 %1715  ;;  %2241 = vst.msk [vmem:[#allocation3 + $0x10] sm:$0x3] %vm2240_vm11, %v4943_v17  ;;  %2245 = vst.msk [vmem:[#allocation3 + $0x1a8] sm:$0x3] %vm2240_vm11, %v4943_v17 }
 0x217   : > { %v1838_v43 = vld [vmem:[#allocation2 + $0x10] sm:$0xff]  ;;  %1616 = vst.msk [vmem:[#allocation2 + $0x28] sm:$0xff] %vm1610_vm8, %v1525_v30  ;;  %v4599_v30 = vld [vmem:[%s4988_s23 + $0x1a2] sm:$0xff] }
 0x218   : > { %1808 = vst.msk [vmem:[#allocation2 + $0x20] sm:$0xff] %vm1803_vm9, %v1716_v42  ;;  %4790 = vmatprep.mubr.msk.f32.mxu0 %vm1880_vm10, %v1838_v43  ;;  %v4598_v42 = vld [vmem:[%s4988_s23 + $0x19a] sm:$0xff]  ;;  %1769 = vrot.lane.b32.xlu1 %v4599_v30, %s4942_s16 }
 0x219   : > { %2243 = vst.msk [vmem:[#allocation3 + $0x198] sm:$0xff] %vm257_vm0, %v4943_v17  ;;  %2244 = vst.msk [vmem:[#allocation3 + $0x1a0] sm:$0xff] %vm257_vm0, %v4943_v17  ;;  %1767 = vrot.lane.b32.xlu0 %v4598_v42, %s4942_s16 }
 0x21a   : > { %v1718_v46 = vpop.permute.xlu0 %1717  ;;  %v1839_v47 = vld [vmem:[#allocation2 + $0x18] sm:$0xff]  ;;  %v1527_v50 = vpop.permute.xlu1 %1526  ;;  %2248 = vst.msk [vmem:[#allocation3 + $0x18] sm:$0x1] %vm2247_vm12, %v4943_v17  ;;  %2249 = vst.msk [vmem:[#allocation3 + $0x30] sm:$0x1] %vm2247_vm12, %v4943_v17 }
 0x21b   : > { %1809 = vst.msk [vmem:[#allocation2 + $0x28] sm:$0xff] %vm1803_vm9, %v1718_v46  ;;  %4791 = vmatmul.mubr.msk.f32.gmra.mrb[2].mxu0 %vm1880_vm10, %v1839_v47 }
 0x21c   : > { %1617 = vst.msk [vmem:[#allocation2 + $0x30] sm:$0xff] %vm1610_vm8, %v1527_v50 }
 0x21d   : > { %2250 = vst.msk [vmem:[#allocation3 + $0x48] sm:$0x1] %vm2247_vm12, %v4943_v17  ;;  %2251 = vst.msk [vmem:[#allocation3 + $0x60] sm:$0x1] %vm2247_vm12, %v4943_v17 }
 0x21e   : > { %v1529_v51 = vpop.permute.xlu0 %1528  ;;  %v1720_v54 = vpop.permute.xlu1 %1719  ;;  %2252 = vst.msk [vmem:[#allocation3 + $0x78] sm:$0x1] %vm2247_vm12, %v4943_v17  ;;  %2253 = vst.msk [vmem:[#allocation3 + $0x90] sm:$0x1] %vm2247_vm12, %v4943_v17 }
 0x21f   : > { %v1840_v55 = vld [vmem:[#allocation2 + $0x20] sm:$0xff]  ;;  %1618 = vst.msk [vmem:[#allocation2 + $0x38] sm:$0xff] %vm1610_vm8, %v1529_v51 }
 0x220   : > { %1810 = vst.msk [vmem:[#allocation2 + $0x30] sm:$0xff] %vm1803_vm9, %v1720_v54  ;;  %4793 = vmatprep.mubr.msk.f32.mxu0 %vm1880_vm10, %v1840_v55  ;;  %v2377_v55 = vld [vmem:[#allocation3 + $0x9] sm:$0xff] }
 0x221   : > { %2254 = vst.msk [vmem:[#allocation3 + $0xa8] sm:$0x1] %vm2247_vm12, %v4943_v17  ;;  %2255 = vst.msk [vmem:[#allocation3 + $0xc0] sm:$0x1] %vm2247_vm12, %v4943_v17  ;;  %2442 = vrot.lane.b32.xlu1 %v2377_v55, %s4935_s24 }
 0x222   : > { %v1722_v12 = vpop.permute.xlu0 %1721  ;;  %v1841_v16 = vld [vmem:[#allocation2 + $0x28] sm:$0xff]  ;;  %v1531_v58 = vpop.permute.xlu1 %1530  ;;  %2256 = vst.msk [vmem:[#allocation3 + $0xd8] sm:$0x1] %vm2247_vm12, %v4943_v17  ;;  %2257 = vst.msk [vmem:[#allocation3 + $0xf0] sm:$0x1] %vm2247_vm12, %v4943_v17 }
 0x223   : > { %1811 = vst.msk [vmem:[#allocation2 + $0x38] sm:$0xff] %vm1803_vm9, %v1722_v12  ;;  %4794 = vmatmul.mubr.msk.f32.gmra.mrb[4].mxu0 %vm1880_vm10, %v1841_v16  ;;  %v2376_v12 = vld [vmem:[#allocation3 + $0x1] sm:$0xff] }
 0x224   : > { %1619 = vst.msk [vmem:[#allocation2 + $0x40] sm:$0xff] %vm1610_vm8, %v1531_v58  ;;  %2440 = vrot.lane.b32.xlu0 %v2376_v12, %s4935_s24 }
 0x225   : > { %2258 = vst.msk [vmem:[#allocation3 + $0x108] sm:$0x1] %vm2247_vm12, %v4943_v17  ;;  %2259 = vst.msk [vmem:[#allocation3 + $0x120] sm:$0x1] %vm2247_vm12, %v4943_v17 }
 0x226   : > { %v1533_v59 = vpop.permute.xlu0 %1532  ;;  %v1724_v1 = vpop.permute.xlu1 %1723  ;;  %2260 = vst.msk [vmem:[#allocation3 + $0x138] sm:$0x1] %vm2247_vm12, %v4943_v17  ;;  %2261 = vst.msk [vmem:[#allocation3 + $0x150] sm:$0x1] %vm2247_vm12, %v4943_v17 }
 0x227   : > { %v1842_v3 = vld [vmem:[#allocation2 + $0x30] sm:$0xff]  ;;  %1620 = vst.msk [vmem:[#allocation2 + $0x48] sm:$0xff] %vm1610_vm8, %v1533_v59 }
 0x228   : > { %1812 = vst.msk [vmem:[#allocation2 + $0x40] sm:$0xff] %vm1803_vm9, %v1724_v1  ;;  %4796 = vmatprep.mubr.msk.f32.mxu0 %vm1880_vm10, %v1842_v3 }
 0x229   : > { %2262 = vst.msk [vmem:[#allocation3 + $0x168] sm:$0x1] %vm2247_vm12, %v4943_v17  ;;  %2263 = vst.msk [vmem:[#allocation3 + $0x180] sm:$0x1] %vm2247_vm12, %v4943_v17 }
 0x22a   : > { %v1726_v2 = vpop.permute.xlu0 %1725  ;;  %v1843_v6 = vld [vmem:[#allocation2 + $0x38] sm:$0xff]  ;;  %v1535_v0 = vpop.permute.xlu1 %1534  ;;  %2264 = vst.msk [vmem:[#allocation3 + $0x29] sm:$0x1] %vm2247_vm12, %v4943_v17  ;;  %2265 = vst.msk [vmem:[#allocation3 + $0x41] sm:$0x1] %vm2247_vm12, %v4943_v17 }
 0x22b   : > { %1813 = vst.msk [vmem:[#allocation2 + $0x48] sm:$0xff] %vm1803_vm9, %v1726_v2  ;;  %4797 = vmatmul.mubr.msk.f32.gmra.mrb[6].mxu0 %vm1880_vm10, %v1843_v6 }
 0x22c   : > { %1621 = vst.msk [vmem:[#allocation2 + $0x50] sm:$0xff] %vm1610_vm8, %v1535_v0 }
 0x22d   : > { %2266 = vst.msk [vmem:[#allocation3 + $0x59] sm:$0x1] %vm2247_vm12, %v4943_v17  ;;  %2267 = vst.msk [vmem:[#allocation3 + $0x71] sm:$0x1] %vm2247_vm12, %v4943_v17 }
 0x22e   : > { %v1537_v61 = vpop.permute.xlu0 %1536  ;;  %v1728_v62 = vpop.permute.xlu1 %1727  ;;  %2268 = vst.msk [vmem:[#allocation3 + $0x89] sm:$0x1] %vm2247_vm12, %v4943_v17  ;;  %2269 = vst.msk [vmem:[#allocation3 + $0xa1] sm:$0x1] %vm2247_vm12, %v4943_v17 }
 0x22f   : > { %v1844_v7 = vld [vmem:[#allocation2 + $0x40] sm:$0xff]  ;;  %1622 = vst.msk [vmem:[#allocation2 + $0x58] sm:$0xff] %vm1610_vm8, %v1537_v61 }
 0x230   : > { %1814 = vst.msk [vmem:[#allocation2 + $0x50] sm:$0xff] %vm1803_vm9, %v1728_v62  ;;  %4799 = vmatprep.mubr.msk.f32.mxu0 %vm1880_vm10, %v1844_v7 }
 0x231   : > { %2270 = vst.msk [vmem:[#allocation3 + $0xb9] sm:$0x1] %vm2247_vm12, %v4943_v17  ;;  %2271 = vst.msk [vmem:[#allocation3 + $0xd1] sm:$0x1] %vm2247_vm12, %v4943_v17 }
 0x232   : > { %v1730_v8 = vpop.permute.xlu0 %1729  ;;  %v1845_v9 = vld [vmem:[#allocation2 + $0x48] sm:$0xff]  ;;  %v1539_v18 = vpop.permute.xlu1 %1538  ;;  %2272 = vst.msk [vmem:[#allocation3 + $0xe9] sm:$0x1] %vm2247_vm12, %v4943_v17  ;;  %2273 = vst.msk [vmem:[#allocation3 + $0x101] sm:$0x1] %vm2247_vm12, %v4943_v17 }
 0x233   : > { %1815 = vst.msk [vmem:[#allocation2 + $0x58] sm:$0xff] %vm1803_vm9, %v1730_v8  ;;  %4800 = vmatmul.mubr.msk.f32.gmra.mrb[8].mxu0 %vm1880_vm10, %v1845_v9 }
 0x234   : > { %1623 = vst.msk [vmem:[#allocation2 + $0x60] sm:$0xff] %vm1610_vm8, %v1539_v18 }
 0x235   : > { %2274 = vst.msk [vmem:[#allocation3 + $0x119] sm:$0x1] %vm2247_vm12, %v4943_v17  ;;  %2275 = vst.msk [vmem:[#allocation3 + $0x131] sm:$0x1] %vm2247_vm12, %v4943_v17 }
 0x236   : > { %v1541_v20 = vpop.permute.xlu0 %1540  ;;  %v1732_v22 = vpop.permute.xlu1 %1731  ;;  %2276 = vst.msk [vmem:[#allocation3 + $0x149] sm:$0x1] %vm2247_vm12, %v4943_v17  ;;  %2277 = vst.msk [vmem:[#allocation3 + $0x161] sm:$0x1] %vm2247_vm12, %v4943_v17 }
 0x237   : > { %v1846_v23 = vld [vmem:[#allocation2 + $0x50] sm:$0xff]  ;;  %1624 = vst.msk [vmem:[#allocation2 + $0x68] sm:$0xff] %vm1610_vm8, %v1541_v20 }
 0x238   : > { %1816 = vst.msk [vmem:[#allocation2 + $0x60] sm:$0xff] %vm1803_vm9, %v1732_v22  ;;  %4802 = vmatprep.mubr.msk.f32.mxu0 %vm1880_vm10, %v1846_v23  ;;  %v2313_v22 = vld [vmem:[#allocation3 + $0x8] sm:$0xff]  ;;  %v2312_v23 = vld [vmem:[#allocation3] sm:$0xff] }
 0x239   : > { %2278 = vst.msk [vmem:[#allocation3 + $0x179] sm:$0x1] %vm2247_vm12, %v4943_v17  ;;  %2279 = vst.msk [vmem:[#allocation3 + $0x191] sm:$0x1] %vm2247_vm12, %v4943_v17 }
 0x23a   : > { %v1734_v24 = vpop.permute.xlu0 %1733  ;;  %v1847_v25 = vld [vmem:[#allocation2 + $0x58] sm:$0xff]  ;;  %v1543_v26 = vpop.permute.xlu1 %1542  ;;  %2345 = vst.msk [vmem:[#allocation2 + $0x8] sm:$0xff] %vm257_vm0, %v2313_v22  ;;  %2344 = vst.msk [vmem:[#allocation2] sm:$0xff] %vm257_vm0, %v2312_v23 }
 0x23b   : > { %1817 = vst.msk [vmem:[#allocation2 + $0x68] sm:$0xff] %vm1803_vm9, %v1734_v24  ;;  %4803 = vmatmul.mubr.msk.f32.gmra.mrb[10].mxu0 %vm1880_vm10, %v1847_v25 }
 0x23c   : > { %1625 = vst.msk [vmem:[#allocation2 + $0x70] sm:$0xff] %vm1610_vm8, %v1543_v26  ;;  %v6202_v26 = vld [vmem:[%s7468_s2] ss:$0 sm:$0xff] }
 0x23e   : > { %v1545_v27 = vpop.permute.xlu0 %1544  ;;  %v1736_v28 = vpop.permute.xlu1 %1735 }
 0x23f   : > { %v1848_v31 = vld [vmem:[#allocation2 + $0x60] sm:$0xff]  ;;  %1626 = vst.msk [vmem:[#allocation2 + $0x78] sm:$0xff] %vm1610_vm8, %v1545_v27 }
 0x240   : > { %1818 = vst.msk [vmem:[#allocation2 + $0x70] sm:$0xff] %vm1803_vm9, %v1736_v28  ;;  %4805 = vmatprep.mubr.msk.f32.mxu0 %vm1880_vm10, %v1848_v31 }
 0x242   : > { %v1738_v32 = vpop.permute.xlu0 %1737  ;;  %v1849_v33 = vld [vmem:[#allocation2 + $0x68] sm:$0xff]  ;;  %v1547_v34 = vpop.permute.xlu1 %1546 }
 0x243   : > { %1819 = vst.msk [vmem:[#allocation2 + $0x78] sm:$0xff] %vm1803_vm9, %v1738_v32  ;;  %4806 = vmatmul.mubr.msk.f32.gmra.mrb[12].mxu0 %vm1880_vm10, %v1849_v33 }
 0x244   : > { %1627 = vst.msk [vmem:[#allocation2 + $0x80] sm:$0xff] %vm1610_vm8, %v1547_v34 }
 0x246   : > { %v1549_v35 = vpop.permute.xlu0 %1548  ;;  %v1740_v36 = vpop.permute.xlu1 %1739 }
 0x247   : > { %v1850_v37 = vld [vmem:[#allocation2 + $0x70] sm:$0xff]  ;;  %1628 = vst.msk [vmem:[#allocation2 + $0x88] sm:$0xff] %vm1610_vm8, %v1549_v35 }
 0x248   : > { %1820 = vst.msk [vmem:[#allocation2 + $0x80] sm:$0xff] %vm1803_vm9, %v1740_v36  ;;  %4808 = vmatprep.mubr.msk.f32.mxu0 %vm1880_vm10, %v1850_v37 }
 0x24a   : > { %v1742_v38 = vpop.permute.xlu0 %1741  ;;  %v1851_v39 = vld [vmem:[#allocation2 + $0x78] sm:$0xff]  ;;  %v1551_v40 = vpop.permute.xlu1 %1550 }
 0x24b   : > { %1821 = vst.msk [vmem:[#allocation2 + $0x88] sm:$0xff] %vm1803_vm9, %v1742_v38  ;;  %4809 = vmatmul.mubr.msk.f32.gmra.mrb[14].mxu0 %vm1880_vm10, %v1851_v39 }
 0x24c   : > { %1629 = vst.msk [vmem:[#allocation2 + $0x90] sm:$0xff] %vm1610_vm8, %v1551_v40 }
 0x24e   : > { %v1553_v41 = vpop.permute.xlu0 %1552  ;;  %v1744_v44 = vpop.permute.xlu1 %1743 }
 0x24f   : > { %v1852_v45 = vld [vmem:[#allocation2 + $0x80] sm:$0xff]  ;;  %1630 = vst.msk [vmem:[#allocation2 + $0x98] sm:$0xff] %vm1610_vm8, %v1553_v41 }
 0x250   : > { %1822 = vst.msk [vmem:[#allocation2 + $0x90] sm:$0xff] %vm1803_vm9, %v1744_v44  ;;  %4811 = vmatprep.mubr.msk.f32.mxu0 %vm1880_vm10, %v1852_v45 }
 0x252   : > { %v1746_v48 = vpop.permute.xlu0 %1745  ;;  %v1853_v49 = vld [vmem:[#allocation2 + $0x88] sm:$0xff]  ;;  %v1555_v52 = vpop.permute.xlu1 %1554 }
 0x253   : > { %1823 = vst.msk [vmem:[#allocation2 + $0x98] sm:$0xff] %vm1803_vm9, %v1746_v48  ;;  %4812 = vmatmul.mubr.msk.f32.gmra.mrb[16].mxu0 %vm1880_vm10, %v1853_v49 }
 0x254   : > { %1631 = vst.msk [vmem:[#allocation2 + $0xa0] sm:$0xff] %vm1610_vm8, %v1555_v52 }
 0x256   : > { %v1557_v53 = vpop.permute.xlu0 %1556  ;;  %v1748_v10 = vpop.permute.xlu1 %1747 }
 0x257   : > { %v1854_v11 = vld [vmem:[#allocation2 + $0x90] sm:$0xff]  ;;  %1632 = vst.msk [vmem:[#allocation2 + $0xa8] sm:$0xff] %vm1610_vm8, %v1557_v53 }
 0x258   : > { %1824 = vst.msk [vmem:[#allocation2 + $0xa0] sm:$0xff] %vm1803_vm9, %v1748_v10  ;;  %4814 = vmatprep.mubr.msk.f32.mxu0 %vm1880_vm10, %v1854_v11 }
 0x25a   : > { %v1750_v13 = vpop.permute.xlu0 %1749  ;;  %v1855_v56 = vld [vmem:[#allocation2 + $0x98] sm:$0xff]  ;;  %v1559_v57 = vpop.permute.xlu1 %1558 }
 0x25b   : > { %1825 = vst.msk [vmem:[#allocation2 + $0xa8] sm:$0xff] %vm1803_vm9, %v1750_v13  ;;  %4815 = vmatmul.mubr.msk.f32.gmra.mrb[18].mxu0 %vm1880_vm10, %v1855_v56 }
 0x25c   : > { %1633 = vst.msk [vmem:[#allocation2 + $0xb0] sm:$0xff] %vm1610_vm8, %v1559_v57 }
 0x25e   : > { %v1561_v60 = vpop.permute.xlu0 %1560  ;;  %v1752_v14 = vpop.permute.xlu1 %1751 }
 0x25f   : > { %v1856_v19 = vld [vmem:[#allocation2 + $0xa0] sm:$0xff]  ;;  %1634 = vst.msk [vmem:[#allocation2 + $0xb8] sm:$0xff] %vm1610_vm8, %v1561_v60 }
 0x260   : > { %1826 = vst.msk [vmem:[#allocation2 + $0xb0] sm:$0xff] %vm1803_vm9, %v1752_v14  ;;  %4817 = vmatprep.mubr.msk.f32.mxu0 %vm1880_vm10, %v1856_v19 }
 0x262   : > { %v1754_v63 = vpop.permute.xlu0 %1753  ;;  %v1857_v4 = vld [vmem:[#allocation2 + $0xa8] sm:$0xff]  ;;  %v1563_v21 = vpop.permute.xlu1 %1562 }
 0x263   : > { %1827 = vst.msk [vmem:[#allocation2 + $0xb8] sm:$0xff] %vm1803_vm9, %v1754_v63  ;;  %4818 = vmatmul.mubr.msk.f32.gmra.mrb[20].mxu0 %vm1880_vm10, %v1857_v4 }
 0x264   : > { %1635 = vst.msk [vmem:[#allocation2 + $0xc0] sm:$0xff] %vm1610_vm8, %v1563_v21 }
 0x266   : > { %v1565_v29 = vpop.permute.xlu0 %1564  ;;  %v1756_v5 = vpop.permute.xlu1 %1755 }
 0x267   : > { %v1858_v15 = vld [vmem:[#allocation2 + $0xb0] sm:$0xff]  ;;  %1636 = vst.msk [vmem:[#allocation2 + $0xc8] sm:$0xff] %vm1610_vm8, %v1565_v29 }
 0x268   : > { %1828 = vst.msk [vmem:[#allocation2 + $0xc0] sm:$0xff] %vm1803_vm9, %v1756_v5  ;;  %4820 = vmatprep.mubr.msk.f32.mxu0 %vm1880_vm10, %v1858_v15 }
 0x26a   : > { %v1758_v43 = vpop.permute.xlu0 %1757  ;;  %v1859_v46 = vld [vmem:[#allocation2 + $0xb8] sm:$0xff]  ;;  %v1567_v47 = vpop.permute.xlu1 %1566 }
 0x26b   : > { %1829 = vst.msk [vmem:[#allocation2 + $0xc8] sm:$0xff] %vm1803_vm9, %v1758_v43  ;;  %4821 = vmatmul.mubr.msk.f32.gmra.mrb[22].mxu0 %vm1880_vm10, %v1859_v46 }
 0x26c   : > { %1637 = vst.msk [vmem:[#allocation2 + $0xd0] sm:$0xff] %vm1610_vm8, %v1567_v47 }
 0x26e   : > { %v1569_v50 = vpop.permute.xlu0 %1568  ;;  %v1760_v51 = vpop.permute.xlu1 %1759 }
 0x26f   : > { %v1860_v54 = vld [vmem:[#allocation2 + $0xc0] sm:$0xff]  ;;  %1638 = vst.msk [vmem:[#allocation2 + $0xd8] sm:$0xff] %vm1610_vm8, %v1569_v50 }
 0x270   : > { %1830 = vst.msk [vmem:[#allocation2 + $0xd0] sm:$0xff] %vm1803_vm9, %v1760_v51  ;;  %4823 = vmatprep.mubr.msk.f32.mxu0 %vm1880_vm10, %v1860_v54 }
 0x272   : > { %v1762_v16 = vpop.permute.xlu0 %1761  ;;  %v1861_v58 = vld [vmem:[#allocation2 + $0xc8] sm:$0xff]  ;;  %v1571_v59 = vpop.permute.xlu1 %1570 }
 0x273   : > { %1831 = vst.msk [vmem:[#allocation2 + $0xd8] sm:$0xff] %vm1803_vm9, %v1762_v16  ;;  %4824 = vmatmul.mubr.msk.f32.gmra.mrb[24].mxu0 %vm1880_vm10, %v1861_v58 }
 0x274   : > { %1639 = vst.msk [vmem:[#allocation2 + $0xe0] sm:$0xff] %vm1610_vm8, %v1571_v59 }
 0x276   : > { %v1573_v1 = vpop.permute.xlu0 %1572  ;;  %v1764_v3 = vpop.permute.xlu1 %1763 }
 0x277   : > { %v1862_v2 = vld [vmem:[#allocation2 + $0xd0] sm:$0xff]  ;;  %1640 = vst.msk [vmem:[#allocation2 + $0xe8] sm:$0xff] %vm1610_vm8, %v1573_v1 }
 0x278   : > { %1832 = vst.msk [vmem:[#allocation2 + $0xe0] sm:$0xff] %vm1803_vm9, %v1764_v3  ;;  %4826 = vmatprep.mubr.msk.f32.mxu0 %vm1880_vm10, %v1862_v2 }
 0x27a   : > { %v1766_v6 = vpop.permute.xlu0 %1765  ;;  %v1863_v0 = vld [vmem:[#allocation2 + $0xd8] sm:$0xff]  ;;  %v1384_v7 = vpop.permute.xlu1 %1383 }
 0x27b   : > { %1833 = vst.msk [vmem:[#allocation2 + $0xe8] sm:$0xff] %vm1803_vm9, %v1766_v6  ;;  %4827 = vmatmul.mubr.msk.f32.gmra.mrb[26].mxu0 %vm1880_vm10, %v1863_v0 }
 0x27c   : > { %1449 = vst.msk [vmem:[#allocation2 + $0xf8] sm:$0xff] %vm1417_vm7, %v1384_v7 }
 0x27e   : > { %v1577_v8 = vpop.permute.xlu1 %1576  ;;  %v1575_v9 = vpop.permute.xlu0 %1574 }
 0x27f   : > { %v1864_v61 = vld [vmem:[#allocation2 + $0xe0] sm:$0xff]  ;;  %1642 = vst.msk [vmem:[#allocation2 + $0xf8] sm:$0xff] %vm1610_vm8, %v1577_v8  ;;  %1641 = vst.msk [vmem:[#allocation2 + $0xf0] sm:$0xff] %vm1610_vm8, %v1575_v9 }
 0x280   : > { %4829 = vmatprep.mubr.msk.f32.mxu0 %vm1880_vm10, %v1864_v61 }
 0x282   : > { %v1865_v62 = vld [vmem:[#allocation2 + $0xe8] sm:$0xff] }
 0x283   : > { %4830 = vmatmul.mubr.msk.f32.gmra.mrb[28].mxu0 %vm1880_vm10, %v1865_v62 }
 0x28a   : > { %v1770_v18 = vpop.permute.xlu1 %1769 }
 0x28b   : > { %v1768_v20 = vpop.permute.xlu0 %1767  ;;  %1835 = vst.msk [vmem:[#allocation2 + $0xf8] sm:$0xff] %vm1803_vm9, %v1770_v18 }
 0x28c   : > { %1834 = vst.msk [vmem:[#allocation2 + $0xf0] sm:$0xff] %vm1803_vm9, %v1768_v20 }
 0x292   : > { %v1867_v28 = vld [vmem:[#allocation2 + $0xf8] sm:$0xff] }
 0x293   : > { %v2443_v24 = vpop.permute.xlu1 %2442  ;;  %v1866_v27 = vld [vmem:[#allocation2 + $0xf0] sm:$0xff] }
 0x294   : > { %2537 = vst.msk [vmem:[#allocation2 + $0x8] sm:$0xff] %vm450_vm1, %v2443_v24  ;;  %4832 = vmatprep.mubr.msk.f32.mxu0 %vm1880_vm10, %v1866_v27 }
 0x295   : > { %4833 = vmatmul.mubr.msk.f32.gmra.mrb[30].mxu0 %vm1880_vm10, %v1867_v28 }
 0x296   : > { %v2441_v25 = vpop.permute.xlu0 %2440 }
 0x297   : > { %2536 = vst.msk [vmem:[#allocation2] sm:$0xff] %vm450_vm1, %v2441_v25 }
 0x2e6   : > { %v4789_v31 = vpop.f32.mrb[0].mxu0 }
 0x2e7   : > { %v6207_v32 = vadd.f32 %v4789_v31, %v6202_v26  ;;  %v2047_v33 = vpop.f32.mrb[1].mxu0 }
 0x2e8   : > { %v6210_v34 = vadd.f32 %v6202_v26, %v2047_v33 }
 0x2e9   : > { %v7527_v35 = vmax.f32 %v6207_v32, 0.0 }
 0x2ea   : > { %v7525_v36 = vmax.f32 %v6210_v34, 0.0 }
 0x2eb   : > { %2281 = vst.msk [vmem:[#allocation3 + $0x21] sm:$0xff] %vm257_vm0, %v7527_v35 }
 0x2ec   : > { %2280 = vst.msk [vmem:[#allocation3 + $0x19] sm:$0xff] %vm257_vm0, %v7525_v36 }
 0x2ee   : > { %v4792_v37 = vpop.f32.mrb[2].mxu0 }
 0x2ef   : > { %v6221_v38 = vadd.f32 %v4792_v37, %v6202_v26  ;;  %v2057_v39 = vpop.f32.mrb[3].mxu0 }
 0x2f0   : > { %v6224_v40 = vadd.f32 %v6202_v26, %v2057_v39 }
 0x2f1   : > { %v7522_v41 = vmax.f32 %v6221_v38, 0.0 }
 0x2f2   : > { %v7523_v44 = vmax.f32 %v6224_v40, 0.0  ;;  %v2379_v45 = vld [vmem:[#allocation3 + $0x21] sm:$0xff] }
 0x2f3   : > { %2283 = vst.msk [vmem:[#allocation3 + $0x39] sm:$0xff] %vm257_vm0, %v7522_v41  ;;  %2446 = vrot.lane.b32.xlu1 %v2379_v45, %s4935_s24  ;;  %v2378_v48 = vld [vmem:[#allocation3 + $0x19] sm:$0xff] }
 0x2f4   : > { %v6232_v49 = vld [vmem:[#allocation3 + $0x20] sm:$0xff]  ;;  %v6234_v52 = vld [vmem:[#allocation3 + $0x18] sm:$0xff]  ;;  %2282 = vst.msk [vmem:[#allocation3 + $0x31] sm:$0xff] %vm257_vm0, %v7523_v44  ;;  %2444 = vrot.lane.b32.xlu0 %v2378_v48, %s4935_s24 }
 0x2f5   : > { %2347 = vst.msk [vmem:[#allocation2 + $0x18] sm:$0xff] %vm257_vm0, %v6232_v49  ;;  %2346 = vst.msk [vmem:[#allocation2 + $0x10] sm:$0xff] %vm257_vm0, %v6234_v52 }
 0x2f6   : > { %v4795_v53 = vpop.f32.mrb[4].mxu0 }
 0x2f7   : > { %v6245_v10 = vadd.f32 %v4795_v53, %v6202_v26  ;;  %v2067_v11 = vpop.f32.mrb[5].mxu0 }
 0x2f8   : > { %v6248_v13 = vadd.f32 %v6202_v26, %v2067_v11 }
 0x2f9   : > { %v7519_v56 = vmax.f32 %v6245_v10, 0.0 }
 0x2fa   : > { %v7521_v57 = vmax.f32 %v6248_v13, 0.0  ;;  %v6252_v60 = vld [vmem:[#allocation3 + $0x39] sm:$0xff] }
 0x2fb   : > { %2285 = vst.msk [vmem:[#allocation3 + $0x51] sm:$0xff] %vm257_vm0, %v7519_v56  ;;  %2450 = vrot.lane.b32.xlu1 %v6252_v60, %s4935_s24  ;;  %v6259_v14 = vld [vmem:[#allocation3 + $0x31] sm:$0xff] }
 0x2fc   : > { %v6261_v19 = vld [vmem:[#allocation3 + $0x38] sm:$0xff]  ;;  %v6263_v63 = vld [vmem:[#allocation3 + $0x30] sm:$0xff]  ;;  %2284 = vst.msk [vmem:[#allocation3 + $0x49] sm:$0xff] %vm257_vm0, %v7521_v57  ;;  %2448 = vrot.lane.b32.xlu0 %v6259_v14, %s4935_s24 }
 0x2fd   : > { %2349 = vst.msk [vmem:[#allocation2 + $0x28] sm:$0xff] %vm257_vm0, %v6261_v19  ;;  %2348 = vst.msk [vmem:[#allocation2 + $0x20] sm:$0xff] %vm257_vm0, %v6263_v63 }
 0x2fe   : > { %v4798_v4 = vpop.f32.mrb[6].mxu0 }
 0x2ff   : > { %v6275_v21 = vadd.f32 %v4798_v4, %v6202_v26  ;;  %v2077_v29 = vpop.f32.mrb[7].mxu0 }
 0x300   : > { %v6278_v5 = vadd.f32 %v6202_v26, %v2077_v29 }
 0x301   : > { %v7516_v15 = vmax.f32 %v6275_v21, 0.0 }
 0x302   : > { %v7517_v17 = vmax.f32 %v6278_v5, 0.0  ;;  %v6282_v30 = vld [vmem:[#allocation3 + $0x51] sm:$0xff] }
 0x303   : > { %2287 = vst.msk [vmem:[#allocation3 + $0x69] sm:$0xff] %vm257_vm0, %v7516_v15  ;;  %2454 = vrot.lane.b32.xlu1 %v6282_v30, %s4935_s24  ;;  %v6289_v42 = vld [vmem:[#allocation3 + $0x49] sm:$0xff] }
 0x304   : > { %v6291_v43 = vld [vmem:[#allocation3 + $0x50] sm:$0xff]  ;;  %2286 = vst.msk [vmem:[#allocation3 + $0x61] sm:$0xff] %vm257_vm0, %v7517_v17  ;;  %2452 = vrot.lane.b32.xlu0 %v6289_v42, %s4935_s24  ;;  %v6300_v46 = vld [vmem:[#allocation3 + $0x48] sm:$0xff] }
 0x305   : > { %2351 = vst.msk [vmem:[#allocation2 + $0x38] sm:$0xff] %vm257_vm0, %v6291_v43  ;;  %2350 = vst.msk [vmem:[#allocation2 + $0x30] sm:$0xff] %vm257_vm0, %v6300_v46 }
 0x306   : > { %v4801_v47 = vpop.f32.mrb[8].mxu0 }
 0x307   : > { %v6305_v50 = vadd.f32 %v4801_v47, %v6202_v26  ;;  %v2087_v51 = vpop.f32.mrb[9].mxu0 }
 0x308   : > { %v6308_v54 = vadd.f32 %v6202_v26, %v2087_v51 }
 0x309   : > { %v7513_v55 = vmax.f32 %v6305_v50, 0.0 }
 0x30a   : > { %v7515_v12 = vmax.f32 %v6308_v54, 0.0  ;;  %v6312_v16 = vld [vmem:[#allocation3 + $0x69] sm:$0xff] }
 0x30b   : > { %2289 = vst.msk [vmem:[#allocation3 + $0x81] sm:$0xff] %vm257_vm0, %v7513_v55  ;;  %2458 = vrot.lane.b32.xlu1 %v6312_v16, %s4935_s24  ;;  %v6319_v58 = vld [vmem:[#allocation3 + $0x61] sm:$0xff] }
 0x30c   : > { %v6321_v59 = vld [vmem:[#allocation3 + $0x68] sm:$0xff]  ;;  %2288 = vst.msk [vmem:[#allocation3 + $0x79] sm:$0xff] %vm257_vm0, %v7515_v12  ;;  %2456 = vrot.lane.b32.xlu0 %v6319_v58, %s4935_s24  ;;  %v6330_v1 = vld [vmem:[#allocation3 + $0x60] sm:$0xff] }
 0x30d   : > { %2353 = vst.msk [vmem:[#allocation2 + $0x48] sm:$0xff] %vm257_vm0, %v6321_v59  ;;  %2352 = vst.msk [vmem:[#allocation2 + $0x40] sm:$0xff] %vm257_vm0, %v6330_v1 }
 0x30e   : > { %v4804_v3 = vpop.f32.mrb[10].mxu0 }
 0x30f   : > { %v6335_v2 = vadd.f32 %v4804_v3, %v6202_v26  ;;  %v2097_v6 = vpop.f32.mrb[11].mxu0 }
 0x310   : > { %v6338_v0 = vadd.f32 %v6202_v26, %v2097_v6 }
 0x311   : > { %v7510_v61 = vmax.f32 %v6335_v2, 0.0 }
 0x312   : > { %v7511_v62 = vmax.f32 %v6338_v0, 0.0  ;;  %v2387_v7 = vld [vmem:[#allocation3 + $0x81] sm:$0xff] }
 0x313   : > { %2291 = vst.msk [vmem:[#allocation3 + $0x99] sm:$0xff] %vm257_vm0, %v7510_v61  ;;  %2462 = vrot.lane.b32.xlu1 %v2387_v7, %s4935_s24  ;;  %v2386_v8 = vld [vmem:[#allocation3 + $0x79] sm:$0xff] }
 0x314   : > { %v6346_v9 = vld [vmem:[#allocation3 + $0x80] sm:$0xff]  ;;  %2290 = vst.msk [vmem:[#allocation3 + $0x91] sm:$0xff] %vm257_vm0, %v7511_v62  ;;  %2460 = vrot.lane.b32.xlu0 %v2386_v8, %s4935_s24  ;;  %v6354_v18 = vld [vmem:[#allocation3 + $0x78] sm:$0xff] }
 0x315   : > { %2355 = vst.msk [vmem:[#allocation2 + $0x58] sm:$0xff] %vm257_vm0, %v6346_v9  ;;  %2354 = vst.msk [vmem:[#allocation2 + $0x50] sm:$0xff] %vm257_vm0, %v6354_v18 }
 0x316   : > { %v4807_v20 = vpop.f32.mrb[12].mxu0 }
 0x317   : > { %v6359_v22 = vadd.f32 %v4807_v20, %v6202_v26  ;;  %v2107_v23 = vpop.f32.mrb[13].mxu0 }
 0x318   : > { %v6362_v24 = vadd.f32 %v6202_v26, %v2107_v23 }
 0x319   : > { %v7507_v25 = vmax.f32 %v6359_v22, 0.0 }
 0x31a   : > { %v7509_v27 = vmax.f32 %v6362_v24, 0.0  ;;  %v2389_v28 = vld [vmem:[#allocation3 + $0x99] sm:$0xff] }
 0x31b   : > { %2293 = vst.msk [vmem:[#allocation3 + $0xb1] sm:$0xff] %vm257_vm0, %v7507_v25  ;;  %2466 = vrot.lane.b32.xlu1 %v2389_v28, %s4935_s24  ;;  %v2388_v31 = vld [vmem:[#allocation3 + $0x91] sm:$0xff] }
 0x31c   : > { %v6370_v33 = vld [vmem:[#allocation3 + $0x98] sm:$0xff]  ;;  %2292 = vst.msk [vmem:[#allocation3 + $0xa9] sm:$0xff] %vm257_vm0, %v7509_v27  ;;  %2464 = vrot.lane.b32.xlu0 %v2388_v31, %s4935_s24  ;;  %v6378_v37 = vld [vmem:[#allocation3 + $0x90] sm:$0xff] }
 0x31d   : > { %2357 = vst.msk [vmem:[#allocation2 + $0x68] sm:$0xff] %vm257_vm0, %v6370_v33  ;;  %2356 = vst.msk [vmem:[#allocation2 + $0x60] sm:$0xff] %vm257_vm0, %v6378_v37 }
 0x31e   : > { %v4810_v39 = vpop.f32.mrb[14].mxu0 }
 0x31f   : > { %v6383_v45 = vadd.f32 %v4810_v39, %v6202_v26  ;;  %v2117_v48 = vpop.f32.mrb[15].mxu0 }
 0x320   : > { %v6386_v53 = vadd.f32 %v6202_v26, %v2117_v48 }
 0x321   : > { %v7504_v11 = vmax.f32 %v6383_v45, 0.0 }
 0x322   : > { %v7505_v4 = vmax.f32 %v6386_v53, 0.0  ;;  %v2391_v29 = vld [vmem:[#allocation3 + $0xb1] sm:$0xff] }
 0x323   : > { %2295 = vst.msk [vmem:[#allocation3 + $0xc9] sm:$0xff] %vm257_vm0, %v7504_v11  ;;  %2470 = vrot.lane.b32.xlu1 %v2391_v29, %s4935_s24  ;;  %v2390_v47 = vld [vmem:[#allocation3 + $0xa9] sm:$0xff] }
 0x324   : > { %v6394_v51 = vld [vmem:[#allocation3 + $0xb0] sm:$0xff]  ;;  %2294 = vst.msk [vmem:[#allocation3 + $0xc1] sm:$0xff] %vm257_vm0, %v7505_v4  ;;  %2468 = vrot.lane.b32.xlu0 %v2390_v47, %s4935_s24  ;;  %v6402_v3 = vld [vmem:[#allocation3 + $0xa8] sm:$0xff] }
 0x325   : > { %2359 = vst.msk [vmem:[#allocation2 + $0x78] sm:$0xff] %vm257_vm0, %v6394_v51  ;;  %2358 = vst.msk [vmem:[#allocation2 + $0x70] sm:$0xff] %vm257_vm0, %v6402_v3 }
 0x326   : > { %v4813_v6 = vpop.f32.mrb[16].mxu0 }
 0x327   : > { %v6407_v7 = vadd.f32 %v4813_v6, %v6202_v26  ;;  %v2127_v8 = vpop.f32.mrb[17].mxu0 }
 0x328   : > { %v6410_v20 = vadd.f32 %v6202_v26, %v2127_v8 }
 0x329   : > { %7628 = vst [vmem:[#allocation4_spill] sm:$0xff] %v6407_v7  ;;  %v7502_v23 = vmax.f32 %v6407_v7, 0.0 }
 0x32a   : > { %7629 = vst [vmem:[#allocation5_spill] sm:$0xff] %v6410_v20  ;;  %v7503_v28 = vmax.f32 %v6410_v20, 0.0  ;;  %v2393_v31 = vld [vmem:[#allocation3 + $0xc9] sm:$0xff] }
 0x32b   : > { %2297 = vst.msk [vmem:[#allocation3 + $0xe1] sm:$0xff] %vm257_vm0, %v7502_v23  ;;  %2474 = vrot.lane.b32.xlu1 %v2393_v31, %s4935_s24  ;;  %v2392_v39 = vld [vmem:[#allocation3 + $0xc1] sm:$0xff] }
 0x32c   : > { %v6418_v48 = vld [vmem:[#allocation3 + $0xc8] sm:$0xff]  ;;  %2296 = vst.msk [vmem:[#allocation3 + $0xd9] sm:$0xff] %vm257_vm0, %v7503_v28  ;;  %2472 = vrot.lane.b32.xlu0 %v2392_v39, %s4935_s24  ;;  %v6426_v29 = vld [vmem:[#allocation3 + $0xc0] sm:$0xff] }
 0x32d   : > { %2361 = vst.msk [vmem:[#allocation2 + $0x88] sm:$0xff] %vm257_vm0, %v6418_v48  ;;  %2360 = vst.msk [vmem:[#allocation2 + $0x80] sm:$0xff] %vm257_vm0, %v6426_v29 }
 0x32e   : > { %v4816_v47 = vpop.f32.mrb[18].mxu0 }
 0x32f   : > { %v6431_v6 = vadd.f32 %v4816_v47, %v6202_v26  ;;  %v2137_v8 = vpop.f32.mrb[19].mxu0 }
 0x330   : > { %v6434_v31 = vadd.f32 %v6202_v26, %v2137_v8 }
 0x331   : > { %7630 = vst [vmem:[#allocation6_spill] sm:$0xff] %v6431_v6  ;;  %v7506_v23 = vmax.f32 %v6431_v6, 0.0  ;;  %v6641_v6 = vld [vmem:[#allocation3 + $0xc2] sm:$0xff] }
 0x332   : > { %7631 = vst [vmem:[#allocation7_spill] sm:$0xff] %v6434_v31  ;;  %v7508_v39 = vmax.f32 %v6434_v31, 0.0  ;;  %v2395_v28 = vld [vmem:[#allocation3 + $0xe1] sm:$0xff] }
 0x333   : > { %2299 = vst.msk [vmem:[#allocation3 + $0xf9] sm:$0xff] %vm257_vm0, %v7506_v23  ;;  %2478 = vrot.lane.b32.xlu1 %v2395_v28, %s4935_s24  ;;  %v2394_v11 = vld [vmem:[#allocation3 + $0xd9] sm:$0xff]  ;;  %v6645_v31 = vld [vmem:[#allocation3 + $0xe2] sm:$0xff] }
 0x334   : > { %v6442_v4 = vld [vmem:[#allocation3 + $0xe0] sm:$0xff]  ;;  %2298 = vst.msk [vmem:[#allocation3 + $0xf1] sm:$0xff] %vm257_vm0, %v7508_v39  ;;  %2476 = vrot.lane.b32.xlu0 %v2394_v11, %s4935_s24  ;;  %v6450_v47 = vld [vmem:[#allocation3 + $0xd8] sm:$0xff]  ;;  %7650 = vst [vmem:[#allocation26_spill] sm:$0xff] %v6645_v31 }
 0x335   : > { %2363 = vst.msk [vmem:[#allocation2 + $0x98] sm:$0xff] %vm257_vm0, %v6442_v4  ;;  %2362 = vst.msk [vmem:[#allocation2 + $0x90] sm:$0xff] %vm257_vm0, %v6450_v47 }
 0x336   : > { %v4819_v8 = vpop.f32.mrb[20].mxu0 }
 0x337   : > { %v6455_v28 = vadd.f32 %v4819_v8, %v6202_v26  ;;  %v2147_v23 = vpop.f32.mrb[21].mxu0 }
 0x338   : > { %v6458_v25 = vadd.f32 %v6202_v26, %v2147_v23 }
 0x339   : > { %7632 = vst [vmem:[#allocation8_spill] sm:$0xff] %v6455_v28  ;;  %v7512_v39 = vmax.f32 %v6455_v28, 0.0  ;;  %v6623_v28 = vld [vmem:[#allocation3 + $0x92] sm:$0xff] }
 0x33a   : > { %7633 = vst [vmem:[#allocation9_spill] sm:$0xff] %v6458_v25  ;;  %v7514_v11 = vmax.f32 %v6458_v25, 0.0  ;;  %v2397_v27 = vld [vmem:[#allocation3 + $0xf9] sm:$0xff] }
 0x33b   : > { %2301 = vst.msk [vmem:[#allocation3 + $0x111] sm:$0xff] %vm257_vm0, %v7512_v39  ;;  %2482 = vrot.lane.b32.xlu1 %v2397_v27, %s4935_s24  ;;  %v2396_v61 = vld [vmem:[#allocation3 + $0xf1] sm:$0xff] }
 0x33c   : > { %v6466_v62 = vld [vmem:[#allocation3 + $0xf8] sm:$0xff]  ;;  %2300 = vst.msk [vmem:[#allocation3 + $0x109] sm:$0xff] %vm257_vm0, %v7514_v11  ;;  %2480 = vrot.lane.b32.xlu0 %v2396_v61, %s4935_s24  ;;  %v6474_v23 = vld [vmem:[#allocation3 + $0xf0] sm:$0xff] }
 0x33d   : > { %7634 = vst [vmem:[#allocation10_spill] sm:$0xff] %v6466_v62  ;;  %2365 = vst.msk [vmem:[#allocation2 + $0xa8] sm:$0xff] %vm257_vm0, %v6466_v62  ;;  %v6627_v25 = vld [vmem:[#allocation3 + $0xb2] sm:$0xff]  ;;  %v6649_v62 = vld [vmem:[#allocation3 + $0xda] sm:$0xff] }
 0x33e   : > { %7635 = vst [vmem:[#allocation11_spill] sm:$0xff] %v6474_v23  ;;  %2364 = vst.msk [vmem:[#allocation2 + $0xa0] sm:$0xff] %vm257_vm0, %v6474_v23  ;;  %v4822_v8 = vpop.f32.mrb[22].mxu0  ;;  %v6654_v23 = vld [vmem:[#allocation3 + $0xfa] sm:$0xff]  ;;  %v6659_v7 = vld [vmem:[#allocation3 + $0xf2] sm:$0xff] }
 0x33f   : > { %v6479_v27 = vadd.f32 %v4822_v8, %v6202_v26  ;;  %v2157_v39 = vpop.f32.mrb[23].mxu0  ;;  %7651 = vst [vmem:[#allocation27_spill] sm:$0xff] %v6649_v62  ;;  %7652 = vst [vmem:[#allocation28_spill] sm:$0xff] %v6654_v23 }
 0x340   : > { %v6482_v55 = vadd.f32 %v6202_v26, %v2157_v39  ;;  %7653 = vst [vmem:[#allocation29_spill] sm:$0xff] %v6659_v7 }
 0x341   : > { %7636 = vst [vmem:[#allocation12_spill] sm:$0xff] %v6479_v27  ;;  %v7518_v11 = vmax.f32 %v6479_v27, 0.0 }
 0x342   : > { %7637 = vst [vmem:[#allocation13_spill] sm:$0xff] %v6482_v55  ;;  %v7520_v61 = vmax.f32 %v6482_v55, 0.0  ;;  %v2399_v12 = vld [vmem:[#allocation3 + $0x111] sm:$0xff]  ;;  %v6609_v55 = vld [vmem:[#allocation3 + $0x82] sm:$0xff] }
 0x343   : > { %2303 = vst.msk [vmem:[#allocation3 + $0x129] sm:$0xff] %vm257_vm0, %v7518_v11  ;;  %2486 = vrot.lane.b32.xlu1 %v2399_v12, %s4935_s24  ;;  %v2398_v15 = vld [vmem:[#allocation3 + $0x109] sm:$0xff] }
 0x344   : > { %v6490_v17 = vld [vmem:[#allocation3 + $0x110] sm:$0xff]  ;;  %2302 = vst.msk [vmem:[#allocation3 + $0x121] sm:$0xff] %vm257_vm0, %v7520_v61  ;;  %2484 = vrot.lane.b32.xlu0 %v2398_v15, %s4935_s24  ;;  %v6498_v39 = vld [vmem:[#allocation3 + $0x108] sm:$0xff] }
 0x345   : > { %7638 = vst [vmem:[#allocation14_spill] sm:$0xff] %v6490_v17  ;;  %2367 = vst.msk [vmem:[#allocation2 + $0xb8] sm:$0xff] %vm257_vm0, %v6490_v17  ;;  %v6631_v17 = vld [vmem:[#allocation3 + $0xaa] sm:$0xff] }
 0x346   : > { %7639 = vst [vmem:[#allocation15_spill] sm:$0xff] %v6498_v39  ;;  %2366 = vst.msk [vmem:[#allocation2 + $0xb0] sm:$0xff] %vm257_vm0, %v6498_v39  ;;  %v4825_v8 = vpop.f32.mrb[24].mxu0  ;;  %v6636_v39 = vld [vmem:[#allocation3 + $0xca] sm:$0xff] }
 0x347   : > { %v6503_v12 = vadd.f32 %v4825_v8, %v6202_v26  ;;  %v2167_v11 = vpop.f32.mrb[25].mxu0  ;;  %7649 = vst [vmem:[#allocation25_spill] sm:$0xff] %v6636_v39 }
 0x348   : > { %v6506_v56 = vadd.f32 %v6202_v26, %v2167_v11 }
 0x349   : > { %7640 = vst [vmem:[#allocation16_spill] sm:$0xff] %v6503_v12  ;;  %v7524_v61 = vmax.f32 %v6503_v12, 0.0 }
 0x34a   : > { %7641 = vst [vmem:[#allocation17_spill] sm:$0xff] %v6506_v56  ;;  %v7526_v15 = vmax.f32 %v6506_v56, 0.0  ;;  %v2401_v57 = vld [vmem:[#allocation3 + $0x129] sm:$0xff] }
 0x34b   : > { %2305 = vst.msk [vmem:[#allocation3 + $0x141] sm:$0xff] %vm257_vm0, %v7524_v61  ;;  %2490 = vrot.lane.b32.xlu1 %v2401_v57, %s4935_s24  ;;  %v2400_v41 = vld [vmem:[#allocation3 + $0x121] sm:$0xff] }
 0x34c   : > { %v6514_v44 = vld [vmem:[#allocation3 + $0x128] sm:$0xff]  ;;  %2304 = vst.msk [vmem:[#allocation3 + $0x139] sm:$0xff] %vm257_vm0, %v7526_v15  ;;  %2488 = vrot.lane.b32.xlu0 %v2400_v41, %s4935_s24  ;;  %v6522_v11 = vld [vmem:[#allocation3 + $0x120] sm:$0xff] }
 0x34d   : > { %7642 = vst [vmem:[#allocation18_spill] sm:$0xff] %v6514_v44  ;;  %2369 = vst.msk [vmem:[#allocation2 + $0xc8] sm:$0xff] %vm257_vm0, %v6514_v44  ;;  %v6613_v44 = vld [vmem:[#allocation3 + $0x7a] sm:$0xff] }
 0x34e   : > { %7643 = vst [vmem:[#allocation19_spill] sm:$0xff] %v6522_v11  ;;  %2368 = vst.msk [vmem:[#allocation2 + $0xc0] sm:$0xff] %vm257_vm0, %v6522_v11  ;;  %v4828_v8 = vpop.f32.mrb[26].mxu0  ;;  %v6618_v11 = vld [vmem:[#allocation3 + $0x9a] sm:$0xff] }
 0x34f   : > { %v6527_v57 = vadd.f32 %v4828_v8, %v6202_v26  ;;  %v2177_v61 = vpop.f32.mrb[27].mxu0 }
 0x350   : > { %v6530_v36 = vadd.f32 %v6202_v26, %v2177_v61 }
 0x351   : > { %7644 = vst [vmem:[#allocation20_spill] sm:$0xff] %v6527_v57  ;;  %v7530_v15 = vmax.f32 %v6527_v57, 0.0 }
 0x352   : > { %7645 = vst [vmem:[#allocation21_spill] sm:$0xff] %v6530_v36  ;;  %v7533_v41 = vmax.f32 %v6530_v36, 0.0  ;;  %v2403_v35 = vld [vmem:[#allocation3 + $0x141] sm:$0xff] }
 0x353   : > { %2307 = vst.msk [vmem:[#allocation3 + $0x159] sm:$0xff] %vm257_vm0, %v7530_v15  ;;  %2494 = vrot.lane.b32.xlu1 %v2403_v35, %s4935_s24  ;;  %v2402_v12 = vld [vmem:[#allocation3 + $0x139] sm:$0xff] }
 0x354   : > { %v2339_v56 = vld [vmem:[#allocation3 + $0x140] sm:$0xff]  ;;  %2306 = vst.msk [vmem:[#allocation3 + $0x151] sm:$0xff] %vm257_vm0, %v7533_v41  ;;  %2492 = vrot.lane.b32.xlu0 %v2402_v12, %s4935_s24  ;;  %v6543_v61 = vld [vmem:[#allocation3 + $0x138] sm:$0xff] }
 0x355   : > { %2371 = vst.msk [vmem:[#allocation2 + $0xd8] sm:$0xff] %vm257_vm0, %v2339_v56  ;;  %7646 = vst [vmem:[#allocation22_spill] sm:$0xff] %v6543_v61 }
 0x356   : > { %2370 = vst.msk [vmem:[#allocation2 + $0xd0] sm:$0xff] %vm257_vm0, %v6543_v61  ;;  %v4831_v8 = vpop.f32.mrb[28].mxu0 }
 0x357   : > { %v6548_v15 = vadd.f32 %v4831_v8, %v6202_v26  ;;  %v2187_v35 = vpop.f32.mrb[29].mxu0 }
 0x358   : > { %v6551_v57 = vadd.f32 %v6202_v26, %v2187_v35 }
 0x359   : > { %7647 = vst [vmem:[#allocation23_spill] sm:$0xff] %v6548_v15  ;;  %v7536_v36 = vmax.f32 %v6548_v15, 0.0 }
 0x35a   : > { %7648 = vst [vmem:[#allocation24_spill] sm:$0xff] %v6551_v57  ;;  %v7539_v41 = vmax.f32 %v6551_v57, 0.0  ;;  %v2405_v12 = vld [vmem:[#allocation3 + $0x159] sm:$0xff] }
 0x35b   : > { %2309 = vst.msk [vmem:[#allocation3 + $0x171] sm:$0xff] %vm257_vm0, %v7536_v36  ;;  %2498 = vrot.lane.b32.xlu1 %v2405_v12, %s4935_s24  ;;  %v2404_v56 = vld [vmem:[#allocation3 + $0x151] sm:$0xff] }
 0x35c   : > { %v2341_v61 = vld [vmem:[#allocation3 + $0x158] sm:$0xff]  ;;  %2308 = vst.msk [vmem:[#allocation3 + $0x169] sm:$0xff] %vm257_vm0, %v7539_v41  ;;  %2496 = vrot.lane.b32.xlu0 %v2404_v56, %s4935_s24  ;;  %v2340_v8 = vld [vmem:[#allocation3 + $0x150] sm:$0xff]  ;;  %v2568_v41 = vld [vmem:[#allocation3 + $0x2] sm:$0xff] }
 0x35d   : > { %2373 = vst.msk [vmem:[#allocation2 + $0xe8] sm:$0xff] %vm257_vm0, %v2341_v61  ;;  %2372 = vst.msk [vmem:[#allocation2 + $0xe0] sm:$0xff] %vm257_vm0, %v2340_v8  ;;  %v2569_v12 = vld [vmem:[#allocation3 + $0xa] sm:$0xff]  ;;  %v6573_v56 = vld [vmem:[#allocation3 + $0x22] sm:$0xff] }
 0x35e   : > { %v6591_v8 = vld [vmem:[#allocation3 + $0x52] sm:$0xff] }
 0x362   : > { %v2407_v35 = vld [vmem:[#allocation3 + $0x171] sm:$0xff] }
 0x363   : > { %2502 = vrot.lane.b32.xlu1 %v2407_v35, %s4935_s24  ;;  %v2406_v15 = vld [vmem:[#allocation3 + $0x169] sm:$0xff] }
 0x364   : > { %v2343_v36 = vld [vmem:[#allocation3 + $0x170] sm:$0xff]  ;;  %2500 = vrot.lane.b32.xlu0 %v2406_v15, %s4935_s24  ;;  %v2342_v57 = vld [vmem:[#allocation3 + $0x168] sm:$0xff] }
 0x365   : > { %2375 = vst.msk [vmem:[#allocation2 + $0xf8] sm:$0xff] %vm257_vm0, %v2343_v36  ;;  %v2447_v27 = vpop.permute.xlu1 %2446  ;;  %2374 = vst.msk [vmem:[#allocation2 + $0xf0] sm:$0xff] %vm257_vm0, %v2342_v57  ;;  %v6577_v36 = vld [vmem:[#allocation3 + $0x1a] sm:$0xff]  ;;  %v6595_v35 = vld [vmem:[#allocation3 + $0x4a] sm:$0xff] }
 0x366   : > { %2539 = vst.msk [vmem:[#allocation2 + $0x18] sm:$0xff] %vm450_vm1, %v2447_v27  ;;  %v2445_v61 = vpop.permute.xlu0 %2444  ;;  %v6582_v57 = vld [vmem:[#allocation3 + $0x3a] sm:$0xff] }
 0x367   : > { %2538 = vst.msk [vmem:[#allocation2 + $0x10] sm:$0xff] %vm450_vm1, %v2445_v61  ;;  %2634 = vrot.lane.b32.xlu1 %v2569_v12, %s4936_s25 }
 0x368   : > { %2632 = vrot.lane.b32.xlu0 %v2568_v41, %s4936_s25  ;;  %v6587_v41 = vld [vmem:[#allocation3 + $0x32] sm:$0xff] }
 0x36b   : > { %2638 = vrot.lane.b32.xlu1 %v6573_v56, %s4936_s25 }
 0x36c   : > { %2636 = vrot.lane.b32.xlu0 %v6577_v36, %s4936_s25 }
 0x36d   : > { %v2451_v15 = vpop.permute.xlu1 %2450 }
 0x36e   : > { %2541 = vst.msk [vmem:[#allocation2 + $0x28] sm:$0xff] %vm450_vm1, %v2451_v15  ;;  %v2449_v27 = vpop.permute.xlu0 %2448  ;;  %v6600_v15 = vld [vmem:[#allocation3 + $0x6a] sm:$0xff] }
 0x36f   : > { %2540 = vst.msk [vmem:[#allocation2 + $0x20] sm:$0xff] %vm450_vm1, %v2449_v27  ;;  %2642 = vrot.lane.b32.xlu1 %v6582_v57, %s4936_s25  ;;  %v6605_v27 = vld [vmem:[#allocation3 + $0x62] sm:$0xff] }
 0x370   : > { %2640 = vrot.lane.b32.xlu0 %v6587_v41, %s4936_s25 }
 0x373   : > { %2646 = vrot.lane.b32.xlu1 %v6591_v8, %s4936_s25 }
 0x374   : > { %2644 = vrot.lane.b32.xlu0 %v6595_v35, %s4936_s25 }
 0x375   : > { %v2455_v12 = vpop.permute.xlu1 %2454 }
 0x376   : > { %2543 = vst.msk [vmem:[#allocation2 + $0x38] sm:$0xff] %vm450_vm1, %v2455_v12  ;;  %v2453_v61 = vpop.permute.xlu0 %2452 }
 0x377   : > { %2542 = vst.msk [vmem:[#allocation2 + $0x30] sm:$0xff] %vm450_vm1, %v2453_v61  ;;  %2650 = vrot.lane.b32.xlu1 %v6600_v15, %s4936_s25 }
 0x378   : > { %2648 = vrot.lane.b32.xlu0 %v6605_v27, %s4936_s25 }
 0x37b   : > { %2654 = vrot.lane.b32.xlu1 %v6609_v55, %s4936_s25 }
 0x37c   : > { %2652 = vrot.lane.b32.xlu0 %v6613_v44, %s4936_s25 }
 0x37d   : > { %v2459_v12 = vpop.permute.xlu1 %2458 }
 0x37e   : > { %2545 = vst.msk [vmem:[#allocation2 + $0x48] sm:$0xff] %vm450_vm1, %v2459_v12  ;;  %v2457_v61 = vpop.permute.xlu0 %2456 }
 0x37f   : > { %2544 = vst.msk [vmem:[#allocation2 + $0x40] sm:$0xff] %vm450_vm1, %v2457_v61  ;;  %2658 = vrot.lane.b32.xlu1 %v6618_v11, %s4936_s25 }
 0x380   : > { %2656 = vrot.lane.b32.xlu0 %v6623_v28, %s4936_s25 }
 0x383   : > { %2662 = vrot.lane.b32.xlu1 %v6627_v25, %s4936_s25 }
 0x384   : > { %2660 = vrot.lane.b32.xlu0 %v6631_v17, %s4936_s25 }
 0x385   : > { %v2463_v12 = vpop.permute.xlu1 %2462 }
 0x386   : > { %2547 = vst.msk [vmem:[#allocation2 + $0x58] sm:$0xff] %vm450_vm1, %v2463_v12  ;;  %v2461_v61 = vpop.permute.xlu0 %2460 }
 0x387   : > { %2546 = vst.msk [vmem:[#allocation2 + $0x50] sm:$0xff] %vm450_vm1, %v2461_v61  ;;  %2666 = vrot.lane.b32.xlu1 %v6636_v39, %s4936_s25  ;;  %v2593_v39 = vld [vmem:[#allocation3 + $0x12a] sm:$0xff] }
 0x388   : > { %2664 = vrot.lane.b32.xlu0 %v6641_v6, %s4936_s25 }
 0x38b   : > { %2670 = vrot.lane.b32.xlu1 %v6645_v31, %s4936_s25  ;;  %v2591_v31 = vld [vmem:[#allocation3 + $0x112] sm:$0xff] }
 0x38c   : > { %2668 = vrot.lane.b32.xlu0 %v6649_v62, %s4936_s25  ;;  %v2590_v62 = vld [vmem:[#allocation3 + $0x10a] sm:$0xff] }
 0x38d   : > { %v2467_v12 = vpop.permute.xlu1 %2466 }
 0x38e   : > { %2549 = vst.msk [vmem:[#allocation2 + $0x68] sm:$0xff] %vm450_vm1, %v2467_v12  ;;  %v2465_v61 = vpop.permute.xlu0 %2464 }
 0x38f   : > { %2548 = vst.msk [vmem:[#allocation2 + $0x60] sm:$0xff] %vm450_vm1, %v2465_v61  ;;  %2674 = vrot.lane.b32.xlu1 %v6654_v23, %s4936_s25  ;;  %v2592_v61 = vld [vmem:[#allocation3 + $0x122] sm:$0xff] }
 0x390   : > { %2672 = vrot.lane.b32.xlu0 %v6659_v7, %s4936_s25  ;;  %v2595_v23 = vld [vmem:[#allocation3 + $0x142] sm:$0xff]  ;;  %v2594_v7 = vld [vmem:[#allocation3 + $0x13a] sm:$0xff] }
 0x393   : > { %2678 = vrot.lane.b32.xlu1 %v2591_v31, %s4936_s25 }
 0x394   : > { %2676 = vrot.lane.b32.xlu0 %v2590_v62, %s4936_s25 }
 0x395   : > { %v2471_v12 = vpop.permute.xlu1 %2470 }
 0x396   : > { %2551 = vst.msk [vmem:[#allocation2 + $0x78] sm:$0xff] %vm450_vm1, %v2471_v12  ;;  %v2469_v20 = vpop.permute.xlu0 %2468  ;;  %v2597_v12 = vld [vmem:[#allocation3 + $0x15a] sm:$0xff] }
 0x397   : > { %2550 = vst.msk [vmem:[#allocation2 + $0x70] sm:$0xff] %vm450_vm1, %v2469_v20  ;;  %2682 = vrot.lane.b32.xlu1 %v2593_v39, %s4936_s25  ;;  %v2596_v20 = vld [vmem:[#allocation3 + $0x152] sm:$0xff] }
 0x398   : > { %2680 = vrot.lane.b32.xlu0 %v2592_v61, %s4936_s25  ;;  %v2599_v39 = vld [vmem:[#allocation3 + $0x172] sm:$0xff]  ;;  %v2598_v61 = vld [vmem:[#allocation3 + $0x16a] sm:$0xff] }
 0x39b   : > { %2686 = vrot.lane.b32.xlu1 %v2595_v23, %s4936_s25 }
 0x39c   : > { %2684 = vrot.lane.b32.xlu0 %v2594_v7, %s4936_s25 }
 0x39d   : > { %v2475_v31 = vpop.permute.xlu1 %2474 }
 0x39e   : > { %2553 = vst.msk [vmem:[#allocation2 + $0x88] sm:$0xff] %vm450_vm1, %v2475_v31  ;;  %v2473_v62 = vpop.permute.xlu0 %2472 }
 0x39f   : > { %2552 = vst.msk [vmem:[#allocation2 + $0x80] sm:$0xff] %vm450_vm1, %v2473_v62  ;;  %2690 = vrot.lane.b32.xlu1 %v2597_v12, %s4936_s25 }
 0x3a0   : > { %2688 = vrot.lane.b32.xlu0 %v2596_v20, %s4936_s25 }
 0x3a3   : > { %2694 = vrot.lane.b32.xlu1 %v2599_v39, %s4936_s25 }
 0x3a4   : > { %2692 = vrot.lane.b32.xlu0 %v2598_v61, %s4936_s25 }
 0x3a5   : > { %v2479_v23 = vpop.permute.xlu1 %2478 }
 0x3a6   : > { %2555 = vst.msk [vmem:[#allocation2 + $0x98] sm:$0xff] %vm450_vm1, %v2479_v23  ;;  %v2477_v7 = vpop.permute.xlu0 %2476  ;;  %v7654_v23 = vmax.f32 %v6207_v32, 0.0  ;;  %v3913_v32 = vld [vmem:[%s7469_s3] sm:$0xff] }
 0x3a7   : > { %2554 = vst.msk [vmem:[#allocation2 + $0x90] sm:$0xff] %vm450_vm1, %v2477_v7  ;;  %2826 = vrot.lane.b32.xlu1 %v6232_v49, %s4937_s26  ;;  %v7655_v7 = vmax.f32 %v6210_v34, 0.0  ;;  %v3914_v34 = vld [vmem:[%s7469_s3 + $0x8] sm:$0xff] }
 0x3a8   : > { %2824 = vrot.lane.b32.xlu0 %v6234_v52, %s4937_s26 }
 0x3ab   : > { %2830 = vrot.lane.b32.xlu1 %v6261_v19, %s4937_s26 }
 0x3ac   : > { %2828 = vrot.lane.b32.xlu0 %v6263_v63, %s4937_s26 }
 0x3ad   : > { %v2483_v31 = vpop.permute.xlu1 %2482 }
 0x3ae   : > { %2557 = vst.msk [vmem:[#allocation2 + $0xa8] sm:$0xff] %vm450_vm1, %v2483_v31  ;;  %v2481_v62 = vpop.permute.xlu0 %2480 }
 0x3af   : > { %2556 = vst.msk [vmem:[#allocation2 + $0xa0] sm:$0xff] %vm450_vm1, %v2481_v62  ;;  %2834 = vrot.lane.b32.xlu1 %v6291_v43, %s4937_s26 }
 0x3b0   : > { %2832 = vrot.lane.b32.xlu0 %v6300_v46, %s4937_s26 }
 0x3b3   : > { %2838 = vrot.lane.b32.xlu1 %v6321_v59, %s4937_s26 }
 0x3b4   : > { %2836 = vrot.lane.b32.xlu0 %v6330_v1, %s4937_s26 }
 0x3b5   : > { %v2487_v49 = vpop.permute.xlu1 %2486 }
 0x3b6   : > { %2559 = vst.msk [vmem:[#allocation2 + $0xb8] sm:$0xff] %vm450_vm1, %v2487_v49  ;;  %v2485_v52 = vpop.permute.xlu0 %2484  ;;  %v4901_v49 = vpack.c.bf16 %v3914_v34, %v3913_v32  ;;  %v4834_v34 = vpop.f32.mrb[30].mxu0 }
 0x3b7   : > { %2558 = vst.msk [vmem:[#allocation2 + $0xb0] sm:$0xff] %vm450_vm1, %v2485_v52  ;;  %2842 = vrot.lane.b32.xlu1 %v6346_v9, %s4937_s26 }
 0x3b8   : > { %2840 = vrot.lane.b32.xlu0 %v6354_v18, %s4937_s26  ;;  %4902 = vmatprep.subr.bf16.mxu1 %v4901_v49 }
 0x3b9   : > { %4904 = vmatpush3.bf16.msra.mxu1 %v4901_v49  ;;  %v2197_v49 = vpop.f32.mrb[31].mxu0 }
 0x3bb   : > { %2846 = vrot.lane.b32.xlu1 %v6370_v33, %s4937_s26 }
 0x3bc   : > { %2844 = vrot.lane.b32.xlu0 %v6378_v37, %s4937_s26 }
 0x3bd   : > { %v2491_v12 = vpop.permute.xlu1 %2490 }
 0x3be   : > { %2561 = vst.msk [vmem:[#allocation2 + $0xc8] sm:$0xff] %vm450_vm1, %v2491_v12  ;;  %v2489_v20 = vpop.permute.xlu0 %2488 }
 0x3bf   : > { %2560 = vst.msk [vmem:[#allocation2 + $0xc0] sm:$0xff] %vm450_vm1, %v2489_v20  ;;  %2850 = vrot.lane.b32.xlu1 %v6394_v51, %s4937_s26 }
 0x3c0   : > { %2848 = vrot.lane.b32.xlu0 %v6402_v3, %s4937_s26 }
 0x3c3   : > { %2854 = vrot.lane.b32.xlu1 %v6418_v48, %s4937_s26 }
 0x3c4   : > { %2852 = vrot.lane.b32.xlu0 %v6426_v29, %s4937_s26 }
 0x3c5   : > { %v2495_v39 = vpop.permute.xlu1 %2494 }
 0x3c6   : > { %2563 = vst.msk [vmem:[#allocation2 + $0xd8] sm:$0xff] %vm450_vm1, %v2495_v39  ;;  %v2493_v61 = vpop.permute.xlu0 %2492 }
 0x3c7   : > { %2562 = vst.msk [vmem:[#allocation2 + $0xd0] sm:$0xff] %vm450_vm1, %v2493_v61  ;;  %2858 = vrot.lane.b32.xlu1 %v6442_v4, %s4937_s26 }
 0x3c8   : > { %2856 = vrot.lane.b32.xlu0 %v6450_v47, %s4937_s26 }
 0x3cb   : > { %2986 = vrot.lane.b32.xlu1 %v7654_v23, %s4938_s27 }
 0x3cc   : > { %2984 = vrot.lane.b32.xlu0 %v7655_v7, %s4938_s27 }
 0x3cd   : > { %v2499_v31 = vpop.permute.xlu1 %2498 }
 0x3ce   : > { %2565 = vst.msk [vmem:[#allocation2 + $0xe8] sm:$0xff] %vm450_vm1, %v2499_v31  ;;  %v2497_v62 = vpop.permute.xlu0 %2496 }
 0x3cf   : > { %2564 = vst.msk [vmem:[#allocation2 + $0xe0] sm:$0xff] %vm450_vm1, %v2497_v62  ;;  %3178 = vrot.lane.b32.xlu1 %v6573_v56, %s4939_s28 }
 0x3d0   : > { %3176 = vrot.lane.b32.xlu0 %v6577_v36, %s4939_s28  ;;  %v3915_v36 = vld [vmem:[%s7469_s3 + $0x10] sm:$0xff] }
 0x3d3   : > { %3371 = vrot.lane.b32.xlu1 %v6261_v19, %s4940_s29  ;;  %v7656_v19 = vmax.f32 %v6224_v40, 0.0  ;;  %v3917_v40 = vld [vmem:[%s7469_s3 + $0x20] sm:$0xf] }
 0x3d4   : > { %3369 = vrot.lane.b32.xlu0 %v6263_v63, %s4940_s29  ;;  %v3916_v63 = vld [vmem:[%s7469_s3 + $0x18] sm:$0xff] }
 0x3d5   : > { %v2503_v52 = vpop.permute.xlu1 %2502  ;;  %v4905_v12 = vpack.c.bf16 %v3916_v63, %v3915_v36 }
 0x3d6   : > { %2567 = vst.msk [vmem:[#allocation2 + $0xf8] sm:$0xff] %vm450_vm1, %v2503_v52  ;;  %v2501_v56 = vpop.permute.xlu0 %2500  ;;  %v7659_v52 = vmax.f32 %v6245_v10, 0.0 }
 0x3d7   : > { %2566 = vst.msk [vmem:[#allocation2 + $0xf0] sm:$0xff] %vm450_vm1, %v2501_v56  ;;  %2988 = vrot.lane.b32.xlu1 %v7656_v19, %s4938_s27  ;;  %4906 = vmatprep.subr.bf16.mxu1 %v4905_v12 }
 0x3d8   : > { %3561 = vrot.lane.b32.xlu0 %v6259_v14, %s4941_s15  ;;  %4908 = vmatpush3.bf16.msra.mxu1 %v4905_v12  ;;  %v7660_v12 = vmax.f32 %v6278_v5, 0.0 }
 0x3d9   : > { %v2635_v20 = vpop.permute.xlu1 %2634  ;;  %4843 = vmatprep.subr.msk.mxu1 %vm1977_vm6, %v3917_v40 }
 0x3da   : > { %2729 = vst.msk [vmem:[#allocation2 + $0x8] sm:$0xff] %vm643_vm2, %v2635_v20  ;;  %v2633_v39 = vpop.permute.xlu0 %2632 }
 0x3db   : > { %2728 = vst.msk [vmem:[#allocation2] sm:$0xff] %vm643_vm2, %v2633_v39  ;;  %3753 = vrot.lane.b32.xlu1 %v6587_v41, %s4942_s16 }
 0x3dc   : > { %3563 = vrot.lane.b32.xlu0 %v6252_v60, %s4941_s15  ;;  %4844 = vmatpush3.msk.msra.mxu1 %vm1977_vm6, %v3917_v40  ;;  %v7657_v60 = vmax.f32 %v6221_v38, 0.0 }
 0x3dd   : > { %v2639_v14 = vpop.permute.xlu1 %2638 }
 0x3de   : > { %2731 = vst.msk [vmem:[#allocation2 + $0x18] sm:$0xff] %vm643_vm2, %v2639_v14  ;;  %v2637_v61 = vpop.permute.xlu0 %2636 }
 0x3df   : > { %2730 = vst.msk [vmem:[#allocation2 + $0x10] sm:$0xff] %vm643_vm2, %v2637_v61  ;;  %3180 = vrot.lane.b32.xlu1 %v6587_v41, %s4939_s28  ;;  %v3503_v61 = vld [vmem:[#allocation3 + $0x79] sm:$0xff] }
 0x3e0   : > { %2990 = vrot.lane.b32.xlu0 %v7657_v60, %s4938_s27 }
 0x3e1   : > { %v2643_v23 = vpop.permute.xlu1 %2642 }
 0x3e2   : > { %2733 = vst.msk [vmem:[#allocation2 + $0x28] sm:$0xff] %vm643_vm2, %v2643_v23  ;;  %v2641_v7 = vpop.permute.xlu0 %2640 }
 0x3e3   : > { %2732 = vst.msk [vmem:[#allocation2 + $0x20] sm:$0xff] %vm643_vm2, %v2641_v7  ;;  %3182 = vrot.lane.b32.xlu1 %v6582_v57, %s4939_s28  ;;  %v7663_v7 = vmax.f32 %v6305_v50, 0.0 }
 0x3e4   : > { %3755 = vrot.lane.b32.xlu0 %v6582_v57, %s4942_s16  ;;  %v7658_v57 = vmax.f32 %v6248_v13, 0.0 }
 0x3e5   : > { %v2647_v31 = vpop.permute.xlu1 %2646 }
 0x3e6   : > { %2735 = vst.msk [vmem:[#allocation2 + $0x38] sm:$0xff] %vm643_vm2, %v2647_v31  ;;  %v2645_v41 = vpop.permute.xlu0 %2644 }
 0x3e7   : > { %2734 = vst.msk [vmem:[#allocation2 + $0x30] sm:$0xff] %vm643_vm2, %v2645_v41  ;;  %3375 = vrot.lane.b32.xlu1 %v6291_v43, %s4940_s29 }
 0x3e8   : > { %3373 = vrot.lane.b32.xlu0 %v6300_v46, %s4940_s29 }
 0x3e9   : > { %v2651_v38 = vpop.permute.xlu1 %2650 }
 0x3ea   : > { %2737 = vst.msk [vmem:[#allocation2 + $0x48] sm:$0xff] %vm643_vm2, %v2651_v38  ;;  %v2649_v62 = vpop.permute.xlu0 %2648 }
 0x3eb   : > { %2736 = vst.msk [vmem:[#allocation2 + $0x40] sm:$0xff] %vm643_vm2, %v2649_v62  ;;  %2992 = vrot.lane.b32.xlu1 %v7658_v57, %s4938_s27  ;;  %v3505_v57 = vld [vmem:[#allocation3 + $0x91] sm:$0xff] }
 0x3ec   : > { %3565 = vrot.lane.b32.xlu0 %v6289_v42, %s4941_s15  ;;  %v6806_v42 = vadd.f32 %v4834_v34, %v6202_v26 }
 0x3ed   : > { %v2655_v32 = vpop.permute.xlu1 %2654 }
 0x3ee   : > { %2739 = vst.msk [vmem:[#allocation2 + $0x58] sm:$0xff] %vm643_vm2, %v2655_v32  ;;  %v2653_v43 = vpop.permute.xlu0 %2652  ;;  %v2237_v19 = vmax.f32 %v6806_v42, 0.0  ;;  %v3528_v42 = vld [vmem:[#allocation3 + $0x1a1] sm:$0xff] }
 0x3ef   : > { %2738 = vst.msk [vmem:[#allocation2 + $0x50] sm:$0xff] %vm643_vm2, %v2653_v43  ;;  %3757 = vrot.lane.b32.xlu1 %v6595_v35, %s4942_s16 }
 0x3f0   : > { %3567 = vrot.lane.b32.xlu0 %v6282_v30, %s4941_s15  ;;  %v6812_v30 = vadd.f32 %v6202_v26, %v2197_v49  ;;  %2311 = vst.msk [vmem:[#allocation3 + $0x189] sm:$0xff] %vm257_vm0, %v2237_v19 }
 0x3f1   : > { %v2659_v46 = vpop.permute.xlu1 %2658 }
 0x3f2   : > { %2741 = vst.msk [vmem:[#allocation2 + $0x68] sm:$0xff] %vm643_vm2, %v2659_v46  ;;  %v2657_v13 = vpop.permute.xlu0 %2656  ;;  %v2236_v63 = vmax.f32 %v6812_v30, 0.0  ;;  %v7665_v46 = vmax.f32 %v6335_v2, 0.0 }
 0x3f3   : > { %2740 = vst.msk [vmem:[#allocation2 + $0x60] sm:$0xff] %vm643_vm2, %v2657_v13  ;;  %3184 = vrot.lane.b32.xlu1 %v6595_v35, %s4939_s28 }
 0x3f4   : > { %2994 = vrot.lane.b32.xlu0 %v7659_v52, %s4938_s27  ;;  %2310 = vst.msk [vmem:[#allocation3 + $0x181] sm:$0xff] %vm257_vm0, %v2236_v63 }
 0x3f5   : > { %v2663_v56 = vpop.permute.xlu1 %2662 }
 0x3f6   : > { %2743 = vst.msk [vmem:[#allocation2 + $0x78] sm:$0xff] %vm643_vm2, %v2663_v56  ;;  %v2661_v36 = vpop.permute.xlu0 %2660  ;;  %v3507_v56 = vld [vmem:[#allocation3 + $0xa9] sm:$0xff] }
 0x3f7   : > { %2742 = vst.msk [vmem:[#allocation2 + $0x70] sm:$0xff] %vm643_vm2, %v2661_v36  ;;  %3186 = vrot.lane.b32.xlu1 %v6591_v8, %s4939_s28 }
 0x3f8   : > { %3759 = vrot.lane.b32.xlu0 %v6591_v8, %s4942_s16 }
 0x3f9   : > { %v2667_v26 = vpop.permute.xlu1 %2666 }
 0x3fa   : > { %2745 = vst.msk [vmem:[#allocation2 + $0x88] sm:$0xff] %vm643_vm2, %v2667_v26  ;;  %v2665_v10 = vpop.permute.xlu0 %2664 }
 0x3fb   : > { %2744 = vst.msk [vmem:[#allocation2 + $0x80] sm:$0xff] %vm643_vm2, %v2665_v10  ;;  %3379 = vrot.lane.b32.xlu1 %v6321_v59, %s4940_s29  ;;  %v7667_v10 = vmax.f32 %v6359_v22, 0.0 }
 0x3fc   : > { %3377 = vrot.lane.b32.xlu0 %v6330_v1, %s4940_s29 }
 0x3fd   : > { %v2671_v35 = vpop.permute.xlu1 %2670 }
 0x3fe   : > { %2747 = vst.msk [vmem:[#allocation2 + $0x98] sm:$0xff] %vm643_vm2, %v2671_v35  ;;  %v2669_v8 = vpop.permute.xlu0 %2668 }
 0x3ff   : > { %2746 = vst.msk [vmem:[#allocation2 + $0x90] sm:$0xff] %vm643_vm2, %v2669_v8  ;;  %2996 = vrot.lane.b32.xlu1 %v7660_v12, %s4938_s27 }
 0x400   : > { %3569 = vrot.lane.b32.xlu0 %v6319_v58, %s4941_s15  ;;  %v7661_v58 = vmax.f32 %v6275_v21, 0.0 }
 0x401   : > { %v2675_v20 = vpop.permute.xlu1 %2674 }
 0x402   : > { %2749 = vst.msk [vmem:[#allocation2 + $0xa8] sm:$0xff] %vm643_vm2, %v2675_v20  ;;  %v2673_v59 = vpop.permute.xlu0 %2672 }
 0x403   : > { %2748 = vst.msk [vmem:[#allocation2 + $0xa0] sm:$0xff] %vm643_vm2, %v2673_v59  ;;  %3761 = vrot.lane.b32.xlu1 %v6605_v27, %s4942_s16  ;;  %v3509_v59 = vld [vmem:[#allocation3 + $0xc1] sm:$0xff] }
 0x404   : > { %3571 = vrot.lane.b32.xlu0 %v6312_v16, %s4941_s15 }
 0x405   : > { %v2679_v1 = vpop.permute.xlu1 %2678 }
 0x406   : > { %2751 = vst.msk [vmem:[#allocation2 + $0xb8] sm:$0xff] %vm643_vm2, %v2679_v1  ;;  %v2677_v5 = vpop.permute.xlu0 %2676 }
 0x407   : > { %2750 = vst.msk [vmem:[#allocation2 + $0xb0] sm:$0xff] %vm643_vm2, %v2677_v5  ;;  %3188 = vrot.lane.b32.xlu1 %v6605_v27, %s4939_s28 }
 0x408   : > { %2998 = vrot.lane.b32.xlu0 %v7661_v58, %s4938_s27 }
 0x409   : > { %v2683_v39 = vpop.permute.xlu1 %2682 }
 0x40a   : > { %2753 = vst.msk [vmem:[#allocation2 + $0xc8] sm:$0xff] %vm643_vm2, %v2683_v39  ;;  %v2681_v40 = vpop.permute.xlu0 %2680  ;;  %v7669_v39 = vmax.f32 %v6383_v45, 0.0 }
 0x40b   : > { %2752 = vst.msk [vmem:[#allocation2 + $0xc0] sm:$0xff] %vm643_vm2, %v2681_v40  ;;  %3190 = vrot.lane.b32.xlu1 %v6600_v15, %s4939_s28 }
 0x40c   : > { %3763 = vrot.lane.b32.xlu0 %v6600_v15, %s4942_s16  ;;  %v7662_v15 = vmax.f32 %v6308_v54, 0.0 }
 0x40d   : > { %v2687_v16 = vpop.permute.xlu1 %2686 }
 0x40e   : > { %2755 = vst.msk [vmem:[#allocation2 + $0xd8] sm:$0xff] %vm643_vm2, %v2687_v16  ;;  %v2685_v27 = vpop.permute.xlu0 %2684 }
 0x40f   : > { %2754 = vst.msk [vmem:[#allocation2 + $0xd0] sm:$0xff] %vm643_vm2, %v2685_v27  ;;  %3383 = vrot.lane.b32.xlu1 %v6346_v9, %s4940_s29  ;;  %v7670_v27 = vld [vmem:[#allocation25_spill] sm:$0xff] }
 0x410   : > { %3381 = vrot.lane.b32.xlu0 %v6354_v18, %s4940_s29  ;;  %v3504_v18 = vld [vmem:[#allocation3 + $0x81] sm:$0xff] }
 0x411   : > { %v2691_v21 = vpop.permute.xlu1 %2690 }
 0x412   : > { %2757 = vst.msk [vmem:[#allocation2 + $0xe8] sm:$0xff] %vm643_vm2, %v2691_v21  ;;  %v2689_v14 = vpop.permute.xlu0 %2688 }
 0x413   : > { %2756 = vst.msk [vmem:[#allocation2 + $0xe0] sm:$0xff] %vm643_vm2, %v2689_v14  ;;  %3000 = vrot.lane.b32.xlu1 %v7662_v15, %s4938_s27 }
 0x414   : > { %3573 = vrot.lane.b32.xlu0 %v3503_v61, %s4941_s15  ;;  %v7671_v61 = vld [vmem:[#allocation5_spill] sm:$0xff] }
 0x415   : > { %v2695_v60 = vpop.permute.xlu1 %2694 }
 0x416   : > { %2759 = vst.msk [vmem:[#allocation2 + $0xf8] sm:$0xff] %vm643_vm2, %v2695_v60  ;;  %v2693_v9 = vpop.permute.xlu0 %2692  ;;  %v7672_v60 = vmax.f32 %v7671_v61, 0.0  ;;  %v7689_v61 = vld [vmem:[#allocation8_spill] sm:$0xff] }
 0x417   : > { %2758 = vst.msk [vmem:[#allocation2 + $0xf0] sm:$0xff] %vm643_vm2, %v2693_v9  ;;  %3765 = vrot.lane.b32.xlu1 %v6613_v44, %s4942_s16  ;;  %v3511_v9 = vld [vmem:[#allocation3 + $0xd9] sm:$0xff] }
 0x418   : > { %3575 = vrot.lane.b32.xlu0 %v3504_v18, %s4941_s15 }
 0x419   : > { %v2827_v23 = vpop.permute.xlu1 %2826 }
 0x41a   : > { %2921 = vst.msk [vmem:[#allocation2 + $0x8] sm:$0xff] %vm837_vm3, %v2827_v23  ;;  %v2825_v54 = vpop.permute.xlu0 %2824  ;;  %v3512_v23 = vld [vmem:[#allocation3 + $0xe1] sm:$0xff] }
 0x41b   : > { %2920 = vst.msk [vmem:[#allocation2] sm:$0xff] %vm837_vm3, %v2825_v54  ;;  %3192 = vrot.lane.b32.xlu1 %v6613_v44, %s4939_s28 }
 0x41c   : > { %3002 = vrot.lane.b32.xlu0 %v7663_v7, %s4938_s27 }
 0x41d   : > { %v2831_v31 = vpop.permute.xlu1 %2830 }
 0x41e   : > { %2923 = vst.msk [vmem:[#allocation2 + $0x18] sm:$0xff] %vm837_vm3, %v2831_v31  ;;  %v2829_v41 = vpop.permute.xlu0 %2828 }
 0x41f   : > { %2922 = vst.msk [vmem:[#allocation2 + $0x10] sm:$0xff] %vm837_vm3, %v2829_v41  ;;  %3194 = vrot.lane.b32.xlu1 %v6609_v55, %s4939_s28  ;;  %v7674_v41 = vld [vmem:[#allocation4_spill] sm:$0xff] }
 0x420   : > { %3767 = vrot.lane.b32.xlu0 %v6609_v55, %s4942_s16  ;;  %v7664_v55 = vmax.f32 %v6338_v0, 0.0 }
 0x421   : > { %v2835_v38 = vpop.permute.xlu1 %2834 }
 0x422   : > { %2925 = vst.msk [vmem:[#allocation2 + $0x28] sm:$0xff] %vm837_vm3, %v2835_v38  ;;  %v2833_v44 = vpop.permute.xlu0 %2832  ;;  %v7675_v38 = vmax.f32 %v7674_v41, 0.0 }
 0x423   : > { %2924 = vst.msk [vmem:[#allocation2 + $0x20] sm:$0xff] %vm837_vm3, %v2833_v44  ;;  %3387 = vrot.lane.b32.xlu1 %v6370_v33, %s4940_s29 }
 0x424   : > { %3385 = vrot.lane.b32.xlu0 %v6378_v37, %s4940_s29  ;;  %v3506_v37 = vld [vmem:[#allocation3 + $0x99] sm:$0xff] }
 0x425   : > { %v2839_v50 = vpop.permute.xlu1 %2838 }
 0x426   : > { %2927 = vst.msk [vmem:[#allocation2 + $0x38] sm:$0xff] %vm837_vm3, %v2839_v50  ;;  %v2837_v62 = vpop.permute.xlu0 %2836 }
 0x427   : > { %2926 = vst.msk [vmem:[#allocation2 + $0x30] sm:$0xff] %vm837_vm3, %v2837_v62  ;;  %3004 = vrot.lane.b32.xlu1 %v7664_v55, %s4938_s27  ;;  %v7676_v62 = vld [vmem:[#allocation26_spill] sm:$0xff] }
 0x428   : > { %3577 = vrot.lane.b32.xlu0 %v3505_v57, %s4941_s15 }
 0x429   : > { %v2843_v32 = vpop.permute.xlu1 %2842 }
 0x42a   : > { %2929 = vst.msk [vmem:[#allocation2 + $0x48] sm:$0xff] %vm837_vm3, %v2843_v32  ;;  %v2841_v33 = vpop.permute.xlu0 %2840 }
 0x42b   : > { %2928 = vst.msk [vmem:[#allocation2 + $0x40] sm:$0xff] %vm837_vm3, %v2841_v33  ;;  %3769 = vrot.lane.b32.xlu1 %v6623_v28, %s4942_s16  ;;  %v7677_v33 = vld [vmem:[#allocation11_spill] sm:$0xff] }
 0x42c   : > { %3579 = vrot.lane.b32.xlu0 %v3506_v37, %s4941_s15 }
 0x42d   : > { %v2847_v43 = vpop.permute.xlu1 %2846 }
 0x42e   : > { %2931 = vst.msk [vmem:[#allocation2 + $0x58] sm:$0xff] %vm837_vm3, %v2847_v43  ;;  %v2845_v0 = vpop.permute.xlu0 %2844 }
 0x42f   : > { %2930 = vst.msk [vmem:[#allocation2 + $0x50] sm:$0xff] %vm837_vm3, %v2845_v0  ;;  %3196 = vrot.lane.b32.xlu1 %v6623_v28, %s4939_s28  ;;  %v3513_v0 = vld [vmem:[#allocation3 + $0xf1] sm:$0xff] }
 0x430   : > { %3006 = vrot.lane.b32.xlu0 %v7665_v46, %s4938_s27  ;;  %v7678_v46 = vld [vmem:[#allocation10_spill] sm:$0xff] }
 0x431   : > { %v2851_v13 = vpop.permute.xlu1 %2850 }
 0x432   : > { %2933 = vst.msk [vmem:[#allocation2 + $0x68] sm:$0xff] %vm837_vm3, %v2851_v13  ;;  %v2849_v34 = vpop.permute.xlu0 %2848 }
 0x433   : > { %2932 = vst.msk [vmem:[#allocation2 + $0x60] sm:$0xff] %vm837_vm3, %v2849_v34  ;;  %3198 = vrot.lane.b32.xlu1 %v6618_v11, %s4939_s28 }
 0x434   : > { %3771 = vrot.lane.b32.xlu0 %v6618_v11, %s4942_s16  ;;  %v7666_v11 = vmax.f32 %v6362_v24, 0.0 }
 0x435   : > { %v2855_v49 = vpop.permute.xlu1 %2854 }
 0x436   : > { %2935 = vst.msk [vmem:[#allocation2 + $0x78] sm:$0xff] %vm837_vm3, %v2855_v49  ;;  %v2853_v28 = vpop.permute.xlu0 %2852  ;;  %v7679_v49 = vld [vmem:[#allocation7_spill] sm:$0xff] }
 0x437   : > { %2934 = vst.msk [vmem:[#allocation2 + $0x70] sm:$0xff] %vm837_vm3, %v2853_v28  ;;  %3391 = vrot.lane.b32.xlu1 %v6394_v51, %s4940_s29  ;;  %v7680_v28 = vmax.f32 %v7679_v49, 0.0 }
 0x438   : > { %3389 = vrot.lane.b32.xlu0 %v6402_v3, %s4940_s29  ;;  %v3508_v3 = vld [vmem:[#allocation3 + $0xb1] sm:$0xff] }
 0x439   : > { %v2859_v2 = vpop.permute.xlu1 %2858 }
 0x43a   : > { %2937 = vst.msk [vmem:[#allocation2 + $0x88] sm:$0xff] %vm837_vm3, %v2859_v2  ;;  %v2857_v52 = vpop.permute.xlu0 %2856 }
 0x43b   : > { %2936 = vst.msk [vmem:[#allocation2 + $0x80] sm:$0xff] %vm837_vm3, %v2857_v52  ;;  %3008 = vrot.lane.b32.xlu1 %v7666_v11, %s4938_s27 }
 0x43c   : > { %3581 = vrot.lane.b32.xlu0 %v3507_v56, %s4941_s15  ;;  %v7681_v56 = vld [vmem:[#allocation29_spill] sm:$0xff] }
 0x43d   : > { %v2987_v36 = vpop.permute.xlu1 %2986 }
 0x43e   : > { %3081 = vst.msk [vmem:[#allocation2 + $0x8] sm:$0xff] %vm1030_vm4, %v2987_v36  ;;  %v2985_v51 = vpop.permute.xlu0 %2984  ;;  %v3514_v36 = vld [vmem:[#allocation3 + $0xf9] sm:$0xff] }
 0x43f   : > { %3080 = vst.msk [vmem:[#allocation2] sm:$0xff] %vm1030_vm4, %v2985_v51  ;;  %3773 = vrot.lane.b32.xlu1 %v6631_v17, %s4942_s16 }
 0x440   : > { %3583 = vrot.lane.b32.xlu0 %v3508_v3, %s4941_s15 }
 0x441   : > { %v3179_v26 = vpop.permute.xlu1 %3178 }
 0x442   : > { %3273 = vst.msk [vmem:[#allocation2 + $0x8] sm:$0xff] %vm1223_vm5, %v3179_v26  ;;  %v3177_v24 = vpop.permute.xlu0 %3176  ;;  %v7682_v26 = vld [vmem:[#allocation6_spill] sm:$0xff] }
 0x443   : > { %3272 = vst.msk [vmem:[#allocation2] sm:$0xff] %vm1223_vm5, %v3177_v24  ;;  %3200 = vrot.lane.b32.xlu1 %v6631_v17, %s4939_s28  ;;  %v7683_v24 = vmax.f32 %v7682_v26, 0.0 }
 0x444   : > { %3010 = vrot.lane.b32.xlu0 %v7667_v10, %s4938_s27 }
 0x445   : > { %v3372_v35 = vpop.permute.xlu1 %3371 }
 0x446   : > { %3466 = vst.msk [vmem:[#allocation2 + $0x8] sm:$0xff] %vm1417_vm7, %v3372_v35  ;;  %v3370_v8 = vpop.permute.xlu0 %3369 }
 0x447   : > { %3465 = vst.msk [vmem:[#allocation2] sm:$0xff] %vm1417_vm7, %v3370_v8  ;;  %3202 = vrot.lane.b32.xlu1 %v6627_v25, %s4939_s28 }
 0x448   : > { %3775 = vrot.lane.b32.xlu0 %v6627_v25, %s4942_s16  ;;  %v7668_v25 = vmax.f32 %v6386_v53, 0.0 }
 0x449   : > { %v2989_v12 = vpop.permute.xlu1 %2988 }
 0x44a   : > { %3082 = vst.msk [vmem:[#allocation2 + $0x10] sm:$0xff] %vm1030_vm4, %v2989_v12  ;;  %v3562_v17 = vpop.permute.xlu0 %3561  ;;  %v7684_v12 = vld [vmem:[#allocation28_spill] sm:$0xff] }
 0x44b   : > { %3657 = vst.msk [vmem:[#allocation2] sm:$0xff] %vm1610_vm8, %v3562_v17  ;;  %3395 = vrot.lane.b32.xlu1 %v6418_v48, %s4940_s29  ;;  %v3706_v17 = vld [vmem:[#allocation3 + $0xfa] sm:$0xff] }
 0x44c   : > { %3393 = vrot.lane.b32.xlu0 %v6426_v29, %s4940_s29  ;;  %v3510_v29 = vld [vmem:[#allocation3 + $0xc9] sm:$0xff] }
 0x44d   : > { %v3754_v22 = vpop.permute.xlu1 %3753 }
 0x44e   : > { %3849 = vst.msk [vmem:[#allocation2] sm:$0xff] %vm1803_vm9, %v3754_v22  ;;  %v3564_v20 = vpop.permute.xlu0 %3563 }
 0x44f   : > { %3658 = vst.msk [vmem:[#allocation2 + $0x8] sm:$0xff] %vm1610_vm8, %v3564_v20  ;;  %3012 = vrot.lane.b32.xlu1 %v7668_v25, %s4938_s27  ;;  %v7685_v25 = vld [vmem:[#allocation15_spill] sm:$0xff] }
 0x450   : > { %3585 = vrot.lane.b32.xlu0 %v3509_v59, %s4941_s15 }
 0x451   : > { %v3181_v1 = vpop.permute.xlu1 %3180 }
 0x452   : > { %3274 = vst.msk [vmem:[#allocation2 + $0x10] sm:$0xff] %vm1223_vm5, %v3181_v1  ;;  %v2991_v48 = vpop.permute.xlu0 %2990 }
 0x453   : > { %3083 = vst.msk [vmem:[#allocation2 + $0x18] sm:$0xff] %vm1030_vm4, %v2991_v48  ;;  %3777 = vrot.lane.b32.xlu1 %v6641_v6, %s4942_s16  ;;  %v3515_v48 = vld [vmem:[#allocation3 + $0x109] sm:$0xff] }
 0x454   : > { %3587 = vrot.lane.b32.xlu0 %v3510_v29, %s4941_s15  ;;  %v7686_v29 = vld [vmem:[#allocation14_spill] sm:$0xff] }
 0x455   : > { %v3183_v5 = vpop.permute.xlu1 %3182  ;;  %v3881_v58 = vld [vmem:[#allocation2] sm:$0xff] }
 0x456   : > { %3275 = vst.msk [vmem:[#allocation2 + $0x18] sm:$0xff] %vm1223_vm5, %v3183_v5  ;;  %4845 = vmatprep.mubr.msk.f32.mxu1 %vm1880_vm10, %v3881_v58  ;;  %v3756_v53 = vpop.permute.xlu0 %3755 }
 0x457   : > { %3850 = vst.msk [vmem:[#allocation2 + $0x8] sm:$0xff] %vm1803_vm9, %v3756_v53  ;;  %3204 = vrot.lane.b32.xlu1 %v6641_v6, %s4939_s28 }
 0x458   : > { %3014 = vrot.lane.b32.xlu0 %v7669_v39, %s4938_s27  ;;  %v7687_v39 = vld [vmem:[#allocation9_spill] sm:$0xff] }
 0x459   : > { %v3376_v40 = vpop.permute.xlu1 %3375 }
 0x45a   : > { %3468 = vst.msk [vmem:[#allocation2 + $0x18] sm:$0xff] %vm1417_vm7, %v3376_v40  ;;  %v3374_v16 = vpop.permute.xlu0 %3373  ;;  %v7688_v40 = vmax.f32 %v7687_v39, 0.0 }
 0x45b   : > { %3467 = vst.msk [vmem:[#allocation2 + $0x10] sm:$0xff] %vm1417_vm7, %v3374_v16  ;;  %3206 = vrot.lane.b32.xlu1 %v7670_v27, %s4939_s28 }
 0x45c   : > { %3779 = vrot.lane.b32.xlu0 %v7670_v27, %s4942_s16 }
 0x45d   : > { %v2993_v21 = vpop.permute.xlu1 %2992 }
 0x45e   : > { %3084 = vst.msk [vmem:[#allocation2 + $0x20] sm:$0xff] %vm1030_vm4, %v2993_v21  ;;  %v3566_v6 = vpop.permute.xlu0 %3565  ;;  %v3882_v14 = vld [vmem:[#allocation2 + $0x8] sm:$0xff] }
 0x45f   : > { %3659 = vst.msk [vmem:[#allocation2 + $0x10] sm:$0xff] %vm1610_vm8, %v3566_v6  ;;  %3399 = vrot.lane.b32.xlu1 %v6442_v4, %s4940_s29  ;;  %4846 = vmatmul.mubr.msk.f32.vlgmr.msra.gmra.mrb[0].mxu1 %vm1880_vm10, %v3882_v14  ;;  %v3707_v21 = vld [vmem:[#allocation3 + $0x10a] sm:$0xff] }
 0x460   : > { %3397 = vrot.lane.b32.xlu0 %v6450_v47, %s4940_s29  ;;  %v7673_v47 = vld [vmem:[#allocation27_spill] sm:$0xff]  ;;  %v3516_v6 = vld [vmem:[#allocation3 + $0x111] sm:$0xff] }
 0x461   : > { %v3758_v45 = vpop.permute.xlu1 %3757 }
 0x462   : > { %3851 = vst.msk [vmem:[#allocation2 + $0x10] sm:$0xff] %vm1803_vm9, %v3758_v45  ;;  %v3568_v15 = vpop.permute.xlu0 %3567 }
 0x463   : > { %3660 = vst.msk [vmem:[#allocation2 + $0x18] sm:$0xff] %vm1610_vm8, %v3568_v15  ;;  %3016 = vrot.lane.b32.xlu1 %v7672_v60, %s4938_s27  ;;  %v7690_v60 = vmax.f32 %v7689_v61, 0.0  ;;  %v3521_v61 = vld [vmem:[#allocation3 + $0x151] sm:$0xff] }
 0x464   : > { %3589 = vrot.lane.b32.xlu0 %v3511_v9, %s4941_s15 }
 0x465   : > { %v3185_v18 = vpop.permute.xlu1 %3184 }
 0x466   : > { %3276 = vst.msk [vmem:[#allocation2 + $0x20] sm:$0xff] %vm1223_vm5, %v3185_v18  ;;  %v2995_v4 = vpop.permute.xlu0 %2994 }
 0x467   : > { %3085 = vst.msk [vmem:[#allocation2 + $0x28] sm:$0xff] %vm1030_vm4, %v2995_v4  ;;  %3781 = vrot.lane.b32.xlu1 %v7673_v47, %s4942_s16  ;;  %v3133_v4 = vld [vmem:[#allocation3 + $0x112] sm:$0xff] }
 0x468   : > { %3591 = vrot.lane.b32.xlu0 %v3512_v23, %s4941_s15 }
 0x469   : > { %v3187_v54 = vpop.permute.xlu1 %3186  ;;  %v3883_v7 = vld [vmem:[#allocation2 + $0x10] sm:$0xff] }
 0x46a   : > { %3277 = vst.msk [vmem:[#allocation2 + $0x28] sm:$0xff] %vm1223_vm5, %v3187_v54  ;;  %v3760_v31 = vpop.permute.xlu0 %3759  ;;  %4848 = vmatprep.mubr.msk.f32.mxu1 %vm1880_vm10, %v3883_v7  ;;  %v7691_v54 = vld [vmem:[#allocation19_spill] sm:$0xff] }
 0x46b   : > { %3852 = vst.msk [vmem:[#allocation2 + $0x18] sm:$0xff] %vm1803_vm9, %v3760_v31  ;;  %3208 = vrot.lane.b32.xlu1 %v7673_v47, %s4939_s28 }
 0x46c   : > { %3018 = vrot.lane.b32.xlu0 %v7675_v38, %s4938_s27  ;;  %v3517_v38 = vld [vmem:[#allocation3 + $0x121] sm:$0xff] }
 0x46d   : > { %v3380_v44 = vpop.permute.xlu1 %3379 }
 0x46e   : > { %3470 = vst.msk [vmem:[#allocation2 + $0x28] sm:$0xff] %vm1417_vm7, %v3380_v44  ;;  %v3378_v50 = vpop.permute.xlu0 %3377  ;;  %v7692_v44 = vld [vmem:[#allocation18_spill] sm:$0xff] }
 0x46f   : > { %3469 = vst.msk [vmem:[#allocation2 + $0x20] sm:$0xff] %vm1417_vm7, %v3378_v50  ;;  %3210 = vrot.lane.b32.xlu1 %v7676_v62, %s4939_s28 }
 0x470   : > { %3783 = vrot.lane.b32.xlu0 %v7676_v62, %s4942_s16 }
 0x471   : > { %v2997_v55 = vpop.permute.xlu1 %2996 }
 0x472   : > { %3086 = vst.msk [vmem:[#allocation2 + $0x30] sm:$0xff] %vm1030_vm4, %v2997_v55  ;;  %v3570_v57 = vpop.permute.xlu0 %3569  ;;  %v3884_v32 = vld [vmem:[#allocation2 + $0x18] sm:$0xff] }
 0x473   : > { %3661 = vst.msk [vmem:[#allocation2 + $0x20] sm:$0xff] %vm1610_vm8, %v3570_v57  ;;  %2860 = vrot.lane.b32.xlu1 %v7677_v33, %s4937_s26  ;;  %4849 = vmatmul.mubr.msk.f32.gmra.mrb[2].mxu1 %vm1880_vm10, %v3884_v32  ;;  %v7693_v55 = vld [vmem:[#allocation13_spill] sm:$0xff] }
 0x474   : > { %3401 = vrot.lane.b32.xlu0 %v7677_v33, %s4940_s29  ;;  %v7694_v57 = vmax.f32 %v7693_v55, 0.0 }
 0x475   : > { %v3762_v37 = vpop.permute.xlu1 %3761 }
 0x476   : > { %3853 = vst.msk [vmem:[#allocation2 + $0x20] sm:$0xff] %vm1803_vm9, %v3762_v37  ;;  %v3572_v43 = vpop.permute.xlu0 %3571  ;;  %v3709_v37 = vld [vmem:[#allocation3 + $0x122] sm:$0xff] }
 0x477   : > { %3662 = vst.msk [vmem:[#allocation2 + $0x28] sm:$0xff] %vm1610_vm8, %v3572_v43  ;;  %3593 = vrot.lane.b32.xlu1 %v3513_v0, %s4941_s15  ;;  %v3518_v0 = vld [vmem:[#allocation3 + $0x129] sm:$0xff] }
 0x478   : > { %3403 = vrot.lane.b32.xlu0 %v7678_v46, %s4940_s29 }
 0x479   : > { %v3189_v13 = vpop.permute.xlu1 %3188 }
 0x47a   : > { %3278 = vst.msk [vmem:[#allocation2 + $0x30] sm:$0xff] %vm1223_vm5, %v3189_v13  ;;  %v2999_v34 = vpop.permute.xlu0 %2998 }
 0x47b   : > { %3087 = vst.msk [vmem:[#allocation2 + $0x38] sm:$0xff] %vm1030_vm4, %v2999_v34  ;;  %3020 = vrot.lane.b32.xlu1 %v7680_v28, %s4938_s27  ;;  %v7695_v34 = vld [vmem:[#allocation12_spill] sm:$0xff] }
 0x47c   : > { %2862 = vrot.lane.b32.xlu0 %v7678_v46, %s4937_s26  ;;  %v7696_v49 = vmax.f32 %v7695_v34, 0.0 }
 0x47d   : > { %v3191_v2 = vpop.permute.xlu1 %3190  ;;  %v3885_v52 = vld [vmem:[#allocation2 + $0x20] sm:$0xff] }
 0x47e   : > { %3279 = vst.msk [vmem:[#allocation2 + $0x38] sm:$0xff] %vm1223_vm5, %v3191_v2  ;;  %v3764_v11 = vpop.permute.xlu0 %3763  ;;  %4851 = vmatprep.mubr.msk.f32.mxu1 %vm1880_vm10, %v3885_v52  ;;  %v3135_v52 = vld [vmem:[#allocation3 + $0x12a] sm:$0xff] }
 0x47f   : > { %3854 = vst.msk [vmem:[#allocation2 + $0x28] sm:$0xff] %vm1803_vm9, %v3764_v11  ;;  %3785 = vrot.lane.b32.xlu1 %v7681_v56, %s4942_s16 }
 0x480   : > { %3595 = vrot.lane.b32.xlu0 %v3514_v36, %s4941_s15 }
 0x481   : > { %v3384_v51 = vpop.permute.xlu1 %3383 }
 0x482   : > { %3472 = vst.msk [vmem:[#allocation2 + $0x38] sm:$0xff] %vm1417_vm7, %v3384_v51  ;;  %v3382_v3 = vpop.permute.xlu0 %3381  ;;  %v7697_v51 = vld [vmem:[#allocation22_spill] sm:$0xff] }
 0x483   : > { %3471 = vst.msk [vmem:[#allocation2 + $0x30] sm:$0xff] %vm1417_vm7, %v3382_v3  ;;  %3212 = vrot.lane.b32.xlu1 %v7681_v56, %s4939_s28  ;;  %v3327_v3 = vld [vmem:[#allocation3 + $0x138] sm:$0xff] }
 0x484   : > { %3022 = vrot.lane.b32.xlu0 %v7683_v24, %s4938_s27 }
 0x485   : > { %v3001_v10 = vpop.permute.xlu1 %3000 }
 0x486   : > { %3088 = vst.msk [vmem:[#allocation2 + $0x40] sm:$0xff] %vm1030_vm4, %v3001_v10  ;;  %v3574_v35 = vpop.permute.xlu0 %3573  ;;  %v3886_v8 = vld [vmem:[#allocation2 + $0x28] sm:$0xff]  ;;  %v3519_v10 = vld [vmem:[#allocation3 + $0x139] sm:$0xff] }
 0x487   : > { %3663 = vst.msk [vmem:[#allocation2 + $0x30] sm:$0xff] %vm1610_vm8, %v3574_v35  ;;  %3214 = vrot.lane.b32.xlu1 %v7684_v12, %s4939_s28  ;;  %4852 = vmatmul.mubr.msk.f32.gmra.mrb[4].mxu1 %vm1880_vm10, %v3886_v8  ;;  %v3328_v35 = vld [vmem:[#allocation3 + $0x140] sm:$0xff] }
 0x488   : > { %3787 = vrot.lane.b32.xlu0 %v3706_v17, %s4942_s16 }
 0x489   : > { %v3766_v22 = vpop.permute.xlu1 %3765 }
 0x48a   : > { %3855 = vst.msk [vmem:[#allocation2 + $0x30] sm:$0xff] %vm1803_vm9, %v3766_v22  ;;  %v3576_v20 = vpop.permute.xlu0 %3575  ;;  %v7698_v22 = vld [vmem:[#allocation17_spill] sm:$0xff] }
 0x48b   : > { %3664 = vst.msk [vmem:[#allocation2 + $0x38] sm:$0xff] %vm1610_vm8, %v3576_v20  ;;  %2864 = vrot.lane.b32.xlu1 %v7685_v25, %s4937_s26  ;;  %v7699_v20 = vmax.f32 %v7698_v22, 0.0 }
 0x48c   : > { %3405 = vrot.lane.b32.xlu0 %v7685_v25, %s4940_s29 }
 0x48d   : > { %v3193_v59 = vpop.permute.xlu1 %3192 }
 0x48e   : > { %3280 = vst.msk [vmem:[#allocation2 + $0x40] sm:$0xff] %vm1223_vm5, %v3193_v59  ;;  %v3003_v1 = vpop.permute.xlu0 %3002 }
 0x48f   : > { %3089 = vst.msk [vmem:[#allocation2 + $0x48] sm:$0xff] %vm1030_vm4, %v3003_v1  ;;  %3597 = vrot.lane.b32.xlu1 %v3515_v48, %s4941_s15  ;;  %v3711_v1 = vld [vmem:[#allocation3 + $0x13a] sm:$0xff] }
 0x490   : > { %3407 = vrot.lane.b32.xlu0 %v7686_v29, %s4940_s29  ;;  %v3520_v48 = vld [vmem:[#allocation3 + $0x141] sm:$0xff] }
 0x491   : > { %v3195_v5 = vpop.permute.xlu1 %3194  ;;  %v3887_v58 = vld [vmem:[#allocation2 + $0x30] sm:$0xff] }
 0x492   : > { %3281 = vst.msk [vmem:[#allocation2 + $0x48] sm:$0xff] %vm1223_vm5, %v3195_v5  ;;  %v3768_v53 = vpop.permute.xlu0 %3767  ;;  %4854 = vmatprep.mubr.msk.f32.mxu1 %vm1880_vm10, %v3887_v58  ;;  %v7700_v58 = vld [vmem:[#allocation16_spill] sm:$0xff] }
 0x493   : > { %3856 = vst.msk [vmem:[#allocation2 + $0x38] sm:$0xff] %vm1803_vm9, %v3768_v53  ;;  %3024 = vrot.lane.b32.xlu1 %v7688_v40, %s4938_s27  ;;  %v7701_v53 = vmax.f32 %v7700_v58, 0.0  ;;  %v3525_v58 = vld [vmem:[#allocation3 + $0x181] sm:$0xff] }
 0x494   : > { %2866 = vrot.lane.b32.xlu0 %v7686_v29, %s4937_s26 }
 0x495   : > { %v3388_v16 = vpop.permute.xlu1 %3387 }
 0x496   : > { %3474 = vst.msk [vmem:[#allocation2 + $0x48] sm:$0xff] %vm1417_vm7, %v3388_v16  ;;  %v3386_v27 = vpop.permute.xlu0 %3385 }
 0x497   : > { %3473 = vst.msk [vmem:[#allocation2 + $0x40] sm:$0xff] %vm1417_vm7, %v3386_v27  ;;  %3789 = vrot.lane.b32.xlu1 %v3707_v21, %s4942_s16  ;;  %v3137_v27 = vld [vmem:[#allocation3 + $0x142] sm:$0xff] }
 0x498   : > { %3599 = vrot.lane.b32.xlu0 %v3516_v6, %s4941_s15 }
 0x499   : > { %v3005_v14 = vpop.permute.xlu1 %3004 }
 0x49a   : > { %3090 = vst.msk [vmem:[#allocation2 + $0x50] sm:$0xff] %vm1030_vm4, %v3005_v14  ;;  %v3578_v45 = vpop.permute.xlu0 %3577  ;;  %v3888_v15 = vld [vmem:[#allocation2 + $0x38] sm:$0xff]  ;;  %v2786_v14 = vld [vmem:[#allocation3 + $0x150] sm:$0xff] }
 0x49b   : > { %3665 = vst.msk [vmem:[#allocation2 + $0x40] sm:$0xff] %vm1610_vm8, %v3578_v45  ;;  %3216 = vrot.lane.b32.xlu1 %v3707_v21, %s4939_s28  ;;  %4855 = vmatmul.mubr.msk.f32.gmra.mrb[6].mxu1 %vm1880_vm10, %v3888_v15 }
 0x49c   : > { %3026 = vrot.lane.b32.xlu0 %v7690_v60, %s4938_s27 }
 0x49d   : > { %v3770_v9 = vpop.permute.xlu1 %3769 }
 0x49e   : > { %3857 = vst.msk [vmem:[#allocation2 + $0x40] sm:$0xff] %vm1803_vm9, %v3770_v9  ;;  %v3580_v18 = vpop.permute.xlu0 %3579  ;;  %v3330_v9 = vld [vmem:[#allocation3 + $0x158] sm:$0xff] }
 0x49f   : > { %3666 = vst.msk [vmem:[#allocation2 + $0x48] sm:$0xff] %vm1610_vm8, %v3580_v18  ;;  %3218 = vrot.lane.b32.xlu1 %v3133_v4, %s4939_s28 }
 0x4a0   : > { %3791 = vrot.lane.b32.xlu0 %v3133_v4, %s4942_s16 }
 0x4a1   : > { %v3197_v47 = vpop.permute.xlu1 %3196 }
 0x4a2   : > { %3282 = vst.msk [vmem:[#allocation2 + $0x50] sm:$0xff] %vm1223_vm5, %v3197_v47  ;;  %v3007_v23 = vpop.permute.xlu0 %3006  ;;  %v7702_v47 = vld [vmem:[#allocation21_spill] sm:$0xff] }
 0x4a3   : > { %3091 = vst.msk [vmem:[#allocation2 + $0x58] sm:$0xff] %vm1030_vm4, %v3007_v23  ;;  %2868 = vrot.lane.b32.xlu1 %v7691_v54, %s4937_s26  ;;  %v7703_v23 = vmax.f32 %v7702_v47, 0.0 }
 0x4a4   : > { %3409 = vrot.lane.b32.xlu0 %v7691_v54, %s4940_s29 }
 0x4a5   : > { %v3199_v7 = vpop.permute.xlu1 %3198  ;;  %v3889_v31 = vld [vmem:[#allocation2 + $0x40] sm:$0xff] }
 0x4a6   : > { %3283 = vst.msk [vmem:[#allocation2 + $0x58] sm:$0xff] %vm1223_vm5, %v3199_v7  ;;  %v3772_v41 = vpop.permute.xlu0 %3771  ;;  %4857 = vmatprep.mubr.msk.f32.mxu1 %vm1880_vm10, %v3889_v31  ;;  %v3713_v31 = vld [vmem:[#allocation3 + $0x152] sm:$0xff] }
 0x4a7   : > { %3858 = vst.msk [vmem:[#allocation2 + $0x48] sm:$0xff] %vm1803_vm9, %v3772_v41  ;;  %3601 = vrot.lane.b32.xlu1 %v3517_v38, %s4941_s15  ;;  %v3522_v41 = vld [vmem:[#allocation3 + $0x159] sm:$0xff] }
 0x4a8   : > { %3411 = vrot.lane.b32.xlu0 %v7692_v44, %s4940_s29 }
 0x4a9   : > { %v3392_v50 = vpop.permute.xlu1 %3391 }
 0x4aa   : > { %3476 = vst.msk [vmem:[#allocation2 + $0x58] sm:$0xff] %vm1417_vm7, %v3392_v50  ;;  %v3390_v62 = vpop.permute.xlu0 %3389 }
 0x4ab   : > { %3475 = vst.msk [vmem:[#allocation2 + $0x50] sm:$0xff] %vm1417_vm7, %v3390_v62  ;;  %3028 = vrot.lane.b32.xlu1 %v7694_v57, %s4938_s27  ;;  %v7704_v62 = vld [vmem:[#allocation20_spill] sm:$0xff] }
 0x4ac   : > { %2870 = vrot.lane.b32.xlu0 %v7692_v44, %s4937_s26  ;;  %v7705_v55 = vmax.f32 %v7704_v62, 0.0 }
 0x4ad   : > { %v3009_v32 = vpop.permute.xlu1 %3008 }
 0x4ae   : > { %3092 = vst.msk [vmem:[#allocation2 + $0x60] sm:$0xff] %vm1030_vm4, %v3009_v32  ;;  %v3582_v33 = vpop.permute.xlu0 %3581  ;;  %v3890_v43 = vld [vmem:[#allocation2 + $0x48] sm:$0xff] }
 0x4af   : > { %3667 = vst.msk [vmem:[#allocation2 + $0x50] sm:$0xff] %vm1610_vm8, %v3582_v33  ;;  %3793 = vrot.lane.b32.xlu1 %v3709_v37, %s4942_s16  ;;  %4858 = vmatmul.mubr.msk.f32.gmra.mrb[8].mxu1 %vm1880_vm10, %v3890_v43  ;;  %v3139_v33 = vld [vmem:[#allocation3 + $0x15a] sm:$0xff] }
 0x4b0   : > { %3603 = vrot.lane.b32.xlu0 %v3518_v0, %s4941_s15  ;;  %v2788_v0 = vld [vmem:[#allocation3 + $0x168] sm:$0xff] }
 0x4b1   : > { %v3774_v46 = vpop.permute.xlu1 %3773 }
 0x4b2   : > { %3859 = vst.msk [vmem:[#allocation2 + $0x50] sm:$0xff] %vm1803_vm9, %v3774_v46  ;;  %v3584_v13 = vpop.permute.xlu0 %3583 }
 0x4b3   : > { %3668 = vst.msk [vmem:[#allocation2 + $0x58] sm:$0xff] %vm1610_vm8, %v3584_v13  ;;  %3220 = vrot.lane.b32.xlu1 %v3709_v37, %s4939_s28 }
 0x4b4   : > { %3030 = vrot.lane.b32.xlu0 %v7696_v49, %s4938_s27  ;;  %v3523_v49 = vld [vmem:[#allocation3 + $0x169] sm:$0xff] }
 0x4b5   : > { %v3201_v28 = vpop.permute.xlu1 %3200 }
 0x4b6   : > { %3284 = vst.msk [vmem:[#allocation2 + $0x60] sm:$0xff] %vm1223_vm5, %v3201_v28  ;;  %v3011_v2 = vpop.permute.xlu0 %3010  ;;  %v3332_v28 = vld [vmem:[#allocation3 + $0x170] sm:$0xff] }
 0x4b7   : > { %3093 = vst.msk [vmem:[#allocation2 + $0x68] sm:$0xff] %vm1030_vm4, %v3011_v2  ;;  %3222 = vrot.lane.b32.xlu1 %v3135_v52, %s4939_s28 }
 0x4b8   : > { %3795 = vrot.lane.b32.xlu0 %v3135_v52, %s4942_s16 }
 0x4b9   : > { %v3203_v11 = vpop.permute.xlu1 %3202  ;;  %v3891_v56 = vld [vmem:[#allocation2 + $0x50] sm:$0xff] }
 0x4ba   : > { %3285 = vst.msk [vmem:[#allocation2 + $0x68] sm:$0xff] %vm1223_vm5, %v3203_v11  ;;  %v3776_v36 = vpop.permute.xlu0 %3775  ;;  %4860 = vmatprep.mubr.msk.f32.mxu1 %vm1880_vm10, %v3891_v56  ;;  %v7706_v11 = vld [vmem:[#allocation24_spill] sm:$0xff] }
 0x4bb   : > { %3860 = vst.msk [vmem:[#allocation2 + $0x58] sm:$0xff] %vm1803_vm9, %v3776_v36  ;;  %2872 = vrot.lane.b32.xlu1 %v7697_v51, %s4937_s26  ;;  %v7707_v56 = vmax.f32 %v7706_v11, 0.0 }
 0x4bc   : > { %3413 = vrot.lane.b32.xlu0 %v3327_v3, %s4940_s29  ;;  %v3715_v3 = vld [vmem:[#allocation3 + $0x16a] sm:$0xff] }
 0x4bd   : > { %v3396_v26 = vpop.permute.xlu1 %3395 }
 0x4be   : > { %3478 = vst.msk [vmem:[#allocation2 + $0x68] sm:$0xff] %vm1417_vm7, %v3396_v26  ;;  %v3394_v24 = vpop.permute.xlu0 %3393  ;;  %v3524_v26 = vld [vmem:[#allocation3 + $0x171] sm:$0xff] }
 0x4bf   : > { %3477 = vst.msk [vmem:[#allocation2 + $0x60] sm:$0xff] %vm1417_vm7, %v3394_v24  ;;  %3605 = vrot.lane.b32.xlu1 %v3519_v10, %s4941_s15 }
 0x4c0   : > { %3415 = vrot.lane.b32.xlu0 %v3328_v35, %s4940_s29 }
 0x4c1   : > { %v3013_v8 = vpop.permute.xlu1 %3012 }
 0x4c2   : > { %3094 = vst.msk [vmem:[#allocation2 + $0x70] sm:$0xff] %vm1030_vm4, %v3013_v8  ;;  %v3586_v12 = vpop.permute.xlu0 %3585  ;;  %v3892_v17 = vld [vmem:[#allocation2 + $0x58] sm:$0xff]  ;;  %v7708_v8 = vld [vmem:[#allocation23_spill] sm:$0xff] }
 0x4c3   : > { %3669 = vst.msk [vmem:[#allocation2 + $0x60] sm:$0xff] %vm1610_vm8, %v3586_v12  ;;  %3032 = vrot.lane.b32.xlu1 %v7699_v20, %s4938_s27  ;;  %4861 = vmatmul.mubr.msk.f32.gmra.mrb[10].mxu1 %vm1880_vm10, %v3892_v17  ;;  %v7709_v12 = vmax.f32 %v7708_v8, 0.0  ;;  %v3141_v20 = vld [vmem:[#allocation3 + $0x172] sm:$0xff] }
 0x4c4   : > { %2874 = vrot.lane.b32.xlu0 %v3328_v35, %s4937_s26 }
 0x4c5   : > { %v3778_v25 = vpop.permute.xlu1 %3777 }
 0x4c6   : > { %3861 = vst.msk [vmem:[#allocation2 + $0x60] sm:$0xff] %vm1803_vm9, %v3778_v25  ;;  %v3588_v59 = vpop.permute.xlu0 %3587 }
 0x4c7   : > { %3670 = vst.msk [vmem:[#allocation2 + $0x68] sm:$0xff] %vm1610_vm8, %v3588_v59  ;;  %3797 = vrot.lane.b32.xlu1 %v3711_v1, %s4942_s16 }
 0x4c8   : > { %3607 = vrot.lane.b32.xlu0 %v3520_v48, %s4941_s15 }
 0x4c9   : > { %v3205_v29 = vpop.permute.xlu1 %3204 }
 0x4ca   : > { %3286 = vst.msk [vmem:[#allocation2 + $0x70] sm:$0xff] %vm1223_vm5, %v3205_v29  ;;  %v3015_v5 = vpop.permute.xlu0 %3014 }
 0x4cb   : > { %3095 = vst.msk [vmem:[#allocation2 + $0x78] sm:$0xff] %vm1030_vm4, %v3015_v5  ;;  %3224 = vrot.lane.b32.xlu1 %v3711_v1, %s4939_s28  ;;  %v2790_v1 = vld [vmem:[#allocation3 + $0x180] sm:$0xff] }
 0x4cc   : > { %3034 = vrot.lane.b32.xlu0 %v7701_v53, %s4938_s27  ;;  %v3334_v53 = vld [vmem:[#allocation3 + $0x188] sm:$0xff] }
 0x4cd   : > { %v3207_v39 = vpop.permute.xlu1 %3206  ;;  %v3893_v40 = vld [vmem:[#allocation2 + $0x60] sm:$0xff] }
 0x4ce   : > { %3287 = vst.msk [vmem:[#allocation2 + $0x78] sm:$0xff] %vm1223_vm5, %v3207_v39  ;;  %v3780_v16 = vpop.permute.xlu0 %3779  ;;  %4863 = vmatprep.mubr.msk.f32.mxu1 %vm1880_vm10, %v3893_v40 }
 0x4cf   : > { %3862 = vst.msk [vmem:[#allocation2 + $0x68] sm:$0xff] %vm1803_vm9, %v3780_v16  ;;  %3226 = vrot.lane.b32.xlu1 %v3137_v27, %s4939_s28 }
 0x4d0   : > { %3799 = vrot.lane.b32.xlu0 %v3137_v27, %s4942_s16 }
 0x4d1   : > { %v3400_v21 = vpop.permute.xlu1 %3399 }
 0x4d2   : > { %3480 = vst.msk [vmem:[#allocation2 + $0x78] sm:$0xff] %vm1417_vm7, %v3400_v21  ;;  %v3398_v6 = vpop.permute.xlu0 %3397  ;;  %v3717_v21 = vld [vmem:[#allocation3 + $0x182] sm:$0xff] }
 0x4d3   : > { %3479 = vst.msk [vmem:[#allocation2 + $0x70] sm:$0xff] %vm1417_vm7, %v3398_v6  ;;  %2876 = vrot.lane.b32.xlu1 %v2786_v14, %s4937_s26  ;;  %v3526_v6 = vld [vmem:[#allocation3 + $0x189] sm:$0xff] }
 0x4d4   : > { %3417 = vrot.lane.b32.xlu0 %v2786_v14, %s4940_s29 }
 0x4d5   : > { %v3017_v45 = vpop.permute.xlu1 %3016 }
 0x4d6   : > { %3096 = vst.msk [vmem:[#allocation2 + $0x80] sm:$0xff] %vm1030_vm4, %v3017_v45  ;;  %v3590_v15 = vpop.permute.xlu0 %3589  ;;  %v3894_v60 = vld [vmem:[#allocation2 + $0x68] sm:$0xff] }
 0x4d7   : > { %3671 = vst.msk [vmem:[#allocation2 + $0x70] sm:$0xff] %vm1610_vm8, %v3590_v15  ;;  %3609 = vrot.lane.b32.xlu1 %v3521_v61, %s4941_s15  ;;  %4864 = vmatmul.mubr.msk.f32.gmra.mrb[12].mxu1 %vm1880_vm10, %v3894_v60  ;;  %v3143_v61 = vld [vmem:[#allocation3 + $0x18a] sm:$0xff]  ;;  %v3336_v60 = vld [vmem:[#allocation3 + $0x1a0] sm:$0xff] }
 0x4d8   : > { %3419 = vrot.lane.b32.xlu0 %v3330_v9, %s4940_s29 }
 0x4d9   : > { %v3782_v18 = vpop.permute.xlu1 %3781 }
 0x4da   : > { %3863 = vst.msk [vmem:[#allocation2 + $0x70] sm:$0xff] %vm1803_vm9, %v3782_v18  ;;  %v3592_v4 = vpop.permute.xlu0 %3591  ;;  %v3335_v18 = vld [vmem:[#allocation3 + $0x198] sm:$0xff] }
 0x4db   : > { %3672 = vst.msk [vmem:[#allocation2 + $0x78] sm:$0xff] %vm1610_vm8, %v3592_v4  ;;  %3036 = vrot.lane.b32.xlu1 %v7703_v23, %s4938_s27  ;;  %v3527_v23 = vld [vmem:[#allocation3 + $0x199] sm:$0xff] }
 0x4dc   : > { %2878 = vrot.lane.b32.xlu0 %v3330_v9, %s4937_s26 }
 0x4dd   : > { %v3209_v54 = vpop.permute.xlu1 %3208 }
 0x4de   : > { %3288 = vst.msk [vmem:[#allocation2 + $0x80] sm:$0xff] %vm1223_vm5, %v3209_v54  ;;  %v3019_v7 = vpop.permute.xlu0 %3018 }
 0x4df   : > { %3097 = vst.msk [vmem:[#allocation2 + $0x88] sm:$0xff] %vm1030_vm4, %v3019_v7  ;;  %3801 = vrot.lane.b32.xlu1 %v3713_v31, %s4942_s16  ;;  %v3720_v7 = vld [vmem:[#allocation3 + $0x1a2] sm:$0xff] }
 0x4e0   : > { %3611 = vrot.lane.b32.xlu0 %v3522_v41, %s4941_s15  ;;  %v3719_v41 = vld [vmem:[#allocation3 + $0x19a] sm:$0xff] }
 0x4e1   : > { %v3211_v38 = vpop.permute.xlu1 %3210  ;;  %v3895_v44 = vld [vmem:[#allocation2 + $0x70] sm:$0xff] }
 0x4e2   : > { %3289 = vst.msk [vmem:[#allocation2 + $0x88] sm:$0xff] %vm1223_vm5, %v3211_v38  ;;  %v3784_v50 = vpop.permute.xlu0 %3783  ;;  %4866 = vmatprep.mubr.msk.f32.mxu1 %vm1880_vm10, %v3895_v44 }
 0x4e3   : > { %3864 = vst.msk [vmem:[#allocation2 + $0x78] sm:$0xff] %vm1803_vm9, %v3784_v50  ;;  %3228 = vrot.lane.b32.xlu1 %v3713_v31, %s4939_s28 }
 0x4e4   : > { %3038 = vrot.lane.b32.xlu0 %v7705_v55, %s4938_s27 }
 0x4e5   : > { %v2861_v57 = vpop.permute.xlu1 %2860 }
 0x4e6   : > { %2938 = vst.msk [vmem:[#allocation2 + $0x90] sm:$0xff] %vm837_vm3, %v2861_v57  ;;  %v3402_v32 = vpop.permute.xlu0 %3401 }
 0x4e7   : > { %3481 = vst.msk [vmem:[#allocation2 + $0x80] sm:$0xff] %vm1417_vm7, %v3402_v32  ;;  %3230 = vrot.lane.b32.xlu1 %v3139_v33, %s4939_s28 }
 0x4e8   : > { %3803 = vrot.lane.b32.xlu0 %v3139_v33, %s4942_s16 }
 0x4e9   : > { %v3594_v37 = vpop.permute.xlu1 %3593 }
 0x4ea   : > { %3673 = vst.msk [vmem:[#allocation2 + $0x80] sm:$0xff] %vm1610_vm8, %v3594_v37  ;;  %v3404_v43 = vpop.permute.xlu0 %3403  ;;  %v3896_v46 = vld [vmem:[#allocation2 + $0x78] sm:$0xff]  ;;  %v7264_v37 = vld [vmem:[%s7470_s4] ss:$0 sm:$0xff] }
 0x4eb   : > { %3482 = vst.msk [vmem:[#allocation2 + $0x88] sm:$0xff] %vm1417_vm7, %v3404_v43  ;;  %2880 = vrot.lane.b32.xlu1 %v2788_v0, %s4937_s26  ;;  %4867 = vmatmul.mubr.msk.f32.gmra.mrb[14].mxu1 %vm1880_vm10, %v3896_v46  ;;  %v4669_v46 = vld [vmem:[%s4988_s23 + $0x21] sm:$0xff] }
 0x4ec   : > { %3421 = vrot.lane.b32.xlu0 %v2788_v0, %s4940_s29 }
 0x4ed   : > { %v3021_v13 = vpop.permute.xlu1 %3020 }
 0x4ee   : > { %3098 = vst.msk [vmem:[#allocation2 + $0x90] sm:$0xff] %vm1030_vm4, %v3021_v13  ;;  %v2863_v34 = vpop.permute.xlu0 %2862 }
 0x4ef   : > { %2939 = vst.msk [vmem:[#allocation2 + $0x98] sm:$0xff] %vm837_vm3, %v2863_v34  ;;  %3613 = vrot.lane.b32.xlu1 %v3523_v49, %s4941_s15 }
 0x4f0   : > { %3423 = vrot.lane.b32.xlu0 %v3332_v28, %s4940_s29 }
 0x4f1   : > { %v3786_v2 = vpop.permute.xlu1 %3785 }
 0x4f2   : > { %3865 = vst.msk [vmem:[#allocation2 + $0x80] sm:$0xff] %vm1803_vm9, %v3786_v2  ;;  %v3596_v52 = vpop.permute.xlu0 %3595  ;;  %v4668_v2 = vld [vmem:[%s4988_s23 + $0x19] sm:$0xff] }
 0x4f3   : > { %3674 = vst.msk [vmem:[#allocation2 + $0x88] sm:$0xff] %vm1610_vm8, %v3596_v52  ;;  %3040 = vrot.lane.b32.xlu1 %v7707_v56, %s4938_s27 }
 0x4f4   : > { %2882 = vrot.lane.b32.xlu0 %v3332_v28, %s4937_s26 }
 0x4f5   : > { %v3213_v36 = vpop.permute.xlu1 %3212 }
 0x4f6   : > { %3290 = vst.msk [vmem:[#allocation2 + $0x90] sm:$0xff] %vm1223_vm5, %v3213_v36  ;;  %v3023_v51 = vpop.permute.xlu0 %3022 }
 0x4f7   : > { %3099 = vst.msk [vmem:[#allocation2 + $0x98] sm:$0xff] %vm1030_vm4, %v3023_v51  ;;  %3805 = vrot.lane.b32.xlu1 %v3715_v3, %s4942_s16 }
 0x4f8   : > { %3615 = vrot.lane.b32.xlu0 %v3524_v26, %s4941_s15 }
 0x4f9   : > { %v3215_v24 = vpop.permute.xlu1 %3214  ;;  %v3897_v10 = vld [vmem:[#allocation2 + $0x80] sm:$0xff] }
 0x4fa   : > { %3291 = vst.msk [vmem:[#allocation2 + $0x98] sm:$0xff] %vm1223_vm5, %v3215_v24  ;;  %v3788_v35 = vpop.permute.xlu0 %3787  ;;  %4869 = vmatprep.mubr.msk.f32.mxu1 %vm1880_vm10, %v3897_v10 }
 0x4fb   : > { %3866 = vst.msk [vmem:[#allocation2 + $0x88] sm:$0xff] %vm1803_vm9, %v3788_v35  ;;  %3232 = vrot.lane.b32.xlu1 %v3715_v3, %s4939_s28 }
 0x4fc   : > { %3042 = vrot.lane.b32.xlu0 %v7709_v12, %s4938_s27 }
 0x4fd   : > { %v2865_v17 = vpop.permute.xlu1 %2864 }
 0x4fe   : > { %2940 = vst.msk [vmem:[#allocation2 + $0xa0] sm:$0xff] %vm837_vm3, %v2865_v17  ;;  %v3406_v22 = vpop.permute.xlu0 %3405 }
 0x4ff   : > { %3483 = vst.msk [vmem:[#allocation2 + $0x90] sm:$0xff] %vm1417_vm7, %v3406_v22  ;;  %3234 = vrot.lane.b32.xlu1 %v3141_v20, %s4939_s28 }
 0x500   : > { %3807 = vrot.lane.b32.xlu0 %v3141_v20, %s4942_s16 }
 0x501   : > { %v3598_v25 = vpop.permute.xlu1 %3597 }
 0x502   : > { %3675 = vst.msk [vmem:[#allocation2 + $0x90] sm:$0xff] %vm1610_vm8, %v3598_v25  ;;  %v3408_v59 = vpop.permute.xlu0 %3407  ;;  %v3898_v48 = vld [vmem:[#allocation2 + $0x88] sm:$0xff]  ;;  %v4671_v25 = vld [vmem:[%s4988_s23 + $0x39] sm:$0xff] }
 0x503   : > { %3484 = vst.msk [vmem:[#allocation2 + $0x98] sm:$0xff] %vm1417_vm7, %v3408_v59  ;;  %2884 = vrot.lane.b32.xlu1 %v2790_v1, %s4937_s26  ;;  %4870 = vmatmul.mubr.msk.f32.gmra.mrb[16].mxu1 %vm1880_vm10, %v3898_v48  ;;  %v4670_v48 = vld [vmem:[%s4988_s23 + $0x31] sm:$0xff] }
 0x504   : > { %3425 = vrot.lane.b32.xlu0 %v2790_v1, %s4940_s29 }
 0x505   : > { %v3025_v29 = vpop.permute.xlu1 %3024 }
 0x506   : > { %3100 = vst.msk [vmem:[#allocation2 + $0xa0] sm:$0xff] %vm1030_vm4, %v3025_v29  ;;  %v2867_v5 = vpop.permute.xlu0 %2866 }
 0x507   : > { %2941 = vst.msk [vmem:[#allocation2 + $0xa8] sm:$0xff] %vm837_vm3, %v2867_v5  ;;  %3617 = vrot.lane.b32.xlu1 %v3525_v58, %s4941_s15 }
 0x508   : > { %3427 = vrot.lane.b32.xlu0 %v3334_v53, %s4940_s29 }
 0x509   : > { %v3790_v39 = vpop.permute.xlu1 %3789 }
 0x50a   : > { %3867 = vst.msk [vmem:[#allocation2 + $0x90] sm:$0xff] %vm1803_vm9, %v3790_v39  ;;  %v3600_v40 = vpop.permute.xlu0 %3599 }
 0x50b   : > { %3676 = vst.msk [vmem:[#allocation2 + $0x98] sm:$0xff] %vm1610_vm8, %v3600_v40  ;;  %3044 = vrot.lane.b32.xlu1 %v2236_v63, %s4938_s27 }
 0x50c   : > { %2886 = vrot.lane.b32.xlu0 %v3334_v53, %s4937_s26 }
 0x50d   : > { %v3217_v16 = vpop.permute.xlu1 %3216 }
 0x50e   : > { %3292 = vst.msk [vmem:[#allocation2 + $0xa0] sm:$0xff] %vm1223_vm5, %v3217_v16  ;;  %v3027_v27 = vpop.permute.xlu0 %3026 }
 0x50f   : > { %3101 = vst.msk [vmem:[#allocation2 + $0xa8] sm:$0xff] %vm1030_vm4, %v3027_v27  ;;  %3809 = vrot.lane.b32.xlu1 %v3717_v21, %s4942_s16 }
 0x510   : > { %3619 = vrot.lane.b32.xlu0 %v3526_v6, %s4941_s15 }
 0x511   : > { %v3219_v14 = vpop.permute.xlu1 %3218  ;;  %v3899_v45 = vld [vmem:[#allocation2 + $0x90] sm:$0xff] }
 0x512   : > { %3293 = vst.msk [vmem:[#allocation2 + $0xa8] sm:$0xff] %vm1223_vm5, %v3219_v14  ;;  %v3792_v30 = vpop.permute.xlu0 %3791  ;;  %4872 = vmatprep.mubr.msk.f32.mxu1 %vm1880_vm10, %v3899_v45 }
 0x513   : > { %3868 = vst.msk [vmem:[#allocation2 + $0x98] sm:$0xff] %vm1803_vm9, %v3792_v30  ;;  %3236 = vrot.lane.b32.xlu1 %v3717_v21, %s4939_s28 }
 0x514   : > { %3046 = vrot.lane.b32.xlu0 %v2237_v19, %s4938_s27 }
 0x515   : > { %v2869_v63 = vpop.permute.xlu1 %2868 }
 0x516   : > { %2942 = vst.msk [vmem:[#allocation2 + $0xb0] sm:$0xff] %vm837_vm3, %v2869_v63  ;;  %v3410_v15 = vpop.permute.xlu0 %3409 }
 0x517   : > { %3485 = vst.msk [vmem:[#allocation2 + $0xa0] sm:$0xff] %vm1417_vm7, %v3410_v15  ;;  %3238 = vrot.lane.b32.xlu1 %v3143_v61, %s4939_s28  ;;  %s4702_s28 = sshll.u32 %s7711_s19, 8 }
 0x518   : > { %3811 = vrot.lane.b32.xlu0 %v3143_v61, %s4942_s16  ;;  %s7276_s12 = scalar_lea.vmem %s7471_s5, %s4702_s28 }
 0x519   : > { %v3602_v9 = vpop.permute.xlu1 %3601 }
 0x51a   : > { %3677 = vst.msk [vmem:[#allocation2 + $0xa0] sm:$0xff] %vm1610_vm8, %v3602_v9  ;;  %v3412_v4 = vpop.permute.xlu0 %3411  ;;  %v3900_v47 = vld [vmem:[#allocation2 + $0x98] sm:$0xff] }
 0x51b   : > { %3486 = vst.msk [vmem:[#allocation2 + $0xa8] sm:$0xff] %vm1417_vm7, %v3412_v4  ;;  %4873 = vmatmul.mubr.msk.f32.gmra.mrb[18].mxu1 %vm1880_vm10, %v3900_v47  ;;  %3431 = vrot.lane.b32.xlu1 %v3336_v60, %s4940_s29  ;;  %v4673_v60 = vld [vmem:[%s4988_s23 + $0x51] sm:$0xff]  ;;  %v4672_v4 = vld [vmem:[%s4988_s23 + $0x49] sm:$0xff] }
 0x51c   : > { %3429 = vrot.lane.b32.xlu0 %v3335_v18, %s4940_s29 }
 0x51d   : > { %v3029_v19 = vpop.permute.xlu1 %3028 }
 0x51e   : > { %3102 = vst.msk [vmem:[#allocation2 + $0xb0] sm:$0xff] %vm1030_vm4, %v3029_v19  ;;  %v2871_v54 = vpop.permute.xlu0 %2870 }
 0x51f   : > { %2943 = vst.msk [vmem:[#allocation2 + $0xb8] sm:$0xff] %vm837_vm3, %v2871_v54  ;;  %3623 = vrot.lane.b32.xlu1 %v3528_v42, %s4941_s15 }
 0x520   : > { %3621 = vrot.lane.b32.xlu0 %v3527_v23, %s4941_s15 }
 0x521   : > { %v3794_v31 = vpop.permute.xlu1 %3793 }
 0x522   : > { %3869 = vst.msk [vmem:[#allocation2 + $0xa0] sm:$0xff] %vm1803_vm9, %v3794_v31  ;;  %v3604_v38 = vpop.permute.xlu0 %3603 }
 0x523   : > { %3678 = vst.msk [vmem:[#allocation2 + $0xa8] sm:$0xff] %vm1610_vm8, %v3604_v38  ;;  %3815 = vrot.lane.b32.xlu1 %v3720_v7, %s4942_s16 }
 0x524   : > { %3813 = vrot.lane.b32.xlu0 %v3719_v41, %s4942_s16 }
 0x525   : > { %v3221_v44 = vpop.permute.xlu1 %3220 }
 0x526   : > { %3294 = vst.msk [vmem:[#allocation2 + $0xb0] sm:$0xff] %vm1223_vm5, %v3221_v44  ;;  %v3031_v50 = vpop.permute.xlu0 %3030 }
 0x527   : > { %3103 = vst.msk [vmem:[#allocation2 + $0xb8] sm:$0xff] %vm1030_vm4, %v3031_v50 }
 0x529   : > { %v3223_v62 = vpop.permute.xlu1 %3222  ;;  %v3901_v55 = vld [vmem:[#allocation2 + $0xa0] sm:$0xff] }
 0x52a   : > { %3295 = vst.msk [vmem:[#allocation2 + $0xb8] sm:$0xff] %vm1223_vm5, %v3223_v62  ;;  %v3796_v57 = vpop.permute.xlu0 %3795  ;;  %4875 = vmatprep.mubr.msk.f32.mxu1 %vm1880_vm10, %v3901_v55 }
 0x52b   : > { %3870 = vst.msk [vmem:[#allocation2 + $0xa8] sm:$0xff] %vm1803_vm9, %v3796_v57 }
 0x52d   : > { %v2873_v32 = vpop.permute.xlu1 %2872 }
 0x52e   : > { %2944 = vst.msk [vmem:[#allocation2 + $0xc0] sm:$0xff] %vm837_vm3, %v2873_v32  ;;  %v3414_v33 = vpop.permute.xlu0 %3413 }
 0x52f   : > { %3487 = vst.msk [vmem:[#allocation2 + $0xb0] sm:$0xff] %vm1417_vm7, %v3414_v33  ;;  %v4675_v33 = vld [vmem:[%s4988_s23 + $0x69] sm:$0xff] }
 0x531   : > { %v3606_v43 = vpop.permute.xlu1 %3605 }
 0x532   : > { %3679 = vst.msk [vmem:[#allocation2 + $0xb0] sm:$0xff] %vm1610_vm8, %v3606_v43  ;;  %v4847_v0 = vpop.f32.mrb[0].mxu1  ;;  %v3416_v13 = vpop.permute.xlu0 %3415  ;;  %v3902_v34 = vld [vmem:[#allocation2 + $0xa8] sm:$0xff] }
 0x533   : > { %v4096_v49 = vadd.f32 %v4847_v0, %v7264_v37  ;;  %3488 = vst.msk [vmem:[#allocation2 + $0xb8] sm:$0xff] %vm1417_vm7, %v3416_v13  ;;  %v4090_v28 = vpop.f32.mrb[1].mxu1  ;;  %4876 = vmatmul.mubr.msk.f32.gmra.mrb[20].mxu1 %vm1880_vm10, %v3902_v34 }
 0x534   : > { %v4091_v52 = vadd.f32 %v7264_v37, %v4090_v28 }
 0x535   : > { %v4282_v11 = vadd.f32 %v4669_v46, %v4096_v49  ;;  %v3033_v56 = vpop.permute.xlu1 %3032  ;;  %v4674_v46 = vld [vmem:[%s4988_s23 + $0x61] sm:$0xff] }
 0x536   : > { %v4281_v36 = vadd.f32 %v4668_v2, %v4091_v52  ;;  %3104 = vst.msk [vmem:[#allocation2 + $0xc0] sm:$0xff] %vm1030_vm4, %v3033_v56  ;;  %v2875_v51 = vpop.permute.xlu0 %2874 }
 0x537   : > { %4314 = vst.msk [vmem:[%s7276_s12 + $0x8] sm:$0xff] %vm257_vm0, %v4282_v11 }
 0x538   : > { %2945 = vst.msk [vmem:[#allocation2 + $0xc8] sm:$0xff] %vm837_vm3, %v2875_v51 }
 0x539   : > { %4313 = vst.msk [vmem:[%s7276_s12] sm:$0xff] %vm257_vm0, %v4281_v36  ;;  %v3798_v3 = vpop.permute.xlu1 %3797 }
 0x53a   : > { %3871 = vst.msk [vmem:[#allocation2 + $0xb0] sm:$0xff] %vm1803_vm9, %v3798_v3  ;;  %v3608_v26 = vpop.permute.xlu0 %3607 }
 0x53b   : > { %3680 = vst.msk [vmem:[#allocation2 + $0xb8] sm:$0xff] %vm1610_vm8, %v3608_v26 }
 0x53d   : > { %v3225_v24 = vpop.permute.xlu1 %3224 }
 0x53e   : > { %3296 = vst.msk [vmem:[#allocation2 + $0xc0] sm:$0xff] %vm1223_vm5, %v3225_v24  ;;  %v3035_v10 = vpop.permute.xlu0 %3034 }
 0x53f   : > { %3105 = vst.msk [vmem:[#allocation2 + $0xc8] sm:$0xff] %vm1030_vm4, %v3035_v10 }
 0x541   : > { %v3227_v35 = vpop.permute.xlu1 %3226  ;;  %v3903_v8 = vld [vmem:[#allocation2 + $0xb0] sm:$0xff] }
 0x542   : > { %3297 = vst.msk [vmem:[#allocation2 + $0xc8] sm:$0xff] %vm1223_vm5, %v3227_v35  ;;  %v3800_v12 = vpop.permute.xlu0 %3799  ;;  %4878 = vmatprep.mubr.msk.f32.mxu1 %vm1880_vm10, %v3903_v8 }
 0x543   : > { %3872 = vst.msk [vmem:[#allocation2 + $0xb8] sm:$0xff] %vm1803_vm9, %v3800_v12  ;;  %v4677_v12 = vld [vmem:[%s4988_s23 + $0x81] sm:$0xff] }
 0x545   : > { %v2877_v17 = vpop.permute.xlu1 %2876 }
 0x546   : > { %2946 = vst.msk [vmem:[#allocation2 + $0xd0] sm:$0xff] %vm837_vm3, %v2877_v17  ;;  %v3418_v22 = vpop.permute.xlu0 %3417  ;;  %v4850_v20 = vpop.f32.mrb[2].mxu1 }
 0x547   : > { %3489 = vst.msk [vmem:[#allocation2 + $0xc0] sm:$0xff] %vm1417_vm7, %v3418_v22  ;;  %v4106_v59 = vadd.f32 %v4850_v20, %v7264_v37  ;;  %v4100_v1 = vpop.f32.mrb[3].mxu1  ;;  %v4676_v20 = vld [vmem:[%s4988_s23 + $0x79] sm:$0xff] }
 0x548   : > { %v4101_v29 = vadd.f32 %v7264_v37, %v4100_v1 }
 0x549   : > { %v4284_v5 = vadd.f32 %v4671_v25, %v4106_v59  ;;  %v3610_v58 = vpop.permute.xlu1 %3609 }
 0x54a   : > { %v4283_v53 = vadd.f32 %v4670_v48, %v4101_v29  ;;  %3681 = vst.msk [vmem:[#allocation2 + $0xc0] sm:$0xff] %vm1610_vm8, %v3610_v58  ;;  %v3420_v39 = vpop.permute.xlu0 %3419  ;;  %v3904_v40 = vld [vmem:[#allocation2 + $0xb8] sm:$0xff] }
 0x54b   : > { %4316 = vst.msk [vmem:[%s7276_s12 + $0x18] sm:$0xff] %vm257_vm0, %v4284_v5  ;;  %4879 = vmatmul.mubr.msk.f32.gmra.mrb[22].mxu1 %vm1880_vm10, %v3904_v40 }
 0x54c   : > { %3490 = vst.msk [vmem:[#allocation2 + $0xc8] sm:$0xff] %vm1417_vm7, %v3420_v39 }
 0x54d   : > { %4315 = vst.msk [vmem:[%s7276_s12 + $0x10] sm:$0xff] %vm257_vm0, %v4283_v53  ;;  %v3037_v16 = vpop.permute.xlu1 %3036 }
 0x54e   : > { %3106 = vst.msk [vmem:[#allocation2 + $0xd0] sm:$0xff] %vm1030_vm4, %v3037_v16  ;;  %v2879_v27 = vpop.permute.xlu0 %2878 }
 0x54f   : > { %2947 = vst.msk [vmem:[#allocation2 + $0xd8] sm:$0xff] %vm837_vm3, %v2879_v27 }
 0x551   : > { %v3802_v21 = vpop.permute.xlu1 %3801 }
 0x552   : > { %3873 = vst.msk [vmem:[#allocation2 + $0xc0] sm:$0xff] %vm1803_vm9, %v3802_v21  ;;  %v3612_v6 = vpop.permute.xlu0 %3611 }
 0x553   : > { %3682 = vst.msk [vmem:[#allocation2 + $0xc8] sm:$0xff] %vm1610_vm8, %v3612_v6 }
 0x555   : > { %v3229_v14 = vpop.permute.xlu1 %3228 }
 0x556   : > { %3298 = vst.msk [vmem:[#allocation2 + $0xd0] sm:$0xff] %vm1223_vm5, %v3229_v14  ;;  %v3039_v45 = vpop.permute.xlu0 %3038 }
 0x557   : > { %3107 = vst.msk [vmem:[#allocation2 + $0xd8] sm:$0xff] %vm1030_vm4, %v3039_v45 }
 0x559   : > { %v3231_v30 = vpop.permute.xlu1 %3230  ;;  %v3905_v63 = vld [vmem:[#allocation2 + $0xc0] sm:$0xff] }
 0x55a   : > { %3299 = vst.msk [vmem:[#allocation2 + $0xd8] sm:$0xff] %vm1223_vm5, %v3231_v30  ;;  %v3804_v15 = vpop.permute.xlu0 %3803  ;;  %v4853_v61 = vpop.f32.mrb[4].mxu1  ;;  %4881 = vmatprep.mubr.msk.f32.mxu1 %vm1880_vm10, %v3905_v63  ;;  %v4679_v30 = vld [vmem:[%s4988_s23 + $0x99] sm:$0xff] }
 0x55b   : > { %3874 = vst.msk [vmem:[#allocation2 + $0xc8] sm:$0xff] %vm1803_vm9, %v3804_v15  ;;  %v4116_v9 = vadd.f32 %v4853_v61, %v7264_v37  ;;  %v4110_v18 = vpop.f32.mrb[5].mxu1  ;;  %v4678_v61 = vld [vmem:[%s4988_s23 + $0x91] sm:$0xff] }
 0x55c   : > { %v4111_v47 = vadd.f32 %v7264_v37, %v4110_v18 }
 0x55d   : > { %v4286_v42 = vadd.f32 %v4673_v60, %v4116_v9  ;;  %v2881_v19 = vpop.permute.xlu1 %2880 }
 0x55e   : > { %v4285_v23 = vadd.f32 %v4672_v4, %v4111_v47  ;;  %2948 = vst.msk [vmem:[#allocation2 + $0xe0] sm:$0xff] %vm837_vm3, %v2881_v19  ;;  %v3422_v54 = vpop.permute.xlu0 %3421  ;;  %v4681_v19 = vld [vmem:[%s4988_s23 + $0xb1] sm:$0xff] }
 0x55f   : > { %4318 = vst.msk [vmem:[%s7276_s12 + $0x28] sm:$0xff] %vm257_vm0, %v4286_v42 }
 0x560   : > { %3491 = vst.msk [vmem:[#allocation2 + $0xd0] sm:$0xff] %vm1417_vm7, %v3422_v54 }
 0x561   : > { %4317 = vst.msk [vmem:[%s7276_s12 + $0x20] sm:$0xff] %vm257_vm0, %v4285_v23  ;;  %v3614_v7 = vpop.permute.xlu1 %3613 }
 0x562   : > { %3683 = vst.msk [vmem:[#allocation2 + $0xd0] sm:$0xff] %vm1610_vm8, %v3614_v7  ;;  %v3424_v31 = vpop.permute.xlu0 %3423  ;;  %v3906_v41 = vld [vmem:[#allocation2 + $0xc8] sm:$0xff] }
 0x563   : > { %3492 = vst.msk [vmem:[#allocation2 + $0xd8] sm:$0xff] %vm1417_vm7, %v3424_v31  ;;  %4882 = vmatmul.mubr.msk.f32.gmra.mrb[24].mxu1 %vm1880_vm10, %v3906_v41  ;;  %v4680_v7 = vld [vmem:[%s4988_s23 + $0xa9] sm:$0xff] }
 0x565   : > { %v3041_v38 = vpop.permute.xlu1 %3040 }
 0x566   : > { %3108 = vst.msk [vmem:[#allocation2 + $0xe0] sm:$0xff] %vm1030_vm4, %v3041_v38  ;;  %v2883_v44 = vpop.permute.xlu0 %2882 }
 0x567   : > { %2949 = vst.msk [vmem:[#allocation2 + $0xe8] sm:$0xff] %vm837_vm3, %v2883_v44 }
 0x569   : > { %v3806_v50 = vpop.permute.xlu1 %3805 }
 0x56a   : > { %3875 = vst.msk [vmem:[#allocation2 + $0xd0] sm:$0xff] %vm1803_vm9, %v3806_v50  ;;  %v3616_v62 = vpop.permute.xlu0 %3615  ;;  %v4683_v50 = vld [vmem:[%s4988_s23 + $0xc9] sm:$0xff] }
 0x56b   : > { %3684 = vst.msk [vmem:[#allocation2 + $0xd8] sm:$0xff] %vm1610_vm8, %v3616_v62 }
 0x56d   : > { %v3233_v55 = vpop.permute.xlu1 %3232 }
 0x56e   : > { %3300 = vst.msk [vmem:[#allocation2 + $0xe0] sm:$0xff] %vm1223_vm5, %v3233_v55  ;;  %v3043_v57 = vpop.permute.xlu0 %3042  ;;  %v4856_v32 = vpop.f32.mrb[6].mxu1 }
 0x56f   : > { %3109 = vst.msk [vmem:[#allocation2 + $0xe8] sm:$0xff] %vm1030_vm4, %v3043_v57  ;;  %v4126_v43 = vadd.f32 %v4856_v32, %v7264_v37  ;;  %v4120_v0 = vpop.f32.mrb[7].mxu1  ;;  %v4682_v57 = vld [vmem:[%s4988_s23 + $0xc1] sm:$0xff] }
 0x570   : > { %v4121_v13 = vadd.f32 %v7264_v37, %v4120_v0 }
 0x571   : > { %v4288_v34 = vadd.f32 %v4675_v33, %v4126_v43  ;;  %v3235_v49 = vpop.permute.xlu1 %3234  ;;  %v3907_v28 = vld [vmem:[#allocation2 + $0xd0] sm:$0xff] }
 0x572   : > { %v4287_v2 = vadd.f32 %v4674_v46, %v4121_v13  ;;  %3301 = vst.msk [vmem:[#allocation2 + $0xe8] sm:$0xff] %vm1223_vm5, %v3235_v49  ;;  %v3808_v52 = vpop.permute.xlu0 %3807  ;;  %4884 = vmatprep.mubr.msk.f32.mxu1 %vm1880_vm10, %v3907_v28  ;;  %v4685_v46 = vld [vmem:[%s4988_s23 + $0xe1] sm:$0xff]  ;;  %v4684_v49 = vld [vmem:[%s4988_s23 + $0xd9] sm:$0xff] }
 0x573   : > { %4320 = vst.msk [vmem:[%s7276_s12 + $0x38] sm:$0xff] %vm257_vm0, %v4288_v34 }
 0x574   : > { %3876 = vst.msk [vmem:[#allocation2 + $0xd8] sm:$0xff] %vm1803_vm9, %v3808_v52 }
 0x575   : > { %4319 = vst.msk [vmem:[%s7276_s12 + $0x30] sm:$0xff] %vm257_vm0, %v4287_v2  ;;  %v2885_v11 = vpop.permute.xlu1 %2884 }
 0x576   : > { %2950 = vst.msk [vmem:[#allocation2 + $0xf0] sm:$0xff] %vm837_vm3, %v2885_v11  ;;  %v3426_v56 = vpop.permute.xlu0 %3425 }
 0x577   : > { %3493 = vst.msk [vmem:[#allocation2 + $0xe0] sm:$0xff] %vm1417_vm7, %v3426_v56  ;;  %v4687_v56 = vld [vmem:[%s4988_s23 + $0xf9] sm:$0xff] }
 0x579   : > { %v3618_v36 = vpop.permute.xlu1 %3617 }
 0x57a   : > { %3685 = vst.msk [vmem:[#allocation2 + $0xe0] sm:$0xff] %vm1610_vm8, %v3618_v36  ;;  %v3428_v51 = vpop.permute.xlu0 %3427 }
 0x57b   : > { %v3908_v3 = vld [vmem:[#allocation2 + $0xd8] sm:$0xff]  ;;  %3494 = vst.msk [vmem:[#allocation2 + $0xe8] sm:$0xff] %vm1417_vm7, %v3428_v51 }
 0x57c   : > { %4885 = vmatmul.mubr.msk.f32.gmra.mrb[26].mxu1 %vm1880_vm10, %v3908_v3  ;;  %v4686_v3 = vld [vmem:[%s4988_s23 + $0xf1] sm:$0xff] }
 0x57d   : > { %v3045_v26 = vpop.permute.xlu1 %3044 }
 0x57e   : > { %3110 = vst.msk [vmem:[#allocation2 + $0xf0] sm:$0xff] %vm1030_vm4, %v3045_v26  ;;  %v2887_v24 = vpop.permute.xlu0 %2886 }
 0x57f   : > { %2951 = vst.msk [vmem:[#allocation2 + $0xf8] sm:$0xff] %vm837_vm3, %v2887_v24 }
 0x581   : > { %v3810_v10 = vpop.permute.xlu1 %3809 }
 0x582   : > { %3877 = vst.msk [vmem:[#allocation2 + $0xe0] sm:$0xff] %vm1803_vm9, %v3810_v10  ;;  %v3620_v35 = vpop.permute.xlu0 %3619  ;;  %v4859_v8 = vpop.f32.mrb[8].mxu1 }
 0x583   : > { %3686 = vst.msk [vmem:[#allocation2 + $0xe8] sm:$0xff] %vm1610_vm8, %v3620_v35  ;;  %v4136_v17 = vadd.f32 %v4859_v8, %v7264_v37  ;;  %v4130_v22 = vpop.f32.mrb[9].mxu1  ;;  %v4689_v8 = vld [vmem:[%s4988_s23 + $0x111] sm:$0xff] }
 0x584   : > { %v4131_v25 = vadd.f32 %v7264_v37, %v4130_v22  ;;  %v4688_v22 = vld [vmem:[%s4988_s23 + $0x109] sm:$0xff] }
 0x585   : > { %v4290_v59 = vadd.f32 %v4677_v12, %v4136_v17  ;;  %v3237_v1 = vpop.permute.xlu1 %3236 }
 0x586   : > { %v4289_v48 = vadd.f32 %v4676_v20, %v4131_v25  ;;  %3302 = vst.msk [vmem:[#allocation2 + $0xf0] sm:$0xff] %vm1223_vm5, %v3237_v1  ;;  %v3047_v29 = vpop.permute.xlu0 %3046 }
 0x587   : > { %4322 = vst.msk [vmem:[%s7276_s12 + $0x48] sm:$0xff] %vm257_vm0, %v4290_v59 }
 0x588   : > { %3111 = vst.msk [vmem:[#allocation2 + $0xf8] sm:$0xff] %vm1030_vm4, %v3047_v29 }
 0x589   : > { %4321 = vst.msk [vmem:[%s7276_s12 + $0x40] sm:$0xff] %vm257_vm0, %v4289_v48  ;;  %v3239_v5 = vpop.permute.xlu1 %3238  ;;  %v3909_v58 = vld [vmem:[#allocation2 + $0xe0] sm:$0xff]  ;;  %v4691_v48 = vld [vmem:[%s4988_s23 + $0x129] sm:$0xff] }
 0x58a   : > { %3303 = vst.msk [vmem:[#allocation2 + $0xf8] sm:$0xff] %vm1223_vm5, %v3239_v5  ;;  %v3812_v53 = vpop.permute.xlu0 %3811  ;;  %4887 = vmatprep.mubr.msk.f32.mxu1 %vm1880_vm10, %v3909_v58  ;;  %v4690_v58 = vld [vmem:[%s4988_s23 + $0x121] sm:$0xff] }
 0x58b   : > { %3878 = vst.msk [vmem:[#allocation2 + $0xe8] sm:$0xff] %vm1803_vm9, %v3812_v53 }
 0x58d   : > { %v3432_v39 = vpop.permute.xlu1 %3431 }
 0x58e   : > { %v3430_v40 = vpop.permute.xlu0 %3429  ;;  %3496 = vst.msk [vmem:[#allocation2 + $0xf8] sm:$0xff] %vm1417_vm7, %v3432_v39 }
 0x58f   : > { %3495 = vst.msk [vmem:[#allocation2 + $0xf0] sm:$0xff] %vm1417_vm7, %v3430_v40 }
 0x591   : > { %v3624_v16 = vpop.permute.xlu1 %3623 }
 0x592   : > { %v3622_v27 = vpop.permute.xlu0 %3621  ;;  %3688 = vst.msk [vmem:[#allocation2 + $0xf8] sm:$0xff] %vm1610_vm8, %v3624_v16  ;;  %v3910_v21 = vld [vmem:[#allocation2 + $0xe8] sm:$0xff] }
 0x593   : > { %3687 = vst.msk [vmem:[#allocation2 + $0xf0] sm:$0xff] %vm1610_vm8, %v3622_v27  ;;  %4888 = vmatmul.mubr.msk.f32.gmra.mrb[28].mxu1 %vm1880_vm10, %v3910_v21  ;;  %v4693_v27 = vld [vmem:[%s4988_s23 + $0x141] sm:$0xff] }
 0x595   : > { %v3816_v6 = vpop.permute.xlu1 %3815 }
 0x596   : > { %v3814_v14 = vpop.permute.xlu0 %3813  ;;  %v4862_v45 = vpop.f32.mrb[10].mxu1  ;;  %3880 = vst.msk [vmem:[#allocation2 + $0xf8] sm:$0xff] %vm1803_vm9, %v3816_v6 }
 0x597   : > { %3879 = vst.msk [vmem:[#allocation2 + $0xf0] sm:$0xff] %vm1803_vm9, %v3814_v14  ;;  %v4146_v63 = vadd.f32 %v4862_v45, %v7264_v37  ;;  %v4140_v15 = vpop.f32.mrb[11].mxu1  ;;  %v4692_v14 = vld [vmem:[%s4988_s23 + $0x139] sm:$0xff] }
 0x598   : > { %v4141_v60 = vadd.f32 %v7264_v37, %v4140_v15 }
 0x599   : > { %v4292_v9 = vadd.f32 %v4679_v30, %v4146_v63 }
 0x59a   : > { %v4291_v18 = vadd.f32 %v4678_v61, %v4141_v60  ;;  %v4695_v61 = vld [vmem:[%s4988_s23 + $0x159] sm:$0xff] }
 0x59b   : > { %4324 = vst.msk [vmem:[%s7276_s12 + $0x58] sm:$0xff] %vm257_vm0, %v4292_v9 }
 0x59c   : > { %4323 = vst.msk [vmem:[%s7276_s12 + $0x50] sm:$0xff] %vm257_vm0, %v4291_v18  ;;  %v4694_v18 = vld [vmem:[%s4988_s23 + $0x151] sm:$0xff] }
 0x59d   : > { %v3912_v4 = vld [vmem:[#allocation2 + $0xf8] sm:$0xff] }
 0x59e   : > { %v3911_v47 = vld [vmem:[#allocation2 + $0xf0] sm:$0xff] }
 0x59f   : > { %4890 = vmatprep.mubr.msk.f32.mxu1 %vm1880_vm10, %v3911_v47 }
 0x5a0   : > { %4891 = vmatmul.mubr.msk.f32.gmra.mrb[30].mxu1 %vm1880_vm10, %v3912_v4 }
 0x5aa   : > { %v4865_v42 = vpop.f32.mrb[12].mxu1 }
 0x5ab   : > { %v4156_v23 = vadd.f32 %v4865_v42, %v7264_v37  ;;  %v4150_v54 = vpop.f32.mrb[13].mxu1 }
 0x5ac   : > { %v4151_v31 = vadd.f32 %v7264_v37, %v4150_v54 }
 0x5ad   : > { %v4294_v41 = vadd.f32 %v4681_v19, %v4156_v23  ;;  %v4697_v23 = vld [vmem:[%s4988_s23 + $0x171] sm:$0xff] }
 0x5ae   : > { %v4293_v38 = vadd.f32 %v4680_v7, %v4151_v31  ;;  %v4696_v31 = vld [vmem:[%s4988_s23 + $0x169] sm:$0xff] }
 0x5af   : > { %4326 = vst.msk [vmem:[%s7276_s12 + $0x68] sm:$0xff] %vm257_vm0, %v4294_v41 }
 0x5b0   : > { %4325 = vst.msk [vmem:[%s7276_s12 + $0x60] sm:$0xff] %vm257_vm0, %v4293_v38 }
 0x5be   : > { %v4868_v44 = vpop.f32.mrb[14].mxu1 }
 0x5bf   : > { %v4166_v62 = vadd.f32 %v4868_v44, %v7264_v37  ;;  %v4160_v55 = vpop.f32.mrb[15].mxu1 }
 0x5c0   : > { %v4161_v32 = vadd.f32 %v7264_v37, %v4160_v55 }
 0x5c1   : > { %v4296_v33 = vadd.f32 %v4683_v50, %v4166_v62  ;;  %v4699_v62 = vld [vmem:[%s4988_s23 + $0x189] sm:$0xff] }
 0x5c2   : > { %v4295_v43 = vadd.f32 %v4682_v57, %v4161_v32  ;;  %v4698_v32 = vld [vmem:[%s4988_s23 + $0x181] sm:$0xff] }
 0x5c3   : > { %4328 = vst.msk [vmem:[%s7276_s12 + $0x78] sm:$0xff] %vm257_vm0, %v4296_v33 }
 0x5c4   : > { %4327 = vst.msk [vmem:[%s7276_s12 + $0x70] sm:$0xff] %vm257_vm0, %v4295_v43 }
 0x5d6   : > { %v4871_v0 = vpop.f32.mrb[16].mxu1 }
 0x5d7   : > { %v4176_v13 = vadd.f32 %v4871_v0, %v7264_v37  ;;  %v4170_v34 = vpop.f32.mrb[17].mxu1 }
 0x5d8   : > { %v4171_v28 = vadd.f32 %v7264_v37, %v4170_v34 }
 0x5d9   : > { %v4298_v2 = vadd.f32 %v4685_v46, %v4176_v13 }
 0x5da   : > { %v4297_v52 = vadd.f32 %v4684_v49, %v4171_v28 }
 0x5db   : > { %4330 = vst.msk [vmem:[%s7276_s12 + $0x88] sm:$0xff] %vm257_vm0, %v4298_v2 }
 0x5dc   : > { %4329 = vst.msk [vmem:[%s7276_s12 + $0x80] sm:$0xff] %vm257_vm0, %v4297_v52 }
 0x5ee   : > { %v4874_v11 = vpop.f32.mrb[18].mxu1 }
 0x5ef   : > { %v4186_v36 = vadd.f32 %v4874_v11, %v7264_v37  ;;  %v4180_v51 = vpop.f32.mrb[19].mxu1 }
 0x5f0   : > { %v4181_v26 = vadd.f32 %v7264_v37, %v4180_v51 }
 0x5f1   : > { %v4300_v24 = vadd.f32 %v4687_v56, %v4186_v36 }
 0x5f2   : > { %v4299_v10 = vadd.f32 %v4686_v3, %v4181_v26 }
 0x5f3   : > { %4332 = vst.msk [vmem:[%s7276_s12 + $0x98] sm:$0xff] %vm257_vm0, %v4300_v24 }
 0x5f4   : > { %4331 = vst.msk [vmem:[%s7276_s12 + $0x90] sm:$0xff] %vm257_vm0, %v4299_v10 }
 0x606   : > { %v4877_v35 = vpop.f32.mrb[20].mxu1 }
 0x607   : > { %v4196_v12 = vadd.f32 %v4877_v35, %v7264_v37  ;;  %v4190_v17 = vpop.f32.mrb[21].mxu1 }
 0x608   : > { %v4191_v20 = vadd.f32 %v7264_v37, %v4190_v17 }
 0x609   : > { %v4302_v25 = vadd.f32 %v4689_v8, %v4196_v12 }
 0x60a   : > { %v4301_v59 = vadd.f32 %v4688_v22, %v4191_v20 }
 0x60b   : > { %4334 = vst.msk [vmem:[%s7276_s12 + $0xa8] sm:$0xff] %vm257_vm0, %v4302_v25 }
 0x60c   : > { %4333 = vst.msk [vmem:[%s7276_s12 + $0xa0] sm:$0xff] %vm257_vm0, %v4301_v59 }
 0x61e   : > { %v4880_v1 = vpop.f32.mrb[22].mxu1 }
 0x61f   : > { %v4206_v29 = vadd.f32 %v4880_v1, %v7264_v37  ;;  %v4200_v5 = vpop.f32.mrb[23].mxu1 }
 0x620   : > { %v4201_v53 = vadd.f32 %v7264_v37, %v4200_v5 }
 0x621   : > { %v4304_v39 = vadd.f32 %v4691_v48, %v4206_v29 }
 0x622   : > { %v4303_v40 = vadd.f32 %v4690_v58, %v4201_v53 }
 0x623   : > { %4336 = vst.msk [vmem:[%s7276_s12 + $0xb8] sm:$0xff] %vm257_vm0, %v4304_v39 }
 0x624   : > { %4335 = vst.msk [vmem:[%s7276_s12 + $0xb0] sm:$0xff] %vm257_vm0, %v4303_v40 }
 0x636   : > { %v4883_v16 = vpop.f32.mrb[24].mxu1 }
 0x637   : > { %v4216_v21 = vadd.f32 %v4883_v16, %v7264_v37  ;;  %v4210_v6 = vpop.f32.mrb[25].mxu1 }
 0x638   : > { %v4211_v45 = vadd.f32 %v7264_v37, %v4210_v6 }
 0x639   : > { %v4306_v30 = vadd.f32 %v4693_v27, %v4216_v21 }
 0x63a   : > { %v4305_v63 = vadd.f32 %v4692_v14, %v4211_v45 }
 0x63b   : > { %4338 = vst.msk [vmem:[%s7276_s12 + $0xc8] sm:$0xff] %vm257_vm0, %v4306_v30 }
 0x63c   : > { %4337 = vst.msk [vmem:[%s7276_s12 + $0xc0] sm:$0xff] %vm257_vm0, %v4305_v63 }
 0x64f   : > { %v4886_v15 = vpop.f32.mrb[26].mxu1 }
 0x650   : > { %v4226_v60 = vadd.f32 %v4886_v15, %v7264_v37  ;;  %v4220_v9 = vpop.f32.mrb[27].mxu1 }
 0x651   : > { %v4221_v4 = vadd.f32 %v7264_v37, %v4220_v9 }
 0x652   : > { %v4308_v47 = vadd.f32 %v4695_v61, %v4226_v60 }
 0x653   : > { %v4307_v42 = vadd.f32 %v4694_v18, %v4221_v4 }
 0x654   : > { %4340 = vst.msk [vmem:[%s7276_s12 + $0xd8] sm:$0xff] %vm257_vm0, %v4308_v47 }
 0x655   : > { %4339 = vst.msk [vmem:[%s7276_s12 + $0xd0] sm:$0xff] %vm257_vm0, %v4307_v42 }
 0x666   : > { %v4889_v19 = vpop.f32.mrb[28].mxu1 }
 0x667   : > { %v4236_v54 = vadd.f32 %v4889_v19, %v7264_v37  ;;  %v4230_v7 = vpop.f32.mrb[29].mxu1 }
 0x668   : > { %v4231_v41 = vadd.f32 %v7264_v37, %v4230_v7 }
 0x669   : > { %v4310_v38 = vadd.f32 %v4697_v23, %v4236_v54 }
 0x66a   : > { %v4309_v44 = vadd.f32 %v4696_v31, %v4231_v41 }
 0x66b   : > { %4342 = vst.msk [vmem:[%s7276_s12 + $0xe8] sm:$0xff] %vm257_vm0, %v4310_v38 }
 0x66c   : > { %4341 = vst.msk [vmem:[%s7276_s12 + $0xe0] sm:$0xff] %vm257_vm0, %v4309_v44 }
 0x673   : > { %v4892_v50 = vpop.f32.mrb[30].mxu1 }
 0x674   : > { %v4246_v55 = vadd.f32 %v4892_v50, %v7264_v37  ;;  %v4240_v57 = vpop.f32.mrb[31].mxu1 }
 0x675   : > { %v4241_v33 = vadd.f32 %v7264_v37, %v4240_v57 }
 0x676   : > { %v4312_v43 = vadd.f32 %v4699_v62, %v4246_v55 }
 0x677   : > { %v4311_v0 = vadd.f32 %v4698_v32, %v4241_v33 }
 0x678   : > { %4344 = vst.msk [vmem:[%s7276_s12 + $0xf8] sm:$0xff] %vm257_vm0, %v4312_v43 }
 0x679   : > { %4343 = vst.msk [vmem:[%s7276_s12 + $0xf0] sm:$0xff] %vm257_vm0, %v4311_v0 }
 0x67a PF: > { %s15_s18 = sadd.s32 1, %s4933_s18  }
 0x67b   : > { %p12_p4 = scmp.ge.s32.totalorder %s15_s18, 4  }
 0x67d   :  { %14 = sbr.rel (!%p12_p4) target bundleno = 1 (0x1), region = 75 }

</bundles_post_ra>
